<compile_context>
chip_gen: v7x
topology: tpu7x:2x2x1
jax: 0.10.0
libtpu: 0.0.40
codegen_flags: <defaults>
</compile_context>

<pallas_src>
import math
import functools

import jax
import jax.numpy as jnp
from jax import lax
from jax.experimental import pallas as pl
from jax.experimental.pallas import tpu as pltpu


# ----------------------------- in-kernel helpers -----------------------------

def _layernorm(x, alpha, beta, eps=1e-6):
    """torch-style LayerNormalization: scalar alpha/beta, unbiased std."""
    d = x.shape[-1]
    mean = jnp.mean(x, axis=-1, keepdims=True)
    diff = x - mean
    var = jnp.sum(diff * diff, axis=-1, keepdims=True) * (1.0 / (d - 1))
    return alpha * diff / (jnp.sqrt(var) + eps) + beta        # exact divide


def _mha_q_only(q_in, k, v, wq, bq, wo, bo, bias, n_heads):
    """Attention of a (Sq, D) query tile against cached bf16 K/V (Sk, D).

    1/sqrt(d_k) is pre-folded into wq/bq; `bias` is the additive mask (Sq, Sk).
    Per-head P@V results are concatenated into a single lane-dense (Sq, D)
    value so W_o runs as one full-D contraction and no masked sub-128-lane
    stores are emitted.
    """
    d_model = q_in.shape[-1]
    d_k = d_model // n_heads
    q = (jnp.dot(q_in.astype(jnp.bfloat16), wq,
                 preferred_element_type=jnp.float32) + bq).astype(jnp.bfloat16)
    # TODO(synk): at high head counts, replace this static per-head loop with a
    # head-batched dot_general ((H,Sq,d_k) x (H,Sk,d_k)) to bound vreg ranges.
    heads = []
    for h in range(n_heads):
        lo = h * d_k
        s = lax.dot_general(q[:, lo:lo + d_k], k[:, lo:lo + d_k],
                            (((1,), (1,)), ((), ())),
                            preferred_element_type=jnp.float32)
        s = s + bias
        s = s - jnp.max(s, axis=-1, keepdims=True)
        p = jnp.exp(s)
        p = p * pl.reciprocal(jnp.sum(p, axis=-1, keepdims=True), approx=True)
        heads.append(jnp.dot(p.astype(jnp.bfloat16), v[:, lo:lo + d_k],
                             preferred_element_type=jnp.float32))
    o = jnp.concatenate(heads, axis=-1).astype(jnp.bfloat16)   # (Sq, D) lane-dense
    return jnp.dot(o, wo, preferred_element_type=jnp.float32) + bo


# --------------------------------- the kernel --------------------------------

def decoder_block_kernel(
        x_ref, enc_ref, tgt_bias_ref, src_bias_ref,
        wq1, bq1, wk1, bk1, wv1, bv1, wo1, bo1,          # self-attention
        wq2, bq2, wk2, bk2, wv2, bv2, wo2, bo2,          # cross-attention
        w1, b1, w2, b2,                                  # feed-forward
        ln_ref,                                          # (3,2) [alpha,beta] SMEM
        out_ref,                                         # (tq, D)
        k1_ref, v1_ref, k2_ref, v2_ref,                  # bf16 K/V caches (VMEM)
        *, n_heads, tq):
    t = pl.program_id(1)

    # Once per batch (seq axis is "arbitrary", so t==0 runs before t>0):
    # project and cache K/V for self- and cross-attention, reused by all tiles.
    @pl.when(t == 0)
    def _fill_kv_caches():
        kv_n = _layernorm(x_ref[...], ln_ref[0, 0], ln_ref[0, 1]).astype(jnp.bfloat16)
        enc_b = enc_ref[...].astype(jnp.bfloat16)
        k1_ref[...] = (jnp.dot(kv_n, wk1[...], preferred_element_type=jnp.float32)
                       + bk1[...]).astype(jnp.bfloat16)
        v1_ref[...] = (jnp.dot(kv_n, wv1[...], preferred_element_type=jnp.float32)
                       + bv1[...]).astype(jnp.bfloat16)
        k2_ref[...] = (jnp.dot(enc_b, wk2[...], preferred_element_type=jnp.float32)
                       + bk2[...]).astype(jnp.bfloat16)
        v2_ref[...] = (jnp.dot(enc_b, wv2[...], preferred_element_type=jnp.float32)
                       + bv2[...]).astype(jnp.bfloat16)

    row0 = pl.multiple_of(t * tq, tq)
    x_t = x_ref[pl.ds(row0, tq), :]                      # (tq, D) residual stream

    # residual connection 0: pre-LN self-attention (dropout = identity)
    q_n = _layernorm(x_t, ln_ref[0, 0], ln_ref[0, 1])
    x_t = x_t + _mha_q_only(q_n, k1_ref[...], v1_ref[...],
                            wq1[...], bq1[...], wo1[...], bo1[...],
                            tgt_bias_ref[...], n_heads)

    # residual connection 1: pre-LN cross-attention against cached encoder K/V
    xn = _layernorm(x_t, ln_ref[1, 0], ln_ref[1, 1])
    x_t = x_t + _mha_q_only(xn, k2_ref[...], v2_ref[...],
                            wq2[...], bq2[...], wo2[...], bo2[...],
                            src_bias_ref[...], n_heads)

    # residual connection 2: pre-LN feed-forward (relu, dropout = identity)
    xn = _layernorm(x_t, ln_ref[2, 0], ln_ref[2, 1])
    h = jnp.maximum(
        jnp.dot(xn.astype(jnp.bfloat16), w1[...],
                preferred_element_type=jnp.float32) + b1[...], 0.0)
    x_t = x_t + jnp.dot(h.astype(jnp.bfloat16), w2[...],
                        preferred_element_type=jnp.float32) + b2[...]

    out_ref[...] = x_t.astype(out_ref.dtype)
    # TODO(synk): for very long S (where (S,D) caches + (tq,S) scores stress the
    # 64 MiB v7x VMEM), switch the attention to a flash-style key-block loop.


# ------------------------------ parameter prep --------------------------------

def prepare_params(params, *, n_heads):
    """One-time prep: bf16 MXU weights, 1/sqrt(d_k) folded into W_q/b_q.

    Done once (not per pallas_call) so no per-step convert/scale HBM pass.
    TODO(synk): on v7x, optionally quantize to fp8 (f32 acc) to relieve VMEM.
    """
    d_model = params["sa_wq"].shape[0]
    scale = 1.0 / math.sqrt(d_model // n_heads)
    out = dict(params)
    for p in ("sa", "ca"):
        out[f"{p}_wq"] = (params[f"{p}_wq"] * scale).astype(jnp.bfloat16)
        out[f"{p}_bq"] = (params[f"{p}_bq"] * scale).astype(jnp.float32)
        for n in ("k", "v", "o"):
            out[f"{p}_w{n}"] = params[f"{p}_w{n}"].astype(jnp.bfloat16)
    out["w1"] = params["w1"].astype(jnp.bfloat16)
    out["w2"] = params["w2"].astype(jnp.bfloat16)
    return out


# --------------------------------- wrapper -----------------------------------

def _default_max_tq():
    # v6e (128 MiB VMEM, 256-wide MXU) benefits from tq=256; v5e (128-wide MXU)
    # and v7x (64 MiB VMEM) stay at 128.
    try:
        kind = jax.devices()[0].device_kind.lower()
        if "v6" in kind:
            return 256
    except Exception:
        pass
    return 128


def _pick_tq(seq_len, max_tq):
    """Largest seq tile <= max_tq dividing S (multiple of 8), else full S."""
    if seq_len <= max_tq:
        return seq_len
    for cand in (256, 128, 64, 32, 16, 8):
        if cand <= max_tq and seq_len % cand == 0:
            return cand
    return seq_len


def _vmem_limit_bytes(S, S_enc, D, d_ff, tq):
    weights = (8 * D * D + 2 * D * d_ff) * 2           # bf16, single-buffered
    biases = (8 * D + d_ff + D) * 4
    xio = 2 * (S * D + S_enc * D + tq * D) * 4         # x, enc, out (double-buffered)
    mask = 2 * (tq * S + tq * S_enc) * 4
    kv = 2 * (S * D + S_enc * D) * 2                   # bf16 K/V caches
    est = weights + biases + xio + mask + kv
    # 2x headroom for compiler temporaries, clamped to v7x physical VMEM.
    return int(min(max(2 * est, 32 * 1024 * 1024), 64 * 1024 * 1024))


def decoder_block(x, enc, tgt_mask, src_mask, params, *, n_heads, max_tq=None):
    """params must already be prepared via prepare_params()."""
    B, S, D = x.shape
    _, S_enc, _ = enc.shape
    d_ff = params["w1"].shape[1]
    if max_tq is None:
        max_tq = _default_max_tq()
    tq = _pick_tq(S, max_tq)
    n_tq = S // tq

    # Additive mask biases precomputed once per call (tiny, outside the kernel).
    tgt_bias = jnp.where(tgt_mask == 0, -1e9, 0.0).astype(jnp.float32)
    src_bias = jnp.where(src_mask == 0, -1e9, 0.0).astype(jnp.float32)

    def run(single_buffer_weights):
        if single_buffer_weights:
            const2d = lambda shape: pl.BlockSpec(shape, lambda b, t: (0, 0),
                                                 pipeline_mode=pl.Buffered(1))
        else:
            const2d = lambda shape: pl.BlockSpec(shape, lambda b, t: (0, 0))

        in_specs = [
            pl.BlockSpec((None, S, D), lambda b, t: (b, 0, 0)),      # x (full seq)
            pl.BlockSpec((None, S_enc, D), lambda b, t: (b, 0, 0)),  # encoder output
            pl.BlockSpec((tq, S), lambda b, t: (t, 0)),              # tgt bias rows
            pl.BlockSpec((tq, S_enc), lambda b, t: (t, 0)),          # src bias rows
        ]
        args = [x, enc, tgt_bias, src_bias]
        for p in ("sa", "ca"):
            for n in ("q", "k", "v", "o"):
                in_specs.append(const2d((D, D)))
                args.append(params[f"{p}_w{n}"])                     # bf16 weights
                in_specs.append(const2d((1, D)))
                args.append(params[f"{p}_b{n}"])                     # f32 biases
        in_specs += [const2d((D, d_ff)), const2d((1, d_ff)),
                     const2d((d_ff, D)), const2d((1, D))]
        args += [params["w1"], params["b1"], params["w2"], params["b2"]]
        in_specs.append(pl.BlockSpec(memory_space=pltpu.MemorySpace.SMEM))
        args.append(params["ln"])

        return pl.pallas_call(
            functools.partial(decoder_block_kernel, n_heads=n_heads, tq=tq),
            out_shape=jax.ShapeDtypeStruct((B, S, D), x.dtype),
            grid=(B, n_tq),
            in_specs=in_specs,
            out_specs=pl.BlockSpec((None, tq, D), lambda b, t: (b, t, 0)),
            scratch_shapes=[pltpu.VMEM((S, D), jnp.bfloat16),       # K1 cache
                            pltpu.VMEM((S, D), jnp.bfloat16),       # V1 cache
                            pltpu.VMEM((S_enc, D), jnp.bfloat16),   # K2 cache
                            pltpu.VMEM((S_enc, D), jnp.bfloat16)],  # V2 cache
            compiler_params=pltpu.CompilerParams(
                dimension_semantics=("parallel", "arbitrary"),
                vmem_limit_bytes=_vmem_limit_bytes(S, S_enc, D, d_ff, tq)),
        )(*args)

    try:
        return run(single_buffer_weights=True)
    except Exception:
        # Fallback for jax builds where pipeline_mode=pl.Buffered(1) is not
        # supported on TPU pallas_call (weights then default to double-buffering).
        return run(single_buffer_weights=False)


# ------------------------------ pure-JAX reference ---------------------------

def _ref_layernorm(x, alpha, beta, eps=1e-6):
    d = x.shape[-1]
    mean = jnp.mean(x, axis=-1, keepdims=True)
    std = jnp.sqrt(jnp.sum((x - mean) ** 2, axis=-1, keepdims=True) / (d - 1))
    return alpha * (x - mean) / (std + eps) + beta


def _ref_mha(xq, xkv, p, prefix, mask, n_heads):
    B, Sq, D = xq.shape
    d_k = D // n_heads
    q = xq @ p[f"{prefix}_wq"] + p[f"{prefix}_bq"]
    k = xkv @ p[f"{prefix}_wk"] + p[f"{prefix}_bk"]
    v = xkv @ p[f"{prefix}_wv"] + p[f"{prefix}_bv"]
    q = q.reshape(B, Sq, n_heads, d_k).transpose(0, 2, 1, 3)
    k = k.reshape(B, -1, n_heads, d_k).transpose(0, 2, 1, 3)
    v = v.reshape(B, -1, n_heads, d_k).transpose(0, 2, 1, 3)
    s = jnp.einsum("bhqd,bhkd->bhqk", q, k) / math.sqrt(d_k)
    s = jnp.where(mask[None, None] == 0, -1e9, s)
    a = jax.nn.softmax(s, axis=-1)
    o = jnp.einsum("bhqk,bhkd->bhqd", a, v).transpose(0, 2, 1, 3).reshape(B, Sq, D)
    return o @ p[f"{prefix}_wo"] + p[f"{prefix}_bo"]


def decoder_block_ref(x, enc, tgt_mask, src_mask, p, *, n_heads):
    ln = p["ln"]
    xn = _ref_layernorm(x, ln[0, 0], ln[0, 1])
    x = x + _ref_mha(xn, xn, p, "sa", tgt_mask, n_heads)
    xn = _ref_layernorm(x, ln[1, 0], ln[1, 1])
    x = x + _ref_mha(xn, enc, p, "ca", src_mask, n_heads)
    xn = _ref_layernorm(x, ln[2, 0], ln[2, 1])
    x = x + jnp.maximum(xn @ p["w1"] + p["b1"], 0.0) @ p["w2"] + p["b2"]
    return x


# ----------------------------------- main ------------------------------------

if __name__ == "__main__":
    B, S, S_enc = 2, 8, 8
    d_model, n_heads, d_ff = 32, 4, 64

    key = jax.random.PRNGKey(0)
    keys = jax.random.split(key, 32)
    ki = iter(range(32))

    def init(shape, scale=0.05):
        return (scale * jax.random.normal(keys[next(ki)], shape)).astype(jnp.float32)

    params = {}
    for p in ("sa", "ca"):
        for n in ("q", "k", "v", "o"):
            params[f"{p}_w{n}"] = init((d_model, d_model))
            params[f"{p}_b{n}"] = init((1, d_model))
    params["w1"] = init((d_model, d_ff))
    params["b1"] = init((1, d_ff))
    params["w2"] = init((d_ff, d_model))
    params["b2"] = init((1, d_model))
    # LayerNormalization params: alpha=1, beta=0 for each of the 3 residuals.
    params["ln"] = jnp.array([[1.0, 0.0]] * 3, dtype=jnp.float32)

    x = init((B, S, d_model), scale=1.0)
    enc = init((B, S_enc, d_model), scale=1.0)
    tgt_mask = jnp.tril(jnp.ones((S, S), jnp.float32))          # causal decoder mask
    src_mask = jnp.ones((S, S_enc), jnp.float32)                # no source padding

    prepped = prepare_params(params, n_heads=n_heads)           # one-time prep
    out = decoder_block(x, enc, tgt_mask, src_mask, prepped, n_heads=n_heads)
    out = jax.block_until_ready(out)

    ref = decoder_block_ref(x, enc, tgt_mask, src_mask, params, n_heads=n_heads)
    assert out.shape == (B, S, d_model)
    # bf16 matmul operands + approx softmax reciprocal -> relaxed tolerance.
    assert jnp.allclose(out, ref, rtol=2e-2, atol=2e-2), \
        float(jnp.max(jnp.abs(out - ref)))

    print("KERNEL_OK")
</pallas_src>

<mosaic_0001>
module attributes {stable_mosaic.version = 11 : i64} {
  func.func @decoder_block_kernel(%arg0: i32, %arg1: i32, %arg2: memref<1x8x32xf32, #tpu.memory_space<vmem>>, %arg3: memref<1x8x32xf32, #tpu.memory_space<vmem>>, %arg4: memref<8x8xf32, #tpu.memory_space<vmem>>, %arg5: memref<8x8xf32, #tpu.memory_space<vmem>>, %arg6: memref<32x32xbf16, #tpu.memory_space<vmem>>, %arg7: memref<1x32xf32, #tpu.memory_space<vmem>>, %arg8: memref<32x32xbf16, #tpu.memory_space<vmem>>, %arg9: memref<1x32xf32, #tpu.memory_space<vmem>>, %arg10: memref<32x32xbf16, #tpu.memory_space<vmem>>, %arg11: memref<1x32xf32, #tpu.memory_space<vmem>>, %arg12: memref<32x32xbf16, #tpu.memory_space<vmem>>, %arg13: memref<1x32xf32, #tpu.memory_space<vmem>>, %arg14: memref<32x32xbf16, #tpu.memory_space<vmem>>, %arg15: memref<1x32xf32, #tpu.memory_space<vmem>>, %arg16: memref<32x32xbf16, #tpu.memory_space<vmem>>, %arg17: memref<1x32xf32, #tpu.memory_space<vmem>>, %arg18: memref<32x32xbf16, #tpu.memory_space<vmem>>, %arg19: memref<1x32xf32, #tpu.memory_space<vmem>>, %arg20: memref<32x32xbf16, #tpu.memory_space<vmem>>, %arg21: memref<1x32xf32, #tpu.memory_space<vmem>>, %arg22: memref<32x64xbf16, #tpu.memory_space<vmem>>, %arg23: memref<1x64xf32, #tpu.memory_space<vmem>>, %arg24: memref<64x32xbf16, #tpu.memory_space<vmem>>, %arg25: memref<1x32xf32, #tpu.memory_space<vmem>>, %arg26: memref<3x2xf32, #tpu.memory_space<smem>>, %arg27: memref<1x8x32xf32, #tpu.memory_space<vmem>>, %arg28: memref<8x32xbf16, #tpu.memory_space<vmem>>, %arg29: memref<8x32xbf16, #tpu.memory_space<vmem>>, %arg30: memref<8x32xbf16, #tpu.memory_space<vmem>>, %arg31: memref<8x32xbf16, #tpu.memory_space<vmem>>) attributes {dimension_semantics = [#tpu.dimension_semantics<parallel>, #tpu.dimension_semantics<arbitrary>], iteration_bounds = array<i64: 2, 1>, scalar_prefetch = 0 : i64, scratch_operands = 4 : i64, tpu.core_type = #tpu.core_type<tc>, window_params = [{transform_indices = @transform_0, window_bounds = array<i64: 1, 8, 32>}, {transform_indices = @transform_1, window_bounds = array<i64: 1, 8, 32>}, {transform_indices = @transform_2, window_bounds = array<i64: 8, 8>}, {transform_indices = @transform_3, window_bounds = array<i64: 8, 8>}, {pipeline_mode = #tpu.pipeline_mode<synchronous>, transform_indices = @transform_4, window_bounds = array<i64: 32, 32>}, {pipeline_mode = #tpu.pipeline_mode<synchronous>, transform_indices = @transform_5, window_bounds = array<i64: 1, 32>}, {pipeline_mode = #tpu.pipeline_mode<synchronous>, transform_indices = @transform_6, window_bounds = array<i64: 32, 32>}, {pipeline_mode = #tpu.pipeline_mode<synchronous>, transform_indices = @transform_7, window_bounds = array<i64: 1, 32>}, {pipeline_mode = #tpu.pipeline_mode<synchronous>, transform_indices = @transform_8, window_bounds = array<i64: 32, 32>}, {pipeline_mode = #tpu.pipeline_mode<synchronous>, transform_indices = @transform_9, window_bounds = array<i64: 1, 32>}, {pipeline_mode = #tpu.pipeline_mode<synchronous>, transform_indices = @transform_10, window_bounds = array<i64: 32, 32>}, {pipeline_mode = #tpu.pipeline_mode<synchronous>, transform_indices = @transform_11, window_bounds = array<i64: 1, 32>}, {pipeline_mode = #tpu.pipeline_mode<synchronous>, transform_indices = @transform_12, window_bounds = array<i64: 32, 32>}, {pipeline_mode = #tpu.pipeline_mode<synchronous>, transform_indices = @transform_13, window_bounds = array<i64: 1, 32>}, {pipeline_mode = #tpu.pipeline_mode<synchronous>, transform_indices = @transform_14, window_bounds = array<i64: 32, 32>}, {pipeline_mode = #tpu.pipeline_mode<synchronous>, transform_indices = @transform_15, window_bounds = array<i64: 1, 32>}, {pipeline_mode = #tpu.pipeline_mode<synchronous>, transform_indices = @transform_16, window_bounds = array<i64: 32, 32>}, {pipeline_mode = #tpu.pipeline_mode<synchronous>, transform_indices = @transform_17, window_bounds = array<i64: 1, 32>}, {pipeline_mode = #tpu.pipeline_mode<synchronous>, transform_indices = @transform_18, window_bounds = array<i64: 32, 32>}, {pipeline_mode = #tpu.pipeline_mode<synchronous>, transform_indices = @transform_19, window_bounds = array<i64: 1, 32>}, {pipeline_mode = #tpu.pipeline_mode<synchronous>, transform_indices = @transform_20, window_bounds = array<i64: 32, 64>}, {pipeline_mode = #tpu.pipeline_mode<synchronous>, transform_indices = @transform_21, window_bounds = array<i64: 1, 64>}, {pipeline_mode = #tpu.pipeline_mode<synchronous>, transform_indices = @transform_22, window_bounds = array<i64: 64, 32>}, {pipeline_mode = #tpu.pipeline_mode<synchronous>, transform_indices = @transform_23, window_bounds = array<i64: 1, 32>}, {transform_indices = @transform_24, window_bounds = array<i64: 3, 2>}, {transform_indices = @transform_25, window_bounds = array<i64: 1, 8, 32>}]} {
    %c0_i32 = arith.constant 0 : i32
    %0 = arith.cmpi eq, %arg1, %c0_i32 : i32
    %1 = arith.extui %0 : i1 to i32
    %c0_i32_0 = arith.constant 0 : i32
    %2 = arith.cmpi ne, %1, %c0_i32_0 : i32
    scf.if %2 {
      %c0_104 = arith.constant 0 : index
      %c0_105 = arith.constant 0 : index
      %c0_106 = arith.constant 0 : index
      %264 = vector.load %arg2[%c0_104, %c0_105, %c0_106] : memref<1x8x32xf32, #tpu.memory_space<vmem>>, vector<1x8x32xf32>
      %265 = vector.shape_cast %264 : vector<1x8x32xf32> to vector<8x32xf32>
      %c0_107 = arith.constant 0 : index
      %c0_108 = arith.constant 0 : index
      %266 = memref.load %arg26[%c0_107, %c0_108] : memref<3x2xf32, #tpu.memory_space<smem>>
      %c0_109 = arith.constant 0 : index
      %c1_110 = arith.constant 1 : index
      %267 = memref.load %arg26[%c0_109, %c1_110] : memref<3x2xf32, #tpu.memory_space<smem>>
      %cst_111 = arith.constant dense<0.000000e+00> : vector<8xf32>
      %268 = vector.multi_reduction <add>, %265, %cst_111 [1] : vector<8x32xf32> to vector<8xf32>
      %269 = vector.shape_cast %268 : vector<8xf32> to vector<8x1xf32>
      %cst_112 = arith.constant 3.200000e+01 : f32
      %270 = vector.broadcast %cst_112 : f32 to vector<8x1xf32>
      %271 = arith.divf %269, %270 : vector<8x1xf32>
      %272 = vector.broadcast %271 : vector<8x1xf32> to vector<8x32xf32>
      %273 = arith.subf %265, %272 : vector<8x32xf32>
      %274 = arith.mulf %273, %273 : vector<8x32xf32>
      %cst_113 = arith.constant dense<0.000000e+00> : vector<8xf32>
      %275 = vector.multi_reduction <add>, %274, %cst_113 [1] : vector<8x32xf32> to vector<8xf32>
      %276 = vector.shape_cast %275 : vector<8xf32> to vector<8x1xf32>
      %cst_114 = arith.constant 0.0322580636 : f32
      %277 = vector.broadcast %cst_114 : f32 to vector<8x1xf32>
      %278 = arith.mulf %276, %277 : vector<8x1xf32>
      %279 = vector.broadcast %266 : f32 to vector<8x32xf32>
      %280 = arith.mulf %279, %273 : vector<8x32xf32>
      %281 = math.sqrt %278 : vector<8x1xf32>
      %cst_115 = arith.constant 9.99999997E-7 : f32
      %282 = vector.broadcast %cst_115 : f32 to vector<8x1xf32>
      %283 = arith.addf %281, %282 : vector<8x1xf32>
      %284 = vector.broadcast %283 : vector<8x1xf32> to vector<8x32xf32>
      %285 = arith.divf %280, %284 : vector<8x32xf32>
      %286 = vector.broadcast %267 : f32 to vector<8x32xf32>
      %287 = arith.addf %285, %286 : vector<8x32xf32>
      %288 = arith.truncf %287 : vector<8x32xf32> to vector<8x32xbf16>
      %c0_116 = arith.constant 0 : index
      %c0_117 = arith.constant 0 : index
      %c0_118 = arith.constant 0 : index
      %289 = vector.load %arg3[%c0_116, %c0_117, %c0_118] : memref<1x8x32xf32, #tpu.memory_space<vmem>>, vector<1x8x32xf32>
      %290 = vector.shape_cast %289 : vector<1x8x32xf32> to vector<8x32xf32>
      %291 = arith.truncf %290 : vector<8x32xf32> to vector<8x32xbf16>
      %c0_119 = arith.constant 0 : index
      %c0_120 = arith.constant 0 : index
      %292 = vector.load %arg8[%c0_119, %c0_120] : memref<32x32xbf16, #tpu.memory_space<vmem>>, vector<32x32xbf16>
      %cst_121 = arith.constant dense<0.000000e+00> : vector<8x32xf32>
      %293 = tpu.matmul %288, %292, %cst_121 {dimension_numbers = #tpu.dot_dimension_numbers<[1], [0], [0], [1], [0, 0, 1, 1], [], []>} : vector<8x32xbf16>, vector<32x32xbf16>, vector<8x32xf32> -> vector<8x32xf32>
      %c0_122 = arith.constant 0 : index
      %c0_123 = arith.constant 0 : index
      %294 = vector.load %arg9[%c0_122, %c0_123] : memref<1x32xf32, #tpu.memory_space<vmem>>, vector<1x32xf32>
      %295 = vector.broadcast %294 : vector<1x32xf32> to vector<8x32xf32>
      %296 = arith.addf %293, %295 : vector<8x32xf32>
      %297 = arith.truncf %296 : vector<8x32xf32> to vector<8x32xbf16>
      %c0_124 = arith.constant 0 : index
      %c0_125 = arith.constant 0 : index
      %298 = vector.load %arg28[%c0_124, %c0_125] : memref<8x32xbf16, #tpu.memory_space<vmem>>, vector<8x32xbf16>
      tpu.vector_store %arg28[%c0_124, %c0_125], %297 {strides = array<i32>} : memref<8x32xbf16, #tpu.memory_space<vmem>>, vector<8x32xbf16>,
      %c0_126 = arith.constant 0 : index
      %c0_127 = arith.constant 0 : index
      %299 = vector.load %arg10[%c0_126, %c0_127] : memref<32x32xbf16, #tpu.memory_space<vmem>>, vector<32x32xbf16>
      %cst_128 = arith.constant dense<0.000000e+00> : vector<8x32xf32>
      %300 = tpu.matmul %288, %299, %cst_128 {dimension_numbers = #tpu.dot_dimension_numbers<[1], [0], [0], [1], [0, 0, 1, 1], [], []>} : vector<8x32xbf16>, vector<32x32xbf16>, vector<8x32xf32> -> vector<8x32xf32>
      %c0_129 = arith.constant 0 : index
      %c0_130 = arith.constant 0 : index
      %301 = vector.load %arg11[%c0_129, %c0_130] : memref<1x32xf32, #tpu.memory_space<vmem>>, vector<1x32xf32>
      %302 = vector.broadcast %301 : vector<1x32xf32> to vector<8x32xf32>
      %303 = arith.addf %300, %302 : vector<8x32xf32>
      %304 = arith.truncf %303 : vector<8x32xf32> to vector<8x32xbf16>
      %c0_131 = arith.constant 0 : index
      %c0_132 = arith.constant 0 : index
      %305 = vector.load %arg29[%c0_131, %c0_132] : memref<8x32xbf16, #tpu.memory_space<vmem>>, vector<8x32xbf16>
      tpu.vector_store %arg29[%c0_131, %c0_132], %304 {strides = array<i32>} : memref<8x32xbf16, #tpu.memory_space<vmem>>, vector<8x32xbf16>,
      %c0_133 = arith.constant 0 : index
      %c0_134 = arith.constant 0 : index
      %306 = vector.load %arg16[%c0_133, %c0_134] : memref<32x32xbf16, #tpu.memory_space<vmem>>, vector<32x32xbf16>
      %cst_135 = arith.constant dense<0.000000e+00> : vector<8x32xf32>
      %307 = tpu.matmul %291, %306, %cst_135 {dimension_numbers = #tpu.dot_dimension_numbers<[1], [0], [0], [1], [0, 0, 1, 1], [], []>} : vector<8x32xbf16>, vector<32x32xbf16>, vector<8x32xf32> -> vector<8x32xf32>
      %c0_136 = arith.constant 0 : index
      %c0_137 = arith.constant 0 : index
      %308 = vector.load %arg17[%c0_136, %c0_137] : memref<1x32xf32, #tpu.memory_space<vmem>>, vector<1x32xf32>
      %309 = vector.broadcast %308 : vector<1x32xf32> to vector<8x32xf32>
      %310 = arith.addf %307, %309 : vector<8x32xf32>
      %311 = arith.truncf %310 : vector<8x32xf32> to vector<8x32xbf16>
      %c0_138 = arith.constant 0 : index
      %c0_139 = arith.constant 0 : index
      %312 = vector.load %arg30[%c0_138, %c0_139] : memref<8x32xbf16, #tpu.memory_space<vmem>>, vector<8x32xbf16>
      tpu.vector_store %arg30[%c0_138, %c0_139], %311 {strides = array<i32>} : memref<8x32xbf16, #tpu.memory_space<vmem>>, vector<8x32xbf16>,
      %c0_140 = arith.constant 0 : index
      %c0_141 = arith.constant 0 : index
      %313 = vector.load %arg18[%c0_140, %c0_141] : memref<32x32xbf16, #tpu.memory_space<vmem>>, vector<32x32xbf16>
      %cst_142 = arith.constant dense<0.000000e+00> : vector<8x32xf32>
      %314 = tpu.matmul %291, %313, %cst_142 {dimension_numbers = #tpu.dot_dimension_numbers<[1], [0], [0], [1], [0, 0, 1, 1], [], []>} : vector<8x32xbf16>, vector<32x32xbf16>, vector<8x32xf32> -> vector<8x32xf32>
      %c0_143 = arith.constant 0 : index
      %c0_144 = arith.constant 0 : index
      %315 = vector.load %arg19[%c0_143, %c0_144] : memref<1x32xf32, #tpu.memory_space<vmem>>, vector<1x32xf32>
      %316 = vector.broadcast %315 : vector<1x32xf32> to vector<8x32xf32>
      %317 = arith.addf %314, %316 : vector<8x32xf32>
      %318 = arith.truncf %317 : vector<8x32xf32> to vector<8x32xbf16>
      %c0_145 = arith.constant 0 : index
      %c0_146 = arith.constant 0 : index
      %319 = vector.load %arg31[%c0_145, %c0_146] : memref<8x32xbf16, #tpu.memory_space<vmem>>, vector<8x32xbf16>
      tpu.vector_store %arg31[%c0_145, %c0_146], %318 {strides = array<i32>} : memref<8x32xbf16, #tpu.memory_space<vmem>>, vector<8x32xbf16>,
    } else {
    }
    %c8_i32 = arith.constant 8 : i32
    %3 = arith.muli %arg1, %c8_i32 : i32
    %4 = tpu.assume_multiple %3, 8 : i32
    %c0 = arith.constant 0 : index
    %5 = arith.index_cast %4 : i32 to index
    %c0_1 = arith.constant 0 : index
    %6 = vector.load %arg2[%c0, %5, %c0_1] : memref<1x8x32xf32, #tpu.memory_space<vmem>>, vector<1x8x32xf32>
    %7 = vector.shape_cast %6 : vector<1x8x32xf32> to vector<8x32xf32>
    %c0_2 = arith.constant 0 : index
    %c0_3 = arith.constant 0 : index
    %8 = memref.load %arg26[%c0_2, %c0_3] : memref<3x2xf32, #tpu.memory_space<smem>>
    %c0_4 = arith.constant 0 : index
    %c1 = arith.constant 1 : index
    %9 = memref.load %arg26[%c0_4, %c1] : memref<3x2xf32, #tpu.memory_space<smem>>
    %cst = arith.constant dense<0.000000e+00> : vector<8xf32>
    %10 = vector.multi_reduction <add>, %7, %cst [1] : vector<8x32xf32> to vector<8xf32>
    %11 = vector.shape_cast %10 : vector<8xf32> to vector<8x1xf32>
    %cst_5 = arith.constant 3.200000e+01 : f32
    %12 = vector.broadcast %cst_5 : f32 to vector<8x1xf32>
    %13 = arith.divf %11, %12 : vector<8x1xf32>
    %14 = vector.broadcast %13 : vector<8x1xf32> to vector<8x32xf32>
    %15 = arith.subf %7, %14 : vector<8x32xf32>
    %16 = arith.mulf %15, %15 : vector<8x32xf32>
    %cst_6 = arith.constant dense<0.000000e+00> : vector<8xf32>
    %17 = vector.multi_reduction <add>, %16, %cst_6 [1] : vector<8x32xf32> to vector<8xf32>
    %18 = vector.shape_cast %17 : vector<8xf32> to vector<8x1xf32>
    %cst_7 = arith.constant 0.0322580636 : f32
    %19 = vector.broadcast %cst_7 : f32 to vector<8x1xf32>
    %20 = arith.mulf %18, %19 : vector<8x1xf32>
    %21 = vector.broadcast %8 : f32 to vector<8x32xf32>
    %22 = arith.mulf %21, %15 : vector<8x32xf32>
    %23 = math.sqrt %20 : vector<8x1xf32>
    %cst_8 = arith.constant 9.99999997E-7 : f32
    %24 = vector.broadcast %cst_8 : f32 to vector<8x1xf32>
    %25 = arith.addf %23, %24 : vector<8x1xf32>
    %26 = vector.broadcast %25 : vector<8x1xf32> to vector<8x32xf32>
    %27 = arith.divf %22, %26 : vector<8x32xf32>
    %28 = vector.broadcast %9 : f32 to vector<8x32xf32>
    %29 = arith.addf %27, %28 : vector<8x32xf32>
    %c0_9 = arith.constant 0 : index
    %c0_10 = arith.constant 0 : index
    %30 = vector.load %arg28[%c0_9, %c0_10] : memref<8x32xbf16, #tpu.memory_space<vmem>>, vector<8x32xbf16>
    %c0_11 = arith.constant 0 : index
    %c0_12 = arith.constant 0 : index
    %31 = vector.load %arg29[%c0_11, %c0_12] : memref<8x32xbf16, #tpu.memory_space<vmem>>, vector<8x32xbf16>
    %c0_13 = arith.constant 0 : index
    %c0_14 = arith.constant 0 : index
    %32 = vector.load %arg6[%c0_13, %c0_14] : memref<32x32xbf16, #tpu.memory_space<vmem>>, vector<32x32xbf16>
    %c0_15 = arith.constant 0 : index
    %c0_16 = arith.constant 0 : index
    %33 = vector.load %arg7[%c0_15, %c0_16] : memref<1x32xf32, #tpu.memory_space<vmem>>, vector<1x32xf32>
    %c0_17 = arith.constant 0 : index
    %c0_18 = arith.constant 0 : index
    %34 = vector.load %arg12[%c0_17, %c0_18] : memref<32x32xbf16, #tpu.memory_space<vmem>>, vector<32x32xbf16>
    %c0_19 = arith.constant 0 : index
    %c0_20 = arith.constant 0 : index
    %35 = vector.load %arg13[%c0_19, %c0_20] : memref<1x32xf32, #tpu.memory_space<vmem>>, vector<1x32xf32>
    %c0_21 = arith.constant 0 : index
    %c0_22 = arith.constant 0 : index
    %36 = vector.load %arg4[%c0_21, %c0_22] : memref<8x8xf32, #tpu.memory_space<vmem>>, vector<8x8xf32>
    %37 = arith.truncf %29 : vector<8x32xf32> to vector<8x32xbf16>
    %cst_23 = arith.constant dense<0.000000e+00> : vector<8x32xf32>
    %38 = tpu.matmul %37, %32, %cst_23 {dimension_numbers = #tpu.dot_dimension_numbers<[1], [0], [0], [1], [0, 0, 1, 1], [], []>} : vector<8x32xbf16>, vector<32x32xbf16>, vector<8x32xf32> -> vector<8x32xf32>
    %39 = vector.broadcast %33 : vector<1x32xf32> to vector<8x32xf32>
    %40 = arith.addf %38, %39 : vector<8x32xf32>
    %41 = arith.truncf %40 : vector<8x32xf32> to vector<8x32xbf16>
    %42 = vector.extract_strided_slice %41 {offsets = [0, 0], sizes = [8, 8], strides = [1, 1]} : vector<8x32xbf16> to vector<8x8xbf16>
    %43 = vector.extract_strided_slice %30 {offsets = [0, 0], sizes = [8, 8], strides = [1, 1]} : vector<8x32xbf16> to vector<8x8xbf16>
    %cst_24 = arith.constant dense<0.000000e+00> : vector<8x8xf32>
    %44 = tpu.matmul %42, %43, %cst_24 {dimension_numbers = #tpu.dot_dimension_numbers<[1], [1], [0], [0], [0, 0, 1, 0], [], []>} : vector<8x8xbf16>, vector<8x8xbf16>, vector<8x8xf32> -> vector<8x8xf32>
    %45 = arith.addf %44, %36 : vector<8x8xf32>
    %cst_25 = arith.constant dense<0xFF800000> : vector<8xf32>
    %46 = vector.multi_reduction <maximumf>, %45, %cst_25 [1] : vector<8x8xf32> to vector<8xf32>
    %47 = vector.shape_cast %46 : vector<8xf32> to vector<8x1xf32>
    %48 = vector.broadcast %47 : vector<8x1xf32> to vector<8x8xf32>
    %49 = arith.subf %45, %48 : vector<8x8xf32>
    %50 = math.exp %49 : vector<8x8xf32>
    %cst_26 = arith.constant dense<0.000000e+00> : vector<8xf32>
    %51 = vector.multi_reduction <add>, %50, %cst_26 [1] : vector<8x8xf32> to vector<8xf32>
    %52 = vector.shape_cast %51 : vector<8xf32> to vector<8x1xf32>
    %53 = tpu.reciprocal %52 {approx = true} : vector<8x1xf32> -> vector<8x1xf32>
    %54 = vector.broadcast %53 : vector<8x1xf32> to vector<8x8xf32>
    %55 = arith.mulf %50, %54 : vector<8x8xf32>
    %56 = arith.truncf %55 : vector<8x8xf32> to vector<8x8xbf16>
    %57 = vector.extract_strided_slice %31 {offsets = [0, 0], sizes = [8, 8], strides = [1, 1]} : vector<8x32xbf16> to vector<8x8xbf16>
    %cst_27 = arith.constant dense<0.000000e+00> : vector<8x8xf32>
    %58 = tpu.matmul %56, %57, %cst_27 {dimension_numbers = #tpu.dot_dimension_numbers<[1], [0], [0], [1], [0, 0, 1, 1], [], []>} : vector<8x8xbf16>, vector<8x8xbf16>, vector<8x8xf32> -> vector<8x8xf32>
    %59 = vector.extract_strided_slice %41 {offsets = [0, 8], sizes = [8, 8], strides = [1, 1]} : vector<8x32xbf16> to vector<8x8xbf16>
    %60 = vector.extract_strided_slice %30 {offsets = [0, 8], sizes = [8, 8], strides = [1, 1]} : vector<8x32xbf16> to vector<8x8xbf16>
    %cst_28 = arith.constant dense<0.000000e+00> : vector<8x8xf32>
    %61 = tpu.matmul %59, %60, %cst_28 {dimension_numbers = #tpu.dot_dimension_numbers<[1], [1], [0], [0], [0, 0, 1, 0], [], []>} : vector<8x8xbf16>, vector<8x8xbf16>, vector<8x8xf32> -> vector<8x8xf32>
    %62 = arith.addf %61, %36 : vector<8x8xf32>
    %cst_29 = arith.constant dense<0xFF800000> : vector<8xf32>
    %63 = vector.multi_reduction <maximumf>, %62, %cst_29 [1] : vector<8x8xf32> to vector<8xf32>
    %64 = vector.shape_cast %63 : vector<8xf32> to vector<8x1xf32>
    %65 = vector.broadcast %64 : vector<8x1xf32> to vector<8x8xf32>
    %66 = arith.subf %62, %65 : vector<8x8xf32>
    %67 = math.exp %66 : vector<8x8xf32>
    %cst_30 = arith.constant dense<0.000000e+00> : vector<8xf32>
    %68 = vector.multi_reduction <add>, %67, %cst_30 [1] : vector<8x8xf32> to vector<8xf32>
    %69 = vector.shape_cast %68 : vector<8xf32> to vector<8x1xf32>
    %70 = tpu.reciprocal %69 {approx = true} : vector<8x1xf32> -> vector<8x1xf32>
    %71 = vector.broadcast %70 : vector<8x1xf32> to vector<8x8xf32>
    %72 = arith.mulf %67, %71 : vector<8x8xf32>
    %73 = arith.truncf %72 : vector<8x8xf32> to vector<8x8xbf16>
    %74 = vector.extract_strided_slice %31 {offsets = [0, 8], sizes = [8, 8], strides = [1, 1]} : vector<8x32xbf16> to vector<8x8xbf16>
    %cst_31 = arith.constant dense<0.000000e+00> : vector<8x8xf32>
    %75 = tpu.matmul %73, %74, %cst_31 {dimension_numbers = #tpu.dot_dimension_numbers<[1], [0], [0], [1], [0, 0, 1, 1], [], []>} : vector<8x8xbf16>, vector<8x8xbf16>, vector<8x8xf32> -> vector<8x8xf32>
    %76 = vector.extract_strided_slice %41 {offsets = [0, 16], sizes = [8, 8], strides = [1, 1]} : vector<8x32xbf16> to vector<8x8xbf16>
    %77 = vector.extract_strided_slice %30 {offsets = [0, 16], sizes = [8, 8], strides = [1, 1]} : vector<8x32xbf16> to vector<8x8xbf16>
    %cst_32 = arith.constant dense<0.000000e+00> : vector<8x8xf32>
    %78 = tpu.matmul %76, %77, %cst_32 {dimension_numbers = #tpu.dot_dimension_numbers<[1], [1], [0], [0], [0, 0, 1, 0], [], []>} : vector<8x8xbf16>, vector<8x8xbf16>, vector<8x8xf32> -> vector<8x8xf32>
    %79 = arith.addf %78, %36 : vector<8x8xf32>
    %cst_33 = arith.constant dense<0xFF800000> : vector<8xf32>
    %80 = vector.multi_reduction <maximumf>, %79, %cst_33 [1] : vector<8x8xf32> to vector<8xf32>
    %81 = vector.shape_cast %80 : vector<8xf32> to vector<8x1xf32>
    %82 = vector.broadcast %81 : vector<8x1xf32> to vector<8x8xf32>
    %83 = arith.subf %79, %82 : vector<8x8xf32>
    %84 = math.exp %83 : vector<8x8xf32>
    %cst_34 = arith.constant dense<0.000000e+00> : vector<8xf32>
    %85 = vector.multi_reduction <add>, %84, %cst_34 [1] : vector<8x8xf32> to vector<8xf32>
    %86 = vector.shape_cast %85 : vector<8xf32> to vector<8x1xf32>
    %87 = tpu.reciprocal %86 {approx = true} : vector<8x1xf32> -> vector<8x1xf32>
    %88 = vector.broadcast %87 : vector<8x1xf32> to vector<8x8xf32>
    %89 = arith.mulf %84, %88 : vector<8x8xf32>
    %90 = arith.truncf %89 : vector<8x8xf32> to vector<8x8xbf16>
    %91 = vector.extract_strided_slice %31 {offsets = [0, 16], sizes = [8, 8], strides = [1, 1]} : vector<8x32xbf16> to vector<8x8xbf16>
    %cst_35 = arith.constant dense<0.000000e+00> : vector<8x8xf32>
    %92 = tpu.matmul %90, %91, %cst_35 {dimension_numbers = #tpu.dot_dimension_numbers<[1], [0], [0], [1], [0, 0, 1, 1], [], []>} : vector<8x8xbf16>, vector<8x8xbf16>, vector<8x8xf32> -> vector<8x8xf32>
    %93 = vector.extract_strided_slice %41 {offsets = [0, 24], sizes = [8, 8], strides = [1, 1]} : vector<8x32xbf16> to vector<8x8xbf16>
    %94 = vector.extract_strided_slice %30 {offsets = [0, 24], sizes = [8, 8], strides = [1, 1]} : vector<8x32xbf16> to vector<8x8xbf16>
    %cst_36 = arith.constant dense<0.000000e+00> : vector<8x8xf32>
    %95 = tpu.matmul %93, %94, %cst_36 {dimension_numbers = #tpu.dot_dimension_numbers<[1], [1], [0], [0], [0, 0, 1, 0], [], []>} : vector<8x8xbf16>, vector<8x8xbf16>, vector<8x8xf32> -> vector<8x8xf32>
    %96 = arith.addf %95, %36 : vector<8x8xf32>
    %cst_37 = arith.constant dense<0xFF800000> : vector<8xf32>
    %97 = vector.multi_reduction <maximumf>, %96, %cst_37 [1] : vector<8x8xf32> to vector<8xf32>
    %98 = vector.shape_cast %97 : vector<8xf32> to vector<8x1xf32>
    %99 = vector.broadcast %98 : vector<8x1xf32> to vector<8x8xf32>
    %100 = arith.subf %96, %99 : vector<8x8xf32>
    %101 = math.exp %100 : vector<8x8xf32>
    %cst_38 = arith.constant dense<0.000000e+00> : vector<8xf32>
    %102 = vector.multi_reduction <add>, %101, %cst_38 [1] : vector<8x8xf32> to vector<8xf32>
    %103 = vector.shape_cast %102 : vector<8xf32> to vector<8x1xf32>
    %104 = tpu.reciprocal %103 {approx = true} : vector<8x1xf32> -> vector<8x1xf32>
    %105 = vector.broadcast %104 : vector<8x1xf32> to vector<8x8xf32>
    %106 = arith.mulf %101, %105 : vector<8x8xf32>
    %107 = arith.truncf %106 : vector<8x8xf32> to vector<8x8xbf16>
    %108 = vector.extract_strided_slice %31 {offsets = [0, 24], sizes = [8, 8], strides = [1, 1]} : vector<8x32xbf16> to vector<8x8xbf16>
    %cst_39 = arith.constant dense<0.000000e+00> : vector<8x8xf32>
    %109 = tpu.matmul %107, %108, %cst_39 {dimension_numbers = #tpu.dot_dimension_numbers<[1], [0], [0], [1], [0, 0, 1, 1], [], []>} : vector<8x8xbf16>, vector<8x8xbf16>, vector<8x8xf32> -> vector<8x8xf32>
    %110 = tpu.concatenate %58, %75, %92, %109 in 1 : vector<8x8xf32>, vector<8x8xf32>, vector<8x8xf32>, vector<8x8xf32> -> vector<8x32xf32>
    %111 = arith.truncf %110 : vector<8x32xf32> to vector<8x32xbf16>
    %cst_40 = arith.constant dense<0.000000e+00> : vector<8x32xf32>
    %112 = tpu.matmul %111, %34, %cst_40 {dimension_numbers = #tpu.dot_dimension_numbers<[1], [0], [0], [1], [0, 0, 1, 1], [], []>} : vector<8x32xbf16>, vector<32x32xbf16>, vector<8x32xf32> -> vector<8x32xf32>
    %113 = vector.broadcast %35 : vector<1x32xf32> to vector<8x32xf32>
    %114 = arith.addf %112, %113 : vector<8x32xf32>
    %115 = arith.addf %7, %114 : vector<8x32xf32>
    %c1_41 = arith.constant 1 : index
    %c0_42 = arith.constant 0 : index
    %116 = memref.load %arg26[%c1_41, %c0_42] : memref<3x2xf32, #tpu.memory_space<smem>>
    %c1_43 = arith.constant 1 : index
    %c1_44 = arith.constant 1 : index
    %117 = memref.load %arg26[%c1_43, %c1_44] : memref<3x2xf32, #tpu.memory_space<smem>>
    %cst_45 = arith.constant dense<0.000000e+00> : vector<8xf32>
    %118 = vector.multi_reduction <add>, %115, %cst_45 [1] : vector<8x32xf32> to vector<8xf32>
    %119 = vector.shape_cast %118 : vector<8xf32> to vector<8x1xf32>
    %cst_46 = arith.constant 3.200000e+01 : f32
    %120 = vector.broadcast %cst_46 : f32 to vector<8x1xf32>
    %121 = arith.divf %119, %120 : vector<8x1xf32>
    %122 = vector.broadcast %121 : vector<8x1xf32> to vector<8x32xf32>
    %123 = arith.subf %115, %122 : vector<8x32xf32>
    %124 = arith.mulf %123, %123 : vector<8x32xf32>
    %cst_47 = arith.constant dense<0.000000e+00> : vector<8xf32>
    %125 = vector.multi_reduction <add>, %124, %cst_47 [1] : vector<8x32xf32> to vector<8xf32>
    %126 = vector.shape_cast %125 : vector<8xf32> to vector<8x1xf32>
    %cst_48 = arith.constant 0.0322580636 : f32
    %127 = vector.broadcast %cst_48 : f32 to vector<8x1xf32>
    %128 = arith.mulf %126, %127 : vector<8x1xf32>
    %129 = vector.broadcast %116 : f32 to vector<8x32xf32>
    %130 = arith.mulf %129, %123 : vector<8x32xf32>
    %131 = math.sqrt %128 : vector<8x1xf32>
    %cst_49 = arith.constant 9.99999997E-7 : f32
    %132 = vector.broadcast %cst_49 : f32 to vector<8x1xf32>
    %133 = arith.addf %131, %132 : vector<8x1xf32>
    %134 = vector.broadcast %133 : vector<8x1xf32> to vector<8x32xf32>
    %135 = arith.divf %130, %134 : vector<8x32xf32>
    %136 = vector.broadcast %117 : f32 to vector<8x32xf32>
    %137 = arith.addf %135, %136 : vector<8x32xf32>
    %c0_50 = arith.constant 0 : index
    %c0_51 = arith.constant 0 : index
    %138 = vector.load %arg30[%c0_50, %c0_51] : memref<8x32xbf16, #tpu.memory_space<vmem>>, vector<8x32xbf16>
    %c0_52 = arith.constant 0 : index
    %c0_53 = arith.constant 0 : index
    %139 = vector.load %arg31[%c0_52, %c0_53] : memref<8x32xbf16, #tpu.memory_space<vmem>>, vector<8x32xbf16>
    %c0_54 = arith.constant 0 : index
    %c0_55 = arith.constant 0 : index
    %140 = vector.load %arg14[%c0_54, %c0_55] : memref<32x32xbf16, #tpu.memory_space<vmem>>, vector<32x32xbf16>
    %c0_56 = arith.constant 0 : index
    %c0_57 = arith.constant 0 : index
    %141 = vector.load %arg15[%c0_56, %c0_57] : memref<1x32xf32, #tpu.memory_space<vmem>>, vector<1x32xf32>
    %c0_58 = arith.constant 0 : index
    %c0_59 = arith.constant 0 : index
    %142 = vector.load %arg20[%c0_58, %c0_59] : memref<32x32xbf16, #tpu.memory_space<vmem>>, vector<32x32xbf16>
    %c0_60 = arith.constant 0 : index
    %c0_61 = arith.constant 0 : index
    %143 = vector.load %arg21[%c0_60, %c0_61] : memref<1x32xf32, #tpu.memory_space<vmem>>, vector<1x32xf32>
    %c0_62 = arith.constant 0 : index
    %c0_63 = arith.constant 0 : index
    %144 = vector.load %arg5[%c0_62, %c0_63] : memref<8x8xf32, #tpu.memory_space<vmem>>, vector<8x8xf32>
    %145 = arith.truncf %137 : vector<8x32xf32> to vector<8x32xbf16>
    %cst_64 = arith.constant dense<0.000000e+00> : vector<8x32xf32>
    %146 = tpu.matmul %145, %140, %cst_64 {dimension_numbers = #tpu.dot_dimension_numbers<[1], [0], [0], [1], [0, 0, 1, 1], [], []>} : vector<8x32xbf16>, vector<32x32xbf16>, vector<8x32xf32> -> vector<8x32xf32>
    %147 = vector.broadcast %141 : vector<1x32xf32> to vector<8x32xf32>
    %148 = arith.addf %146, %147 : vector<8x32xf32>
    %149 = arith.truncf %148 : vector<8x32xf32> to vector<8x32xbf16>
    %150 = vector.extract_strided_slice %149 {offsets = [0, 0], sizes = [8, 8], strides = [1, 1]} : vector<8x32xbf16> to vector<8x8xbf16>
    %151 = vector.extract_strided_slice %138 {offsets = [0, 0], sizes = [8, 8], strides = [1, 1]} : vector<8x32xbf16> to vector<8x8xbf16>
    %cst_65 = arith.constant dense<0.000000e+00> : vector<8x8xf32>
    %152 = tpu.matmul %150, %151, %cst_65 {dimension_numbers = #tpu.dot_dimension_numbers<[1], [1], [0], [0], [0, 0, 1, 0], [], []>} : vector<8x8xbf16>, vector<8x8xbf16>, vector<8x8xf32> -> vector<8x8xf32>
    %153 = arith.addf %152, %144 : vector<8x8xf32>
    %cst_66 = arith.constant dense<0xFF800000> : vector<8xf32>
    %154 = vector.multi_reduction <maximumf>, %153, %cst_66 [1] : vector<8x8xf32> to vector<8xf32>
    %155 = vector.shape_cast %154 : vector<8xf32> to vector<8x1xf32>
    %156 = vector.broadcast %155 : vector<8x1xf32> to vector<8x8xf32>
    %157 = arith.subf %153, %156 : vector<8x8xf32>
    %158 = math.exp %157 : vector<8x8xf32>
    %cst_67 = arith.constant dense<0.000000e+00> : vector<8xf32>
    %159 = vector.multi_reduction <add>, %158, %cst_67 [1] : vector<8x8xf32> to vector<8xf32>
    %160 = vector.shape_cast %159 : vector<8xf32> to vector<8x1xf32>
    %161 = tpu.reciprocal %160 {approx = true} : vector<8x1xf32> -> vector<8x1xf32>
    %162 = vector.broadcast %161 : vector<8x1xf32> to vector<8x8xf32>
    %163 = arith.mulf %158, %162 : vector<8x8xf32>
    %164 = arith.truncf %163 : vector<8x8xf32> to vector<8x8xbf16>
    %165 = vector.extract_strided_slice %139 {offsets = [0, 0], sizes = [8, 8], strides = [1, 1]} : vector<8x32xbf16> to vector<8x8xbf16>
    %cst_68 = arith.constant dense<0.000000e+00> : vector<8x8xf32>
    %166 = tpu.matmul %164, %165, %cst_68 {dimension_numbers = #tpu.dot_dimension_numbers<[1], [0], [0], [1], [0, 0, 1, 1], [], []>} : vector<8x8xbf16>, vector<8x8xbf16>, vector<8x8xf32> -> vector<8x8xf32>
    %167 = vector.extract_strided_slice %149 {offsets = [0, 8], sizes = [8, 8], strides = [1, 1]} : vector<8x32xbf16> to vector<8x8xbf16>
    %168 = vector.extract_strided_slice %138 {offsets = [0, 8], sizes = [8, 8], strides = [1, 1]} : vector<8x32xbf16> to vector<8x8xbf16>
    %cst_69 = arith.constant dense<0.000000e+00> : vector<8x8xf32>
    %169 = tpu.matmul %167, %168, %cst_69 {dimension_numbers = #tpu.dot_dimension_numbers<[1], [1], [0], [0], [0, 0, 1, 0], [], []>} : vector<8x8xbf16>, vector<8x8xbf16>, vector<8x8xf32> -> vector<8x8xf32>
    %170 = arith.addf %169, %144 : vector<8x8xf32>
    %cst_70 = arith.constant dense<0xFF800000> : vector<8xf32>
    %171 = vector.multi_reduction <maximumf>, %170, %cst_70 [1] : vector<8x8xf32> to vector<8xf32>
    %172 = vector.shape_cast %171 : vector<8xf32> to vector<8x1xf32>
    %173 = vector.broadcast %172 : vector<8x1xf32> to vector<8x8xf32>
    %174 = arith.subf %170, %173 : vector<8x8xf32>
    %175 = math.exp %174 : vector<8x8xf32>
    %cst_71 = arith.constant dense<0.000000e+00> : vector<8xf32>
    %176 = vector.multi_reduction <add>, %175, %cst_71 [1] : vector<8x8xf32> to vector<8xf32>
    %177 = vector.shape_cast %176 : vector<8xf32> to vector<8x1xf32>
    %178 = tpu.reciprocal %177 {approx = true} : vector<8x1xf32> -> vector<8x1xf32>
    %179 = vector.broadcast %178 : vector<8x1xf32> to vector<8x8xf32>
    %180 = arith.mulf %175, %179 : vector<8x8xf32>
    %181 = arith.truncf %180 : vector<8x8xf32> to vector<8x8xbf16>
    %182 = vector.extract_strided_slice %139 {offsets = [0, 8], sizes = [8, 8], strides = [1, 1]} : vector<8x32xbf16> to vector<8x8xbf16>
    %cst_72 = arith.constant dense<0.000000e+00> : vector<8x8xf32>
    %183 = tpu.matmul %181, %182, %cst_72 {dimension_numbers = #tpu.dot_dimension_numbers<[1], [0], [0], [1], [0, 0, 1, 1], [], []>} : vector<8x8xbf16>, vector<8x8xbf16>, vector<8x8xf32> -> vector<8x8xf32>
    %184 = vector.extract_strided_slice %149 {offsets = [0, 16], sizes = [8, 8], strides = [1, 1]} : vector<8x32xbf16> to vector<8x8xbf16>
    %185 = vector.extract_strided_slice %138 {offsets = [0, 16], sizes = [8, 8], strides = [1, 1]} : vector<8x32xbf16> to vector<8x8xbf16>
    %cst_73 = arith.constant dense<0.000000e+00> : vector<8x8xf32>
    %186 = tpu.matmul %184, %185, %cst_73 {dimension_numbers = #tpu.dot_dimension_numbers<[1], [1], [0], [0], [0, 0, 1, 0], [], []>} : vector<8x8xbf16>, vector<8x8xbf16>, vector<8x8xf32> -> vector<8x8xf32>
    %187 = arith.addf %186, %144 : vector<8x8xf32>
    %cst_74 = arith.constant dense<0xFF800000> : vector<8xf32>
    %188 = vector.multi_reduction <maximumf>, %187, %cst_74 [1] : vector<8x8xf32> to vector<8xf32>
    %189 = vector.shape_cast %188 : vector<8xf32> to vector<8x1xf32>
    %190 = vector.broadcast %189 : vector<8x1xf32> to vector<8x8xf32>
    %191 = arith.subf %187, %190 : vector<8x8xf32>
    %192 = math.exp %191 : vector<8x8xf32>
    %cst_75 = arith.constant dense<0.000000e+00> : vector<8xf32>
    %193 = vector.multi_reduction <add>, %192, %cst_75 [1] : vector<8x8xf32> to vector<8xf32>
    %194 = vector.shape_cast %193 : vector<8xf32> to vector<8x1xf32>
    %195 = tpu.reciprocal %194 {approx = true} : vector<8x1xf32> -> vector<8x1xf32>
    %196 = vector.broadcast %195 : vector<8x1xf32> to vector<8x8xf32>
    %197 = arith.mulf %192, %196 : vector<8x8xf32>
    %198 = arith.truncf %197 : vector<8x8xf32> to vector<8x8xbf16>
    %199 = vector.extract_strided_slice %139 {offsets = [0, 16], sizes = [8, 8], strides = [1, 1]} : vector<8x32xbf16> to vector<8x8xbf16>
    %cst_76 = arith.constant dense<0.000000e+00> : vector<8x8xf32>
    %200 = tpu.matmul %198, %199, %cst_76 {dimension_numbers = #tpu.dot_dimension_numbers<[1], [0], [0], [1], [0, 0, 1, 1], [], []>} : vector<8x8xbf16>, vector<8x8xbf16>, vector<8x8xf32> -> vector<8x8xf32>
    %201 = vector.extract_strided_slice %149 {offsets = [0, 24], sizes = [8, 8], strides = [1, 1]} : vector<8x32xbf16> to vector<8x8xbf16>
    %202 = vector.extract_strided_slice %138 {offsets = [0, 24], sizes = [8, 8], strides = [1, 1]} : vector<8x32xbf16> to vector<8x8xbf16>
    %cst_77 = arith.constant dense<0.000000e+00> : vector<8x8xf32>
    %203 = tpu.matmul %201, %202, %cst_77 {dimension_numbers = #tpu.dot_dimension_numbers<[1], [1], [0], [0], [0, 0, 1, 0], [], []>} : vector<8x8xbf16>, vector<8x8xbf16>, vector<8x8xf32> -> vector<8x8xf32>
    %204 = arith.addf %203, %144 : vector<8x8xf32>
    %cst_78 = arith.constant dense<0xFF800000> : vector<8xf32>
    %205 = vector.multi_reduction <maximumf>, %204, %cst_78 [1] : vector<8x8xf32> to vector<8xf32>
    %206 = vector.shape_cast %205 : vector<8xf32> to vector<8x1xf32>
    %207 = vector.broadcast %206 : vector<8x1xf32> to vector<8x8xf32>
    %208 = arith.subf %204, %207 : vector<8x8xf32>
    %209 = math.exp %208 : vector<8x8xf32>
    %cst_79 = arith.constant dense<0.000000e+00> : vector<8xf32>
    %210 = vector.multi_reduction <add>, %209, %cst_79 [1] : vector<8x8xf32> to vector<8xf32>
    %211 = vector.shape_cast %210 : vector<8xf32> to vector<8x1xf32>
    %212 = tpu.reciprocal %211 {approx = true} : vector<8x1xf32> -> vector<8x1xf32>
    %213 = vector.broadcast %212 : vector<8x1xf32> to vector<8x8xf32>
    %214 = arith.mulf %209, %213 : vector<8x8xf32>
    %215 = arith.truncf %214 : vector<8x8xf32> to vector<8x8xbf16>
    %216 = vector.extract_strided_slice %139 {offsets = [0, 24], sizes = [8, 8], strides = [1, 1]} : vector<8x32xbf16> to vector<8x8xbf16>
    %cst_80 = arith.constant dense<0.000000e+00> : vector<8x8xf32>
    %217 = tpu.matmul %215, %216, %cst_80 {dimension_numbers = #tpu.dot_dimension_numbers<[1], [0], [0], [1], [0, 0, 1, 1], [], []>} : vector<8x8xbf16>, vector<8x8xbf16>, vector<8x8xf32> -> vector<8x8xf32>
    %218 = tpu.concatenate %166, %183, %200, %217 in 1 : vector<8x8xf32>, vector<8x8xf32>, vector<8x8xf32>, vector<8x8xf32> -> vector<8x32xf32>
    %219 = arith.truncf %218 : vector<8x32xf32> to vector<8x32xbf16>
    %cst_81 = arith.constant dense<0.000000e+00> : vector<8x32xf32>
    %220 = tpu.matmul %219, %142, %cst_81 {dimension_numbers = #tpu.dot_dimension_numbers<[1], [0], [0], [1], [0, 0, 1, 1], [], []>} : vector<8x32xbf16>, vector<32x32xbf16>, vector<8x32xf32> -> vector<8x32xf32>
    %221 = vector.broadcast %143 : vector<1x32xf32> to vector<8x32xf32>
    %222 = arith.addf %220, %221 : vector<8x32xf32>
    %223 = arith.addf %115, %222 : vector<8x32xf32>
    %c2 = arith.constant 2 : index
    %c0_82 = arith.constant 0 : index
    %224 = memref.load %arg26[%c2, %c0_82] : memref<3x2xf32, #tpu.memory_space<smem>>
    %c2_83 = arith.constant 2 : index
    %c1_84 = arith.constant 1 : index
    %225 = memref.load %arg26[%c2_83, %c1_84] : memref<3x2xf32, #tpu.memory_space<smem>>
    %cst_85 = arith.constant dense<0.000000e+00> : vector<8xf32>
    %226 = vector.multi_reduction <add>, %223, %cst_85 [1] : vector<8x32xf32> to vector<8xf32>
    %227 = vector.shape_cast %226 : vector<8xf32> to vector<8x1xf32>
    %cst_86 = arith.constant 3.200000e+01 : f32
    %228 = vector.broadcast %cst_86 : f32 to vector<8x1xf32>
    %229 = arith.divf %227, %228 : vector<8x1xf32>
    %230 = vector.broadcast %229 : vector<8x1xf32> to vector<8x32xf32>
    %231 = arith.subf %223, %230 : vector<8x32xf32>
    %232 = arith.mulf %231, %231 : vector<8x32xf32>
    %cst_87 = arith.constant dense<0.000000e+00> : vector<8xf32>
    %233 = vector.multi_reduction <add>, %232, %cst_87 [1] : vector<8x32xf32> to vector<8xf32>
    %234 = vector.shape_cast %233 : vector<8xf32> to vector<8x1xf32>
    %cst_88 = arith.constant 0.0322580636 : f32
    %235 = vector.broadcast %cst_88 : f32 to vector<8x1xf32>
    %236 = arith.mulf %234, %235 : vector<8x1xf32>
    %237 = vector.broadcast %224 : f32 to vector<8x32xf32>
    %238 = arith.mulf %237, %231 : vector<8x32xf32>
    %239 = math.sqrt %236 : vector<8x1xf32>
    %cst_89 = arith.constant 9.99999997E-7 : f32
    %240 = vector.broadcast %cst_89 : f32 to vector<8x1xf32>
    %241 = arith.addf %239, %240 : vector<8x1xf32>
    %242 = vector.broadcast %241 : vector<8x1xf32> to vector<8x32xf32>
    %243 = arith.divf %238, %242 : vector<8x32xf32>
    %244 = vector.broadcast %225 : f32 to vector<8x32xf32>
    %245 = arith.addf %243, %244 : vector<8x32xf32>
    %246 = arith.truncf %245 : vector<8x32xf32> to vector<8x32xbf16>
    %c0_90 = arith.constant 0 : index
    %c0_91 = arith.constant 0 : index
    %247 = vector.load %arg22[%c0_90, %c0_91] : memref<32x64xbf16, #tpu.memory_space<vmem>>, vector<32x64xbf16>
    %cst_92 = arith.constant dense<0.000000e+00> : vector<8x64xf32>
    %248 = tpu.matmul %246, %247, %cst_92 {dimension_numbers = #tpu.dot_dimension_numbers<[1], [0], [0], [1], [0, 0, 1, 1], [], []>} : vector<8x32xbf16>, vector<32x64xbf16>, vector<8x64xf32> -> vector<8x64xf32>
    %c0_93 = arith.constant 0 : index
    %c0_94 = arith.constant 0 : index
    %249 = vector.load %arg23[%c0_93, %c0_94] : memref<1x64xf32, #tpu.memory_space<vmem>>, vector<1x64xf32>
    %250 = vector.broadcast %249 : vector<1x64xf32> to vector<8x64xf32>
    %251 = arith.addf %248, %250 : vector<8x64xf32>
    %cst_95 = arith.constant 0.000000e+00 : f32
    %252 = vector.broadcast %cst_95 : f32 to vector<8x64xf32>
    %253 = arith.maximumf %251, %252 : vector<8x64xf32>
    %254 = arith.truncf %253 : vector<8x64xf32> to vector<8x64xbf16>
    %c0_96 = arith.constant 0 : index
    %c0_97 = arith.constant 0 : index
    %255 = vector.load %arg24[%c0_96, %c0_97] : memref<64x32xbf16, #tpu.memory_space<vmem>>, vector<64x32xbf16>
    %cst_98 = arith.constant dense<0.000000e+00> : vector<8x32xf32>
    %256 = tpu.matmul %254, %255, %cst_98 {dimension_numbers = #tpu.dot_dimension_numbers<[1], [0], [0], [1], [0, 0, 1, 1], [], []>} : vector<8x64xbf16>, vector<64x32xbf16>, vector<8x32xf32> -> vector<8x32xf32>
    %257 = arith.addf %223, %256 : vector<8x32xf32>
    %c0_99 = arith.constant 0 : index
    %c0_100 = arith.constant 0 : index
    %258 = vector.load %arg25[%c0_99, %c0_100] : memref<1x32xf32, #tpu.memory_space<vmem>>, vector<1x32xf32>
    %259 = vector.broadcast %258 : vector<1x32xf32> to vector<8x32xf32>
    %260 = arith.addf %257, %259 : vector<8x32xf32>
    %c0_101 = arith.constant 0 : index
    %c0_102 = arith.constant 0 : index
    %c0_103 = arith.constant 0 : index
    %261 = vector.load %arg27[%c0_101, %c0_102, %c0_103] : memref<1x8x32xf32, #tpu.memory_space<vmem>>, vector<1x8x32xf32>
    %262 = vector.shape_cast %261 : vector<1x8x32xf32> to vector<8x32xf32>
    %263 = vector.shape_cast %260 : vector<8x32xf32> to vector<1x8x32xf32>
    tpu.vector_store %arg27[%c0_101, %c0_102, %c0_103], %263 {strides = array<i32>} : memref<1x8x32xf32, #tpu.memory_space<vmem>>, vector<1x8x32xf32>,
    return
  }
  func.func @transform_0(%arg0: i32, %arg1: i32) -> (i32, i32, i32) {
    %c0_i32 = arith.constant 0 : i32
    %c0_i32_0 = arith.constant 0 : i32
    %c0_i32_1 = arith.constant 0 : i32
    return %arg0, %c0_i32, %c0_i32_0 : i32, i32, i32
  }
  func.func @transform_1(%arg0: i32, %arg1: i32) -> (i32, i32, i32) {
    %c0_i32 = arith.constant 0 : i32
    %c0_i32_0 = arith.constant 0 : i32
    %c0_i32_1 = arith.constant 0 : i32
    return %arg0, %c0_i32, %c0_i32_0 : i32, i32, i32
  }
  func.func @transform_2(%arg0: i32, %arg1: i32) -> (i32, i32) {
    %c0_i32 = arith.constant 0 : i32
    %c0_i32_0 = arith.constant 0 : i32
    return %arg1, %c0_i32 : i32, i32
  }
  func.func @transform_3(%arg0: i32, %arg1: i32) -> (i32, i32) {
    %c0_i32 = arith.constant 0 : i32
    %c0_i32_0 = arith.constant 0 : i32
    return %arg1, %c0_i32 : i32, i32
  }
  func.func @transform_4(%arg0: i32, %arg1: i32) -> (i32, i32) {
    %c0_i32 = arith.constant 0 : i32
    %c0_i32_0 = arith.constant 0 : i32
    %c0_i32_1 = arith.constant 0 : i32
    return %c0_i32, %c0_i32_0 : i32, i32
  }
  func.func @transform_5(%arg0: i32, %arg1: i32) -> (i32, i32) {
    %c0_i32 = arith.constant 0 : i32
    %c0_i32_0 = arith.constant 0 : i32
    %c0_i32_1 = arith.constant 0 : i32
    return %c0_i32, %c0_i32_0 : i32, i32
  }
  func.func @transform_6(%arg0: i32, %arg1: i32) -> (i32, i32) {
    %c0_i32 = arith.constant 0 : i32
    %c0_i32_0 = arith.constant 0 : i32
    %c0_i32_1 = arith.constant 0 : i32
    return %c0_i32, %c0_i32_0 : i32, i32
  }
  func.func @transform_7(%arg0: i32, %arg1: i32) -> (i32, i32) {
    %c0_i32 = arith.constant 0 : i32
    %c0_i32_0 = arith.constant 0 : i32
    %c0_i32_1 = arith.constant 0 : i32
    return %c0_i32, %c0_i32_0 : i32, i32
  }
  func.func @transform_8(%arg0: i32, %arg1: i32) -> (i32, i32) {
    %c0_i32 = arith.constant 0 : i32
    %c0_i32_0 = arith.constant 0 : i32
    %c0_i32_1 = arith.constant 0 : i32
    return %c0_i32, %c0_i32_0 : i32, i32
  }
  func.func @transform_9(%arg0: i32, %arg1: i32) -> (i32, i32) {
    %c0_i32 = arith.constant 0 : i32
    %c0_i32_0 = arith.constant 0 : i32
    %c0_i32_1 = arith.constant 0 : i32
    return %c0_i32, %c0_i32_0 : i32, i32
  }
  func.func @transform_10(%arg0: i32, %arg1: i32) -> (i32, i32) {
    %c0_i32 = arith.constant 0 : i32
    %c0_i32_0 = arith.constant 0 : i32
    %c0_i32_1 = arith.constant 0 : i32
    return %c0_i32, %c0_i32_0 : i32, i32
  }
  func.func @transform_11(%arg0: i32, %arg1: i32) -> (i32, i32) {
    %c0_i32 = arith.constant 0 : i32
    %c0_i32_0 = arith.constant 0 : i32
    %c0_i32_1 = arith.constant 0 : i32
    return %c0_i32, %c0_i32_0 : i32, i32
  }
  func.func @transform_12(%arg0: i32, %arg1: i32) -> (i32, i32) {
    %c0_i32 = arith.constant 0 : i32
    %c0_i32_0 = arith.constant 0 : i32
    %c0_i32_1 = arith.constant 0 : i32
    return %c0_i32, %c0_i32_0 : i32, i32
  }
  func.func @transform_13(%arg0: i32, %arg1: i32) -> (i32, i32) {
    %c0_i32 = arith.constant 0 : i32
    %c0_i32_0 = arith.constant 0 : i32
    %c0_i32_1 = arith.constant 0 : i32
    return %c0_i32, %c0_i32_0 : i32, i32
  }
  func.func @transform_14(%arg0: i32, %arg1: i32) -> (i32, i32) {
    %c0_i32 = arith.constant 0 : i32
    %c0_i32_0 = arith.constant 0 : i32
    %c0_i32_1 = arith.constant 0 : i32
    return %c0_i32, %c0_i32_0 : i32, i32
  }
  func.func @transform_15(%arg0: i32, %arg1: i32) -> (i32, i32) {
    %c0_i32 = arith.constant 0 : i32
    %c0_i32_0 = arith.constant 0 : i32
    %c0_i32_1 = arith.constant 0 : i32
    return %c0_i32, %c0_i32_0 : i32, i32
  }
  func.func @transform_16(%arg0: i32, %arg1: i32) -> (i32, i32) {
    %c0_i32 = arith.constant 0 : i32
    %c0_i32_0 = arith.constant 0 : i32
    %c0_i32_1 = arith.constant 0 : i32
    return %c0_i32, %c0_i32_0 : i32, i32
  }
  func.func @transform_17(%arg0: i32, %arg1: i32) -> (i32, i32) {
    %c0_i32 = arith.constant 0 : i32
    %c0_i32_0 = arith.constant 0 : i32
    %c0_i32_1 = arith.constant 0 : i32
    return %c0_i32, %c0_i32_0 : i32, i32
  }
  func.func @transform_18(%arg0: i32, %arg1: i32) -> (i32, i32) {
    %c0_i32 = arith.constant 0 : i32
    %c0_i32_0 = arith.constant 0 : i32
    %c0_i32_1 = arith.constant 0 : i32
    return %c0_i32, %c0_i32_0 : i32, i32
  }
  func.func @transform_19(%arg0: i32, %arg1: i32) -> (i32, i32) {
    %c0_i32 = arith.constant 0 : i32
    %c0_i32_0 = arith.constant 0 : i32
    %c0_i32_1 = arith.constant 0 : i32
    return %c0_i32, %c0_i32_0 : i32, i32
  }
  func.func @transform_20(%arg0: i32, %arg1: i32) -> (i32, i32) {
    %c0_i32 = arith.constant 0 : i32
    %c0_i32_0 = arith.constant 0 : i32
    %c0_i32_1 = arith.constant 0 : i32
    return %c0_i32, %c0_i32_0 : i32, i32
  }
  func.func @transform_21(%arg0: i32, %arg1: i32) -> (i32, i32) {
    %c0_i32 = arith.constant 0 : i32
    %c0_i32_0 = arith.constant 0 : i32
    %c0_i32_1 = arith.constant 0 : i32
    return %c0_i32, %c0_i32_0 : i32, i32
  }
  func.func @transform_22(%arg0: i32, %arg1: i32) -> (i32, i32) {
    %c0_i32 = arith.constant 0 : i32
    %c0_i32_0 = arith.constant 0 : i32
    %c0_i32_1 = arith.constant 0 : i32
    return %c0_i32, %c0_i32_0 : i32, i32
  }
  func.func @transform_23(%arg0: i32, %arg1: i32) -> (i32, i32) {
    %c0_i32 = arith.constant 0 : i32
    %c0_i32_0 = arith.constant 0 : i32
    %c0_i32_1 = arith.constant 0 : i32
    return %c0_i32, %c0_i32_0 : i32, i32
  }
  func.func @transform_24(%arg0: i32, %arg1: i32) -> (i32, i32) {
    %c0_i32 = arith.constant 0 : i32
    %c0_i32_0 = arith.constant 0 : i32
    %c0_i32_1 = arith.constant 0 : i32
    return %c0_i32, %c0_i32_0 : i32, i32
  }
  func.func @transform_25(%arg0: i32, %arg1: i32) -> (i32, i32, i32) {
    %c0_i32 = arith.constant 0 : i32
    %c0_i32_0 = arith.constant 0 : i32
    return %arg0, %arg1, %c0_i32 : i32, i32, i32
  }
}

module attributes {stable_mosaic.version = 11 : i64} {
  func.func @decoder_block_kernel(%arg0: i32, %arg1: i32, %arg2: memref<1x8x32xf32, #tpu.memory_space<vmem>>, %arg3: memref<1x8x32xf32, #tpu.memory_space<vmem>>, %arg4: memref<8x8xf32, #tpu.memory_space<vmem>>, %arg5: memref<8x8xf32, #tpu.memory_space<vmem>>, %arg6: memref<32x32xbf16, #tpu.memory_space<vmem>>, %arg7: memref<1x32xf32, #tpu.memory_space<vmem>>, %arg8: memref<32x32xbf16, #tpu.memory_space<vmem>>, %arg9: memref<1x32xf32, #tpu.memory_space<vmem>>, %arg10: memref<32x32xbf16, #tpu.memory_space<vmem>>, %arg11: memref<1x32xf32, #tpu.memory_space<vmem>>, %arg12: memref<32x32xbf16, #tpu.memory_space<vmem>>, %arg13: memref<1x32xf32, #tpu.memory_space<vmem>>, %arg14: memref<32x32xbf16, #tpu.memory_space<vmem>>, %arg15: memref<1x32xf32, #tpu.memory_space<vmem>>, %arg16: memref<32x32xbf16, #tpu.memory_space<vmem>>, %arg17: memref<1x32xf32, #tpu.memory_space<vmem>>, %arg18: memref<32x32xbf16, #tpu.memory_space<vmem>>, %arg19: memref<1x32xf32, #tpu.memory_space<vmem>>, %arg20: memref<32x32xbf16, #tpu.memory_space<vmem>>, %arg21: memref<1x32xf32, #tpu.memory_space<vmem>>, %arg22: memref<32x64xbf16, #tpu.memory_space<vmem>>, %arg23: memref<1x64xf32, #tpu.memory_space<vmem>>, %arg24: memref<64x32xbf16, #tpu.memory_space<vmem>>, %arg25: memref<1x32xf32, #tpu.memory_space<vmem>>, %arg26: memref<3x2xf32, #tpu.memory_space<smem>>, %arg27: memref<1x8x32xf32, #tpu.memory_space<vmem>>, %arg28: memref<8x32xbf16, #tpu.memory_space<vmem>>, %arg29: memref<8x32xbf16, #tpu.memory_space<vmem>>, %arg30: memref<8x32xbf16, #tpu.memory_space<vmem>>, %arg31: memref<8x32xbf16, #tpu.memory_space<vmem>>) attributes {dimension_semantics = [#tpu.dimension_semantics<parallel>, #tpu.dimension_semantics<arbitrary>], iteration_bounds = array<i64: 2, 1>, scalar_prefetch = 0 : i64, scratch_operands = 4 : i64, tpu.core_type = #tpu.core_type<tc>, window_params = [{transform_indices = @transform_0, window_bounds = array<i64: 1, 8, 32>}, {transform_indices = @transform_1, window_bounds = array<i64: 1, 8, 32>}, {transform_indices = @transform_2, window_bounds = array<i64: 8, 8>}, {transform_indices = @transform_3, window_bounds = array<i64: 8, 8>}, {pipeline_mode = #tpu.pipeline_mode<synchronous>, transform_indices = @transform_4, window_bounds = array<i64: 32, 32>}, {pipeline_mode = #tpu.pipeline_mode<synchronous>, transform_indices = @transform_5, window_bounds = array<i64: 1, 32>}, {pipeline_mode = #tpu.pipeline_mode<synchronous>, transform_indices = @transform_6, window_bounds = array<i64: 32, 32>}, {pipeline_mode = #tpu.pipeline_mode<synchronous>, transform_indices = @transform_7, window_bounds = array<i64: 1, 32>}, {pipeline_mode = #tpu.pipeline_mode<synchronous>, transform_indices = @transform_8, window_bounds = array<i64: 32, 32>}, {pipeline_mode = #tpu.pipeline_mode<synchronous>, transform_indices = @transform_9, window_bounds = array<i64: 1, 32>}, {pipeline_mode = #tpu.pipeline_mode<synchronous>, transform_indices = @transform_10, window_bounds = array<i64: 32, 32>}, {pipeline_mode = #tpu.pipeline_mode<synchronous>, transform_indices = @transform_11, window_bounds = array<i64: 1, 32>}, {pipeline_mode = #tpu.pipeline_mode<synchronous>, transform_indices = @transform_12, window_bounds = array<i64: 32, 32>}, {pipeline_mode = #tpu.pipeline_mode<synchronous>, transform_indices = @transform_13, window_bounds = array<i64: 1, 32>}, {pipeline_mode = #tpu.pipeline_mode<synchronous>, transform_indices = @transform_14, window_bounds = array<i64: 32, 32>}, {pipeline_mode = #tpu.pipeline_mode<synchronous>, transform_indices = @transform_15, window_bounds = array<i64: 1, 32>}, {pipeline_mode = #tpu.pipeline_mode<synchronous>, transform_indices = @transform_16, window_bounds = array<i64: 32, 32>}, {pipeline_mode = #tpu.pipeline_mode<synchronous>, transform_indices = @transform_17, window_bounds = array<i64: 1, 32>}, {pipeline_mode = #tpu.pipeline_mode<synchronous>, transform_indices = @transform_18, window_bounds = array<i64: 32, 32>}, {pipeline_mode = #tpu.pipeline_mode<synchronous>, transform_indices = @transform_19, window_bounds = array<i64: 1, 32>}, {pipeline_mode = #tpu.pipeline_mode<synchronous>, transform_indices = @transform_20, window_bounds = array<i64: 32, 64>}, {pipeline_mode = #tpu.pipeline_mode<synchronous>, transform_indices = @transform_21, window_bounds = array<i64: 1, 64>}, {pipeline_mode = #tpu.pipeline_mode<synchronous>, transform_indices = @transform_22, window_bounds = array<i64: 64, 32>}, {pipeline_mode = #tpu.pipeline_mode<synchronous>, transform_indices = @transform_23, window_bounds = array<i64: 1, 32>}, {transform_indices = @transform_24, window_bounds = array<i64: 3, 2>}, {transform_indices = @transform_25, window_bounds = array<i64: 1, 8, 32>}]} {
    %c0_i32 = arith.constant 0 : i32
    %0 = arith.cmpi eq, %arg1, %c0_i32 : i32
    %1 = arith.extui %0 : i1 to i32
    %c0_i32_0 = arith.constant 0 : i32
    %2 = arith.cmpi ne, %1, %c0_i32_0 : i32
    scf.if %2 {
      %c0_104 = arith.constant 0 : index
      %c0_105 = arith.constant 0 : index
      %c0_106 = arith.constant 0 : index
      %264 = vector.load %arg2[%c0_104, %c0_105, %c0_106] : memref<1x8x32xf32, #tpu.memory_space<vmem>>, vector<1x8x32xf32>
      %265 = vector.shape_cast %264 : vector<1x8x32xf32> to vector<8x32xf32>
      %c0_107 = arith.constant 0 : index
      %c0_108 = arith.constant 0 : index
      %266 = memref.load %arg26[%c0_107, %c0_108] : memref<3x2xf32, #tpu.memory_space<smem>>
      %c0_109 = arith.constant 0 : index
      %c1_110 = arith.constant 1 : index
      %267 = memref.load %arg26[%c0_109, %c1_110] : memref<3x2xf32, #tpu.memory_space<smem>>
      %cst_111 = arith.constant dense<0.000000e+00> : vector<8xf32>
      %268 = vector.multi_reduction <add>, %265, %cst_111 [1] : vector<8x32xf32> to vector<8xf32>
      %269 = vector.shape_cast %268 : vector<8xf32> to vector<8x1xf32>
      %cst_112 = arith.constant 3.200000e+01 : f32
      %270 = vector.broadcast %cst_112 : f32 to vector<8x1xf32>
      %271 = arith.divf %269, %270 : vector<8x1xf32>
      %272 = vector.broadcast %271 : vector<8x1xf32> to vector<8x32xf32>
      %273 = arith.subf %265, %272 : vector<8x32xf32>
      %274 = arith.mulf %273, %273 : vector<8x32xf32>
      %cst_113 = arith.constant dense<0.000000e+00> : vector<8xf32>
      %275 = vector.multi_reduction <add>, %274, %cst_113 [1] : vector<8x32xf32> to vector<8xf32>
      %276 = vector.shape_cast %275 : vector<8xf32> to vector<8x1xf32>
      %cst_114 = arith.constant 0.0322580636 : f32
      %277 = vector.broadcast %cst_114 : f32 to vector<8x1xf32>
      %278 = arith.mulf %276, %277 : vector<8x1xf32>
      %279 = vector.broadcast %266 : f32 to vector<8x32xf32>
      %280 = arith.mulf %279, %273 : vector<8x32xf32>
      %281 = math.sqrt %278 : vector<8x1xf32>
      %cst_115 = arith.constant 9.99999997E-7 : f32
      %282 = vector.broadcast %cst_115 : f32 to vector<8x1xf32>
      %283 = arith.addf %281, %282 : vector<8x1xf32>
      %284 = vector.broadcast %283 : vector<8x1xf32> to vector<8x32xf32>
      %285 = arith.divf %280, %284 : vector<8x32xf32>
      %286 = vector.broadcast %267 : f32 to vector<8x32xf32>
      %287 = arith.addf %285, %286 : vector<8x32xf32>
      %288 = arith.truncf %287 : vector<8x32xf32> to vector<8x32xbf16>
      %c0_116 = arith.constant 0 : index
      %c0_117 = arith.constant 0 : index
      %c0_118 = arith.constant 0 : index
      %289 = vector.load %arg3[%c0_116, %c0_117, %c0_118] : memref<1x8x32xf32, #tpu.memory_space<vmem>>, vector<1x8x32xf32>
      %290 = vector.shape_cast %289 : vector<1x8x32xf32> to vector<8x32xf32>
      %291 = arith.truncf %290 : vector<8x32xf32> to vector<8x32xbf16>
      %c0_119 = arith.constant 0 : index
      %c0_120 = arith.constant 0 : index
      %292 = vector.load %arg8[%c0_119, %c0_120] : memref<32x32xbf16, #tpu.memory_space<vmem>>, vector<32x32xbf16>
      %cst_121 = arith.constant dense<0.000000e+00> : vector<8x32xf32>
      %293 = tpu.matmul %288, %292, %cst_121 {dimension_numbers = #tpu.dot_dimension_numbers<[1], [0], [0], [1], [0, 0, 1, 1], [], []>} : vector<8x32xbf16>, vector<32x32xbf16>, vector<8x32xf32> -> vector<8x32xf32>
      %c0_122 = arith.constant 0 : index
      %c0_123 = arith.constant 0 : index
      %294 = vector.load %arg9[%c0_122, %c0_123] : memref<1x32xf32, #tpu.memory_space<vmem>>, vector<1x32xf32>
      %295 = vector.broadcast %294 : vector<1x32xf32> to vector<8x32xf32>
      %296 = arith.addf %293, %295 : vector<8x32xf32>
      %297 = arith.truncf %296 : vector<8x32xf32> to vector<8x32xbf16>
      %c0_124 = arith.constant 0 : index
      %c0_125 = arith.constant 0 : index
      %298 = vector.load %arg28[%c0_124, %c0_125] : memref<8x32xbf16, #tpu.memory_space<vmem>>, vector<8x32xbf16>
      tpu.vector_store %arg28[%c0_124, %c0_125], %297 {strides = array<i32>} : memref<8x32xbf16, #tpu.memory_space<vmem>>, vector<8x32xbf16>,
      %c0_126 = arith.constant 0 : index
      %c0_127 = arith.constant 0 : index
      %299 = vector.load %arg10[%c0_126, %c0_127] : memref<32x32xbf16, #tpu.memory_space<vmem>>, vector<32x32xbf16>
      %cst_128 = arith.constant dense<0.000000e+00> : vector<8x32xf32>
      %300 = tpu.matmul %288, %299, %cst_128 {dimension_numbers = #tpu.dot_dimension_numbers<[1], [0], [0], [1], [0, 0, 1, 1], [], []>} : vector<8x32xbf16>, vector<32x32xbf16>, vector<8x32xf32> -> vector<8x32xf32>
      %c0_129 = arith.constant 0 : index
      %c0_130 = arith.constant 0 : index
      %301 = vector.load %arg11[%c0_129, %c0_130] : memref<1x32xf32, #tpu.memory_space<vmem>>, vector<1x32xf32>
      %302 = vector.broadcast %301 : vector<1x32xf32> to vector<8x32xf32>
      %303 = arith.addf %300, %302 : vector<8x32xf32>
      %304 = arith.truncf %303 : vector<8x32xf32> to vector<8x32xbf16>
      %c0_131 = arith.constant 0 : index
      %c0_132 = arith.constant 0 : index
      %305 = vector.load %arg29[%c0_131, %c0_132] : memref<8x32xbf16, #tpu.memory_space<vmem>>, vector<8x32xbf16>
      tpu.vector_store %arg29[%c0_131, %c0_132], %304 {strides = array<i32>} : memref<8x32xbf16, #tpu.memory_space<vmem>>, vector<8x32xbf16>,
      %c0_133 = arith.constant 0 : index
      %c0_134 = arith.constant 0 : index
      %306 = vector.load %arg16[%c0_133, %c0_134] : memref<32x32xbf16, #tpu.memory_space<vmem>>, vector<32x32xbf16>
      %cst_135 = arith.constant dense<0.000000e+00> : vector<8x32xf32>
      %307 = tpu.matmul %291, %306, %cst_135 {dimension_numbers = #tpu.dot_dimension_numbers<[1], [0], [0], [1], [0, 0, 1, 1], [], []>} : vector<8x32xbf16>, vector<32x32xbf16>, vector<8x32xf32> -> vector<8x32xf32>
      %c0_136 = arith.constant 0 : index
      %c0_137 = arith.constant 0 : index
      %308 = vector.load %arg17[%c0_136, %c0_137] : memref<1x32xf32, #tpu.memory_space<vmem>>, vector<1x32xf32>
      %309 = vector.broadcast %308 : vector<1x32xf32> to vector<8x32xf32>
      %310 = arith.addf %307, %309 : vector<8x32xf32>
      %311 = arith.truncf %310 : vector<8x32xf32> to vector<8x32xbf16>
      %c0_138 = arith.constant 0 : index
      %c0_139 = arith.constant 0 : index
      %312 = vector.load %arg30[%c0_138, %c0_139] : memref<8x32xbf16, #tpu.memory_space<vmem>>, vector<8x32xbf16>
      tpu.vector_store %arg30[%c0_138, %c0_139], %311 {strides = array<i32>} : memref<8x32xbf16, #tpu.memory_space<vmem>>, vector<8x32xbf16>,
      %c0_140 = arith.constant 0 : index
      %c0_141 = arith.constant 0 : index
      %313 = vector.load %arg18[%c0_140, %c0_141] : memref<32x32xbf16, #tpu.memory_space<vmem>>, vector<32x32xbf16>
      %cst_142 = arith.constant dense<0.000000e+00> : vector<8x32xf32>
      %314 = tpu.matmul %291, %313, %cst_142 {dimension_numbers = #tpu.dot_dimension_numbers<[1], [0], [0], [1], [0, 0, 1, 1], [], []>} : vector<8x32xbf16>, vector<32x32xbf16>, vector<8x32xf32> -> vector<8x32xf32>
      %c0_143 = arith.constant 0 : index
      %c0_144 = arith.constant 0 : index
      %315 = vector.load %arg19[%c0_143, %c0_144] : memref<1x32xf32, #tpu.memory_space<vmem>>, vector<1x32xf32>
      %316 = vector.broadcast %315 : vector<1x32xf32> to vector<8x32xf32>
      %317 = arith.addf %314, %316 : vector<8x32xf32>
      %318 = arith.truncf %317 : vector<8x32xf32> to vector<8x32xbf16>
      %c0_145 = arith.constant 0 : index
      %c0_146 = arith.constant 0 : index
      %319 = vector.load %arg31[%c0_145, %c0_146] : memref<8x32xbf16, #tpu.memory_space<vmem>>, vector<8x32xbf16>
      tpu.vector_store %arg31[%c0_145, %c0_146], %318 {strides = array<i32>} : memref<8x32xbf16, #tpu.memory_space<vmem>>, vector<8x32xbf16>,
    } else {
    }
    %c8_i32 = arith.constant 8 : i32
    %3 = arith.muli %arg1, %c8_i32 : i32
    %4 = tpu.assume_multiple %3, 8 : i32
    %c0 = arith.constant 0 : index
    %5 = arith.index_cast %4 : i32 to index
    %c0_1 = arith.constant 0 : index
    %6 = vector.load %arg2[%c0, %5, %c0_1] : memref<1x8x32xf32, #tpu.memory_space<vmem>>, vector<1x8x32xf32>
    %7 = vector.shape_cast %6 : vector<1x8x32xf32> to vector<8x32xf32>
    %c0_2 = arith.constant 0 : index
    %c0_3 = arith.constant 0 : index
    %8 = memref.load %arg26[%c0_2, %c0_3] : memref<3x2xf32, #tpu.memory_space<smem>>
    %c0_4 = arith.constant 0 : index
    %c1 = arith.constant 1 : index
    %9 = memref.load %arg26[%c0_4, %c1] : memref<3x2xf32, #tpu.memory_space<smem>>
    %cst = arith.constant dense<0.000000e+00> : vector<8xf32>
    %10 = vector.multi_reduction <add>, %7, %cst [1] : vector<8x32xf32> to vector<8xf32>
    %11 = vector.shape_cast %10 : vector<8xf32> to vector<8x1xf32>
    %cst_5 = arith.constant 3.200000e+01 : f32
    %12 = vector.broadcast %cst_5 : f32 to vector<8x1xf32>
    %13 = arith.divf %11, %12 : vector<8x1xf32>
    %14 = vector.broadcast %13 : vector<8x1xf32> to vector<8x32xf32>
    %15 = arith.subf %7, %14 : vector<8x32xf32>
    %16 = arith.mulf %15, %15 : vector<8x32xf32>
    %cst_6 = arith.constant dense<0.000000e+00> : vector<8xf32>
    %17 = vector.multi_reduction <add>, %16, %cst_6 [1] : vector<8x32xf32> to vector<8xf32>
    %18 = vector.shape_cast %17 : vector<8xf32> to vector<8x1xf32>
    %cst_7 = arith.constant 0.0322580636 : f32
    %19 = vector.broadcast %cst_7 : f32 to vector<8x1xf32>
    %20 = arith.mulf %18, %19 : vector<8x1xf32>
    %21 = vector.broadcast %8 : f32 to vector<8x32xf32>
    %22 = arith.mulf %21, %15 : vector<8x32xf32>
    %23 = math.sqrt %20 : vector<8x1xf32>
    %cst_8 = arith.constant 9.99999997E-7 : f32
    %24 = vector.broadcast %cst_8 : f32 to vector<8x1xf32>
    %25 = arith.addf %23, %24 : vector<8x1xf32>
    %26 = vector.broadcast %25 : vector<8x1xf32> to vector<8x32xf32>
    %27 = arith.divf %22, %26 : vector<8x32xf32>
    %28 = vector.broadcast %9 : f32 to vector<8x32xf32>
    %29 = arith.addf %27, %28 : vector<8x32xf32>
    %c0_9 = arith.constant 0 : index
    %c0_10 = arith.constant 0 : index
    %30 = vector.load %arg28[%c0_9, %c0_10] : memref<8x32xbf16, #tpu.memory_space<vmem>>, vector<8x32xbf16>
    %c0_11 = arith.constant 0 : index
    %c0_12 = arith.constant 0 : index
    %31 = vector.load %arg29[%c0_11, %c0_12] : memref<8x32xbf16, #tpu.memory_space<vmem>>, vector<8x32xbf16>
    %c0_13 = arith.constant 0 : index
    %c0_14 = arith.constant 0 : index
    %32 = vector.load %arg6[%c0_13, %c0_14] : memref<32x32xbf16, #tpu.memory_space<vmem>>, vector<32x32xbf16>
    %c0_15 = arith.constant 0 : index
    %c0_16 = arith.constant 0 : index
    %33 = vector.load %arg7[%c0_15, %c0_16] : memref<1x32xf32, #tpu.memory_space<vmem>>, vector<1x32xf32>
    %c0_17 = arith.constant 0 : index
    %c0_18 = arith.constant 0 : index
    %34 = vector.load %arg12[%c0_17, %c0_18] : memref<32x32xbf16, #tpu.memory_space<vmem>>, vector<32x32xbf16>
    %c0_19 = arith.constant 0 : index
    %c0_20 = arith.constant 0 : index
    %35 = vector.load %arg13[%c0_19, %c0_20] : memref<1x32xf32, #tpu.memory_space<vmem>>, vector<1x32xf32>
    %c0_21 = arith.constant 0 : index
    %c0_22 = arith.constant 0 : index
    %36 = vector.load %arg4[%c0_21, %c0_22] : memref<8x8xf32, #tpu.memory_space<vmem>>, vector<8x8xf32>
    %37 = arith.truncf %29 : vector<8x32xf32> to vector<8x32xbf16>
    %cst_23 = arith.constant dense<0.000000e+00> : vector<8x32xf32>
    %38 = tpu.matmul %37, %32, %cst_23 {dimension_numbers = #tpu.dot_dimension_numbers<[1], [0], [0], [1], [0, 0, 1, 1], [], []>} : vector<8x32xbf16>, vector<32x32xbf16>, vector<8x32xf32> -> vector<8x32xf32>
    %39 = vector.broadcast %33 : vector<1x32xf32> to vector<8x32xf32>
    %40 = arith.addf %38, %39 : vector<8x32xf32>
    %41 = arith.truncf %40 : vector<8x32xf32> to vector<8x32xbf16>
    %42 = vector.extract_strided_slice %41 {offsets = [0, 0], sizes = [8, 8], strides = [1, 1]} : vector<8x32xbf16> to vector<8x8xbf16>
    %43 = vector.extract_strided_slice %30 {offsets = [0, 0], sizes = [8, 8], strides = [1, 1]} : vector<8x32xbf16> to vector<8x8xbf16>
    %cst_24 = arith.constant dense<0.000000e+00> : vector<8x8xf32>
    %44 = tpu.matmul %42, %43, %cst_24 {dimension_numbers = #tpu.dot_dimension_numbers<[1], [1], [0], [0], [0, 0, 1, 0], [], []>} : vector<8x8xbf16>, vector<8x8xbf16>, vector<8x8xf32> -> vector<8x8xf32>
    %45 = arith.addf %44, %36 : vector<8x8xf32>
    %cst_25 = arith.constant dense<0xFF800000> : vector<8xf32>
    %46 = vector.multi_reduction <maximumf>, %45, %cst_25 [1] : vector<8x8xf32> to vector<8xf32>
    %47 = vector.shape_cast %46 : vector<8xf32> to vector<8x1xf32>
    %48 = vector.broadcast %47 : vector<8x1xf32> to vector<8x8xf32>
    %49 = arith.subf %45, %48 : vector<8x8xf32>
    %50 = math.exp %49 : vector<8x8xf32>
    %cst_26 = arith.constant dense<0.000000e+00> : vector<8xf32>
    %51 = vector.multi_reduction <add>, %50, %cst_26 [1] : vector<8x8xf32> to vector<8xf32>
    %52 = vector.shape_cast %51 : vector<8xf32> to vector<8x1xf32>
    %53 = tpu.reciprocal %52 {approx = true} : vector<8x1xf32> -> vector<8x1xf32>
    %54 = vector.broadcast %53 : vector<8x1xf32> to vector<8x8xf32>
    %55 = arith.mulf %50, %54 : vector<8x8xf32>
    %56 = arith.truncf %55 : vector<8x8xf32> to vector<8x8xbf16>
    %57 = vector.extract_strided_slice %31 {offsets = [0, 0], sizes = [8, 8], strides = [1, 1]} : vector<8x32xbf16> to vector<8x8xbf16>
    %cst_27 = arith.constant dense<0.000000e+00> : vector<8x8xf32>
    %58 = tpu.matmul %56, %57, %cst_27 {dimension_numbers = #tpu.dot_dimension_numbers<[1], [0], [0], [1], [0, 0, 1, 1], [], []>} : vector<8x8xbf16>, vector<8x8xbf16>, vector<8x8xf32> -> vector<8x8xf32>
    %59 = vector.extract_strided_slice %41 {offsets = [0, 8], sizes = [8, 8], strides = [1, 1]} : vector<8x32xbf16> to vector<8x8xbf16>
    %60 = vector.extract_strided_slice %30 {offsets = [0, 8], sizes = [8, 8], strides = [1, 1]} : vector<8x32xbf16> to vector<8x8xbf16>
    %cst_28 = arith.constant dense<0.000000e+00> : vector<8x8xf32>
    %61 = tpu.matmul %59, %60, %cst_28 {dimension_numbers = #tpu.dot_dimension_numbers<[1], [1], [0], [0], [0, 0, 1, 0], [], []>} : vector<8x8xbf16>, vector<8x8xbf16>, vector<8x8xf32> -> vector<8x8xf32>
    %62 = arith.addf %61, %36 : vector<8x8xf32>
    %cst_29 = arith.constant dense<0xFF800000> : vector<8xf32>
    %63 = vector.multi_reduction <maximumf>, %62, %cst_29 [1] : vector<8x8xf32> to vector<8xf32>
    %64 = vector.shape_cast %63 : vector<8xf32> to vector<8x1xf32>
    %65 = vector.broadcast %64 : vector<8x1xf32> to vector<8x8xf32>
    %66 = arith.subf %62, %65 : vector<8x8xf32>
    %67 = math.exp %66 : vector<8x8xf32>
    %cst_30 = arith.constant dense<0.000000e+00> : vector<8xf32>
    %68 = vector.multi_reduction <add>, %67, %cst_30 [1] : vector<8x8xf32> to vector<8xf32>
    %69 = vector.shape_cast %68 : vector<8xf32> to vector<8x1xf32>
    %70 = tpu.reciprocal %69 {approx = true} : vector<8x1xf32> -> vector<8x1xf32>
    %71 = vector.broadcast %70 : vector<8x1xf32> to vector<8x8xf32>
    %72 = arith.mulf %67, %71 : vector<8x8xf32>
    %73 = arith.truncf %72 : vector<8x8xf32> to vector<8x8xbf16>
    %74 = vector.extract_strided_slice %31 {offsets = [0, 8], sizes = [8, 8], strides = [1, 1]} : vector<8x32xbf16> to vector<8x8xbf16>
    %cst_31 = arith.constant dense<0.000000e+00> : vector<8x8xf32>
    %75 = tpu.matmul %73, %74, %cst_31 {dimension_numbers = #tpu.dot_dimension_numbers<[1], [0], [0], [1], [0, 0, 1, 1], [], []>} : vector<8x8xbf16>, vector<8x8xbf16>, vector<8x8xf32> -> vector<8x8xf32>
    %76 = vector.extract_strided_slice %41 {offsets = [0, 16], sizes = [8, 8], strides = [1, 1]} : vector<8x32xbf16> to vector<8x8xbf16>
    %77 = vector.extract_strided_slice %30 {offsets = [0, 16], sizes = [8, 8], strides = [1, 1]} : vector<8x32xbf16> to vector<8x8xbf16>
    %cst_32 = arith.constant dense<0.000000e+00> : vector<8x8xf32>
    %78 = tpu.matmul %76, %77, %cst_32 {dimension_numbers = #tpu.dot_dimension_numbers<[1], [1], [0], [0], [0, 0, 1, 0], [], []>} : vector<8x8xbf16>, vector<8x8xbf16>, vector<8x8xf32> -> vector<8x8xf32>
    %79 = arith.addf %78, %36 : vector<8x8xf32>
    %cst_33 = arith.constant dense<0xFF800000> : vector<8xf32>
    %80 = vector.multi_reduction <maximumf>, %79, %cst_33 [1] : vector<8x8xf32> to vector<8xf32>
    %81 = vector.shape_cast %80 : vector<8xf32> to vector<8x1xf32>
    %82 = vector.broadcast %81 : vector<8x1xf32> to vector<8x8xf32>
    %83 = arith.subf %79, %82 : vector<8x8xf32>
    %84 = math.exp %83 : vector<8x8xf32>
    %cst_34 = arith.constant dense<0.000000e+00> : vector<8xf32>
    %85 = vector.multi_reduction <add>, %84, %cst_34 [1] : vector<8x8xf32> to vector<8xf32>
    %86 = vector.shape_cast %85 : vector<8xf32> to vector<8x1xf32>
    %87 = tpu.reciprocal %86 {approx = true} : vector<8x1xf32> -> vector<8x1xf32>
    %88 = vector.broadcast %87 : vector<8x1xf32> to vector<8x8xf32>
    %89 = arith.mulf %84, %88 : vector<8x8xf32>
    %90 = arith.truncf %89 : vector<8x8xf32> to vector<8x8xbf16>
    %91 = vector.extract_strided_slice %31 {offsets = [0, 16], sizes = [8, 8], strides = [1, 1]} : vector<8x32xbf16> to vector<8x8xbf16>
    %cst_35 = arith.constant dense<0.000000e+00> : vector<8x8xf32>
    %92 = tpu.matmul %90, %91, %cst_35 {dimension_numbers = #tpu.dot_dimension_numbers<[1], [0], [0], [1], [0, 0, 1, 1], [], []>} : vector<8x8xbf16>, vector<8x8xbf16>, vector<8x8xf32> -> vector<8x8xf32>
    %93 = vector.extract_strided_slice %41 {offsets = [0, 24], sizes = [8, 8], strides = [1, 1]} : vector<8x32xbf16> to vector<8x8xbf16>
    %94 = vector.extract_strided_slice %30 {offsets = [0, 24], sizes = [8, 8], strides = [1, 1]} : vector<8x32xbf16> to vector<8x8xbf16>
    %cst_36 = arith.constant dense<0.000000e+00> : vector<8x8xf32>
    %95 = tpu.matmul %93, %94, %cst_36 {dimension_numbers = #tpu.dot_dimension_numbers<[1], [1], [0], [0], [0, 0, 1, 0], [], []>} : vector<8x8xbf16>, vector<8x8xbf16>, vector<8x8xf32> -> vector<8x8xf32>
    %96 = arith.addf %95, %36 : vector<8x8xf32>
    %cst_37 = arith.constant dense<0xFF800000> : vector<8xf32>
    %97 = vector.multi_reduction <maximumf>, %96, %cst_37 [1] : vector<8x8xf32> to vector<8xf32>
    %98 = vector.shape_cast %97 : vector<8xf32> to vector<8x1xf32>
    %99 = vector.broadcast %98 : vector<8x1xf32> to vector<8x8xf32>
    %100 = arith.subf %96, %99 : vector<8x8xf32>
    %101 = math.exp %100 : vector<8x8xf32>
    %cst_38 = arith.constant dense<0.000000e+00> : vector<8xf32>
    %102 = vector.multi_reduction <add>, %101, %cst_38 [1] : vector<8x8xf32> to vector<8xf32>
    %103 = vector.shape_cast %102 : vector<8xf32> to vector<8x1xf32>
    %104 = tpu.reciprocal %103 {approx = true} : vector<8x1xf32> -> vector<8x1xf32>
    %105 = vector.broadcast %104 : vector<8x1xf32> to vector<8x8xf32>
    %106 = arith.mulf %101, %105 : vector<8x8xf32>
    %107 = arith.truncf %106 : vector<8x8xf32> to vector<8x8xbf16>
    %108 = vector.extract_strided_slice %31 {offsets = [0, 24], sizes = [8, 8], strides = [1, 1]} : vector<8x32xbf16> to vector<8x8xbf16>
    %cst_39 = arith.constant dense<0.000000e+00> : vector<8x8xf32>
    %109 = tpu.matmul %107, %108, %cst_39 {dimension_numbers = #tpu.dot_dimension_numbers<[1], [0], [0], [1], [0, 0, 1, 1], [], []>} : vector<8x8xbf16>, vector<8x8xbf16>, vector<8x8xf32> -> vector<8x8xf32>
    %110 = tpu.concatenate %58, %75, %92, %109 in 1 : vector<8x8xf32>, vector<8x8xf32>, vector<8x8xf32>, vector<8x8xf32> -> vector<8x32xf32>
    %111 = arith.truncf %110 : vector<8x32xf32> to vector<8x32xbf16>
    %cst_40 = arith.constant dense<0.000000e+00> : vector<8x32xf32>
    %112 = tpu.matmul %111, %34, %cst_40 {dimension_numbers = #tpu.dot_dimension_numbers<[1], [0], [0], [1], [0, 0, 1, 1], [], []>} : vector<8x32xbf16>, vector<32x32xbf16>, vector<8x32xf32> -> vector<8x32xf32>
    %113 = vector.broadcast %35 : vector<1x32xf32> to vector<8x32xf32>
    %114 = arith.addf %112, %113 : vector<8x32xf32>
    %115 = arith.addf %7, %114 : vector<8x32xf32>
    %c1_41 = arith.constant 1 : index
    %c0_42 = arith.constant 0 : index
    %116 = memref.load %arg26[%c1_41, %c0_42] : memref<3x2xf32, #tpu.memory_space<smem>>
    %c1_43 = arith.constant 1 : index
    %c1_44 = arith.constant 1 : index
    %117 = memref.load %arg26[%c1_43, %c1_44] : memref<3x2xf32, #tpu.memory_space<smem>>
    %cst_45 = arith.constant dense<0.000000e+00> : vector<8xf32>
    %118 = vector.multi_reduction <add>, %115, %cst_45 [1] : vector<8x32xf32> to vector<8xf32>
    %119 = vector.shape_cast %118 : vector<8xf32> to vector<8x1xf32>
    %cst_46 = arith.constant 3.200000e+01 : f32
    %120 = vector.broadcast %cst_46 : f32 to vector<8x1xf32>
    %121 = arith.divf %119, %120 : vector<8x1xf32>
    %122 = vector.broadcast %121 : vector<8x1xf32> to vector<8x32xf32>
    %123 = arith.subf %115, %122 : vector<8x32xf32>
    %124 = arith.mulf %123, %123 : vector<8x32xf32>
    %cst_47 = arith.constant dense<0.000000e+00> : vector<8xf32>
    %125 = vector.multi_reduction <add>, %124, %cst_47 [1] : vector<8x32xf32> to vector<8xf32>
    %126 = vector.shape_cast %125 : vector<8xf32> to vector<8x1xf32>
    %cst_48 = arith.constant 0.0322580636 : f32
    %127 = vector.broadcast %cst_48 : f32 to vector<8x1xf32>
    %128 = arith.mulf %126, %127 : vector<8x1xf32>
    %129 = vector.broadcast %116 : f32 to vector<8x32xf32>
    %130 = arith.mulf %129, %123 : vector<8x32xf32>
    %131 = math.sqrt %128 : vector<8x1xf32>
    %cst_49 = arith.constant 9.99999997E-7 : f32
    %132 = vector.broadcast %cst_49 : f32 to vector<8x1xf32>
    %133 = arith.addf %131, %132 : vector<8x1xf32>
    %134 = vector.broadcast %133 : vector<8x1xf32> to vector<8x32xf32>
    %135 = arith.divf %130, %134 : vector<8x32xf32>
    %136 = vector.broadcast %117 : f32 to vector<8x32xf32>
    %137 = arith.addf %135, %136 : vector<8x32xf32>
    %c0_50 = arith.constant 0 : index
    %c0_51 = arith.constant 0 : index
    %138 = vector.load %arg30[%c0_50, %c0_51] : memref<8x32xbf16, #tpu.memory_space<vmem>>, vector<8x32xbf16>
    %c0_52 = arith.constant 0 : index
    %c0_53 = arith.constant 0 : index
    %139 = vector.load %arg31[%c0_52, %c0_53] : memref<8x32xbf16, #tpu.memory_space<vmem>>, vector<8x32xbf16>
    %c0_54 = arith.constant 0 : index
    %c0_55 = arith.constant 0 : index
    %140 = vector.load %arg14[%c0_54, %c0_55] : memref<32x32xbf16, #tpu.memory_space<vmem>>, vector<32x32xbf16>
    %c0_56 = arith.constant 0 : index
    %c0_57 = arith.constant 0 : index
    %141 = vector.load %arg15[%c0_56, %c0_57] : memref<1x32xf32, #tpu.memory_space<vmem>>, vector<1x32xf32>
    %c0_58 = arith.constant 0 : index
    %c0_59 = arith.constant 0 : index
    %142 = vector.load %arg20[%c0_58, %c0_59] : memref<32x32xbf16, #tpu.memory_space<vmem>>, vector<32x32xbf16>
    %c0_60 = arith.constant 0 : index
    %c0_61 = arith.constant 0 : index
    %143 = vector.load %arg21[%c0_60, %c0_61] : memref<1x32xf32, #tpu.memory_space<vmem>>, vector<1x32xf32>
    %c0_62 = arith.constant 0 : index
    %c0_63 = arith.constant 0 : index
    %144 = vector.load %arg5[%c0_62, %c0_63] : memref<8x8xf32, #tpu.memory_space<vmem>>, vector<8x8xf32>
    %145 = arith.truncf %137 : vector<8x32xf32> to vector<8x32xbf16>
    %cst_64 = arith.constant dense<0.000000e+00> : vector<8x32xf32>
    %146 = tpu.matmul %145, %140, %cst_64 {dimension_numbers = #tpu.dot_dimension_numbers<[1], [0], [0], [1], [0, 0, 1, 1], [], []>} : vector<8x32xbf16>, vector<32x32xbf16>, vector<8x32xf32> -> vector<8x32xf32>
    %147 = vector.broadcast %141 : vector<1x32xf32> to vector<8x32xf32>
    %148 = arith.addf %146, %147 : vector<8x32xf32>
    %149 = arith.truncf %148 : vector<8x32xf32> to vector<8x32xbf16>
    %150 = vector.extract_strided_slice %149 {offsets = [0, 0], sizes = [8, 8], strides = [1, 1]} : vector<8x32xbf16> to vector<8x8xbf16>
    %151 = vector.extract_strided_slice %138 {offsets = [0, 0], sizes = [8, 8], strides = [1, 1]} : vector<8x32xbf16> to vector<8x8xbf16>
    %cst_65 = arith.constant dense<0.000000e+00> : vector<8x8xf32>
    %152 = tpu.matmul %150, %151, %cst_65 {dimension_numbers = #tpu.dot_dimension_numbers<[1], [1], [0], [0], [0, 0, 1, 0], [], []>} : vector<8x8xbf16>, vector<8x8xbf16>, vector<8x8xf32> -> vector<8x8xf32>
    %153 = arith.addf %152, %144 : vector<8x8xf32>
    %cst_66 = arith.constant dense<0xFF800000> : vector<8xf32>
    %154 = vector.multi_reduction <maximumf>, %153, %cst_66 [1] : vector<8x8xf32> to vector<8xf32>
    %155 = vector.shape_cast %154 : vector<8xf32> to vector<8x1xf32>
    %156 = vector.broadcast %155 : vector<8x1xf32> to vector<8x8xf32>
    %157 = arith.subf %153, %156 : vector<8x8xf32>
    %158 = math.exp %157 : vector<8x8xf32>
    %cst_67 = arith.constant dense<0.000000e+00> : vector<8xf32>
    %159 = vector.multi_reduction <add>, %158, %cst_67 [1] : vector<8x8xf32> to vector<8xf32>
    %160 = vector.shape_cast %159 : vector<8xf32> to vector<8x1xf32>
    %161 = tpu.reciprocal %160 {approx = true} : vector<8x1xf32> -> vector<8x1xf32>
    %162 = vector.broadcast %161 : vector<8x1xf32> to vector<8x8xf32>
    %163 = arith.mulf %158, %162 : vector<8x8xf32>
    %164 = arith.truncf %163 : vector<8x8xf32> to vector<8x8xbf16>
    %165 = vector.extract_strided_slice %139 {offsets = [0, 0], sizes = [8, 8], strides = [1, 1]} : vector<8x32xbf16> to vector<8x8xbf16>
    %cst_68 = arith.constant dense<0.000000e+00> : vector<8x8xf32>
    %166 = tpu.matmul %164, %165, %cst_68 {dimension_numbers = #tpu.dot_dimension_numbers<[1], [0], [0], [1], [0, 0, 1, 1], [], []>} : vector<8x8xbf16>, vector<8x8xbf16>, vector<8x8xf32> -> vector<8x8xf32>
    %167 = vector.extract_strided_slice %149 {offsets = [0, 8], sizes = [8, 8], strides = [1, 1]} : vector<8x32xbf16> to vector<8x8xbf16>
    %168 = vector.extract_strided_slice %138 {offsets = [0, 8], sizes = [8, 8], strides = [1, 1]} : vector<8x32xbf16> to vector<8x8xbf16>
    %cst_69 = arith.constant dense<0.000000e+00> : vector<8x8xf32>
    %169 = tpu.matmul %167, %168, %cst_69 {dimension_numbers = #tpu.dot_dimension_numbers<[1], [1], [0], [0], [0, 0, 1, 0], [], []>} : vector<8x8xbf16>, vector<8x8xbf16>, vector<8x8xf32> -> vector<8x8xf32>
    %170 = arith.addf %169, %144 : vector<8x8xf32>
    %cst_70 = arith.constant dense<0xFF800000> : vector<8xf32>
    %171 = vector.multi_reduction <maximumf>, %170, %cst_70 [1] : vector<8x8xf32> to vector<8xf32>
    %172 = vector.shape_cast %171 : vector<8xf32> to vector<8x1xf32>
    %173 = vector.broadcast %172 : vector<8x1xf32> to vector<8x8xf32>
    %174 = arith.subf %170, %173 : vector<8x8xf32>
    %175 = math.exp %174 : vector<8x8xf32>
    %cst_71 = arith.constant dense<0.000000e+00> : vector<8xf32>
    %176 = vector.multi_reduction <add>, %175, %cst_71 [1] : vector<8x8xf32> to vector<8xf32>
    %177 = vector.shape_cast %176 : vector<8xf32> to vector<8x1xf32>
    %178 = tpu.reciprocal %177 {approx = true} : vector<8x1xf32> -> vector<8x1xf32>
    %179 = vector.broadcast %178 : vector<8x1xf32> to vector<8x8xf32>
    %180 = arith.mulf %175, %179 : vector<8x8xf32>
    %181 = arith.truncf %180 : vector<8x8xf32> to vector<8x8xbf16>
    %182 = vector.extract_strided_slice %139 {offsets = [0, 8], sizes = [8, 8], strides = [1, 1]} : vector<8x32xbf16> to vector<8x8xbf16>
    %cst_72 = arith.constant dense<0.000000e+00> : vector<8x8xf32>
    %183 = tpu.matmul %181, %182, %cst_72 {dimension_numbers = #tpu.dot_dimension_numbers<[1], [0], [0], [1], [0, 0, 1, 1], [], []>} : vector<8x8xbf16>, vector<8x8xbf16>, vector<8x8xf32> -> vector<8x8xf32>
    %184 = vector.extract_strided_slice %149 {offsets = [0, 16], sizes = [8, 8], strides = [1, 1]} : vector<8x32xbf16> to vector<8x8xbf16>
    %185 = vector.extract_strided_slice %138 {offsets = [0, 16], sizes = [8, 8], strides = [1, 1]} : vector<8x32xbf16> to vector<8x8xbf16>
    %cst_73 = arith.constant dense<0.000000e+00> : vector<8x8xf32>
    %186 = tpu.matmul %184, %185, %cst_73 {dimension_numbers = #tpu.dot_dimension_numbers<[1], [1], [0], [0], [0, 0, 1, 0], [], []>} : vector<8x8xbf16>, vector<8x8xbf16>, vector<8x8xf32> -> vector<8x8xf32>
    %187 = arith.addf %186, %144 : vector<8x8xf32>
    %cst_74 = arith.constant dense<0xFF800000> : vector<8xf32>
    %188 = vector.multi_reduction <maximumf>, %187, %cst_74 [1] : vector<8x8xf32> to vector<8xf32>
    %189 = vector.shape_cast %188 : vector<8xf32> to vector<8x1xf32>
    %190 = vector.broadcast %189 : vector<8x1xf32> to vector<8x8xf32>
    %191 = arith.subf %187, %190 : vector<8x8xf32>
    %192 = math.exp %191 : vector<8x8xf32>
    %cst_75 = arith.constant dense<0.000000e+00> : vector<8xf32>
    %193 = vector.multi_reduction <add>, %192, %cst_75 [1] : vector<8x8xf32> to vector<8xf32>
    %194 = vector.shape_cast %193 : vector<8xf32> to vector<8x1xf32>
    %195 = tpu.reciprocal %194 {approx = true} : vector<8x1xf32> -> vector<8x1xf32>
    %196 = vector.broadcast %195 : vector<8x1xf32> to vector<8x8xf32>
    %197 = arith.mulf %192, %196 : vector<8x8xf32>
    %198 = arith.truncf %197 : vector<8x8xf32> to vector<8x8xbf16>
    %199 = vector.extract_strided_slice %139 {offsets = [0, 16], sizes = [8, 8], strides = [1, 1]} : vector<8x32xbf16> to vector<8x8xbf16>
    %cst_76 = arith.constant dense<0.000000e+00> : vector<8x8xf32>
    %200 = tpu.matmul %198, %199, %cst_76 {dimension_numbers = #tpu.dot_dimension_numbers<[1], [0], [0], [1], [0, 0, 1, 1], [], []>} : vector<8x8xbf16>, vector<8x8xbf16>, vector<8x8xf32> -> vector<8x8xf32>
    %201 = vector.extract_strided_slice %149 {offsets = [0, 24], sizes = [8, 8], strides = [1, 1]} : vector<8x32xbf16> to vector<8x8xbf16>
    %202 = vector.extract_strided_slice %138 {offsets = [0, 24], sizes = [8, 8], strides = [1, 1]} : vector<8x32xbf16> to vector<8x8xbf16>
    %cst_77 = arith.constant dense<0.000000e+00> : vector<8x8xf32>
    %203 = tpu.matmul %201, %202, %cst_77 {dimension_numbers = #tpu.dot_dimension_numbers<[1], [1], [0], [0], [0, 0, 1, 0], [], []>} : vector<8x8xbf16>, vector<8x8xbf16>, vector<8x8xf32> -> vector<8x8xf32>
    %204 = arith.addf %203, %144 : vector<8x8xf32>
    %cst_78 = arith.constant dense<0xFF800000> : vector<8xf32>
    %205 = vector.multi_reduction <maximumf>, %204, %cst_78 [1] : vector<8x8xf32> to vector<8xf32>
    %206 = vector.shape_cast %205 : vector<8xf32> to vector<8x1xf32>
    %207 = vector.broadcast %206 : vector<8x1xf32> to vector<8x8xf32>
    %208 = arith.subf %204, %207 : vector<8x8xf32>
    %209 = math.exp %208 : vector<8x8xf32>
    %cst_79 = arith.constant dense<0.000000e+00> : vector<8xf32>
    %210 = vector.multi_reduction <add>, %209, %cst_79 [1] : vector<8x8xf32> to vector<8xf32>
    %211 = vector.shape_cast %210 : vector<8xf32> to vector<8x1xf32>
    %212 = tpu.reciprocal %211 {approx = true} : vector<8x1xf32> -> vector<8x1xf32>
    %213 = vector.broadcast %212 : vector<8x1xf32> to vector<8x8xf32>
    %214 = arith.mulf %209, %213 : vector<8x8xf32>
    %215 = arith.truncf %214 : vector<8x8xf32> to vector<8x8xbf16>
    %216 = vector.extract_strided_slice %139 {offsets = [0, 24], sizes = [8, 8], strides = [1, 1]} : vector<8x32xbf16> to vector<8x8xbf16>
    %cst_80 = arith.constant dense<0.000000e+00> : vector<8x8xf32>
    %217 = tpu.matmul %215, %216, %cst_80 {dimension_numbers = #tpu.dot_dimension_numbers<[1], [0], [0], [1], [0, 0, 1, 1], [], []>} : vector<8x8xbf16>, vector<8x8xbf16>, vector<8x8xf32> -> vector<8x8xf32>
    %218 = tpu.concatenate %166, %183, %200, %217 in 1 : vector<8x8xf32>, vector<8x8xf32>, vector<8x8xf32>, vector<8x8xf32> -> vector<8x32xf32>
    %219 = arith.truncf %218 : vector<8x32xf32> to vector<8x32xbf16>
    %cst_81 = arith.constant dense<0.000000e+00> : vector<8x32xf32>
    %220 = tpu.matmul %219, %142, %cst_81 {dimension_numbers = #tpu.dot_dimension_numbers<[1], [0], [0], [1], [0, 0, 1, 1], [], []>} : vector<8x32xbf16>, vector<32x32xbf16>, vector<8x32xf32> -> vector<8x32xf32>
    %221 = vector.broadcast %143 : vector<1x32xf32> to vector<8x32xf32>
    %222 = arith.addf %220, %221 : vector<8x32xf32>
    %223 = arith.addf %115, %222 : vector<8x32xf32>
    %c2 = arith.constant 2 : index
    %c0_82 = arith.constant 0 : index
    %224 = memref.load %arg26[%c2, %c0_82] : memref<3x2xf32, #tpu.memory_space<smem>>
    %c2_83 = arith.constant 2 : index
    %c1_84 = arith.constant 1 : index
    %225 = memref.load %arg26[%c2_83, %c1_84] : memref<3x2xf32, #tpu.memory_space<smem>>
    %cst_85 = arith.constant dense<0.000000e+00> : vector<8xf32>
    %226 = vector.multi_reduction <add>, %223, %cst_85 [1] : vector<8x32xf32> to vector<8xf32>
    %227 = vector.shape_cast %226 : vector<8xf32> to vector<8x1xf32>
    %cst_86 = arith.constant 3.200000e+01 : f32
    %228 = vector.broadcast %cst_86 : f32 to vector<8x1xf32>
    %229 = arith.divf %227, %228 : vector<8x1xf32>
    %230 = vector.broadcast %229 : vector<8x1xf32> to vector<8x32xf32>
    %231 = arith.subf %223, %230 : vector<8x32xf32>
    %232 = arith.mulf %231, %231 : vector<8x32xf32>
    %cst_87 = arith.constant dense<0.000000e+00> : vector<8xf32>
    %233 = vector.multi_reduction <add>, %232, %cst_87 [1] : vector<8x32xf32> to vector<8xf32>
    %234 = vector.shape_cast %233 : vector<8xf32> to vector<8x1xf32>
    %cst_88 = arith.constant 0.0322580636 : f32
    %235 = vector.broadcast %cst_88 : f32 to vector<8x1xf32>
    %236 = arith.mulf %234, %235 : vector<8x1xf32>
    %237 = vector.broadcast %224 : f32 to vector<8x32xf32>
    %238 = arith.mulf %237, %231 : vector<8x32xf32>
    %239 = math.sqrt %236 : vector<8x1xf32>
    %cst_89 = arith.constant 9.99999997E-7 : f32
    %240 = vector.broadcast %cst_89 : f32 to vector<8x1xf32>
    %241 = arith.addf %239, %240 : vector<8x1xf32>
    %242 = vector.broadcast %241 : vector<8x1xf32> to vector<8x32xf32>
    %243 = arith.divf %238, %242 : vector<8x32xf32>
    %244 = vector.broadcast %225 : f32 to vector<8x32xf32>
    %245 = arith.addf %243, %244 : vector<8x32xf32>
    %246 = arith.truncf %245 : vector<8x32xf32> to vector<8x32xbf16>
    %c0_90 = arith.constant 0 : index
    %c0_91 = arith.constant 0 : index
    %247 = vector.load %arg22[%c0_90, %c0_91] : memref<32x64xbf16, #tpu.memory_space<vmem>>, vector<32x64xbf16>
    %cst_92 = arith.constant dense<0.000000e+00> : vector<8x64xf32>
    %248 = tpu.matmul %246, %247, %cst_92 {dimension_numbers = #tpu.dot_dimension_numbers<[1], [0], [0], [1], [0, 0, 1, 1], [], []>} : vector<8x32xbf16>, vector<32x64xbf16>, vector<8x64xf32> -> vector<8x64xf32>
    %c0_93 = arith.constant 0 : index
    %c0_94 = arith.constant 0 : index
    %249 = vector.load %arg23[%c0_93, %c0_94] : memref<1x64xf32, #tpu.memory_space<vmem>>, vector<1x64xf32>
    %250 = vector.broadcast %249 : vector<1x64xf32> to vector<8x64xf32>
    %251 = arith.addf %248, %250 : vector<8x64xf32>
    %cst_95 = arith.constant 0.000000e+00 : f32
    %252 = vector.broadcast %cst_95 : f32 to vector<8x64xf32>
    %253 = arith.maximumf %251, %252 : vector<8x64xf32>
    %254 = arith.truncf %253 : vector<8x64xf32> to vector<8x64xbf16>
    %c0_96 = arith.constant 0 : index
    %c0_97 = arith.constant 0 : index
    %255 = vector.load %arg24[%c0_96, %c0_97] : memref<64x32xbf16, #tpu.memory_space<vmem>>, vector<64x32xbf16>
    %cst_98 = arith.constant dense<0.000000e+00> : vector<8x32xf32>
    %256 = tpu.matmul %254, %255, %cst_98 {dimension_numbers = #tpu.dot_dimension_numbers<[1], [0], [0], [1], [0, 0, 1, 1], [], []>} : vector<8x64xbf16>, vector<64x32xbf16>, vector<8x32xf32> -> vector<8x32xf32>
    %257 = arith.addf %223, %256 : vector<8x32xf32>
    %c0_99 = arith.constant 0 : index
    %c0_100 = arith.constant 0 : index
    %258 = vector.load %arg25[%c0_99, %c0_100] : memref<1x32xf32, #tpu.memory_space<vmem>>, vector<1x32xf32>
    %259 = vector.broadcast %258 : vector<1x32xf32> to vector<8x32xf32>
    %260 = arith.addf %257, %259 : vector<8x32xf32>
    %c0_101 = arith.constant 0 : index
    %c0_102 = arith.constant 0 : index
    %c0_103 = arith.constant 0 : index
    %261 = vector.load %arg27[%c0_101, %c0_102, %c0_103] : memref<1x8x32xf32, #tpu.memory_space<vmem>>, vector<1x8x32xf32>
    %262 = vector.shape_cast %261 : vector<1x8x32xf32> to vector<8x32xf32>
    %263 = vector.shape_cast %260 : vector<8x32xf32> to vector<1x8x32xf32>
    tpu.vector_store %arg27[%c0_101, %c0_102, %c0_103], %263 {strides = array<i32>} : memref<1x8x32xf32, #tpu.memory_space<vmem>>, vector<1x8x32xf32>,
    return
  }
  func.func @transform_0(%arg0: i32, %arg1: i32) -> (i32, i32, i32) {
    %c0_i32 = arith.constant 0 : i32
    %c0_i32_0 = arith.constant 0 : i32
    %c0_i32_1 = arith.constant 0 : i32
    return %arg0, %c0_i32, %c0_i32_0 : i32, i32, i32
  }
  func.func @transform_1(%arg0: i32, %arg1: i32) -> (i32, i32, i32) {
    %c0_i32 = arith.constant 0 : i32
    %c0_i32_0 = arith.constant 0 : i32
    %c0_i32_1 = arith.constant 0 : i32
    return %arg0, %c0_i32, %c0_i32_0 : i32, i32, i32
  }
  func.func @transform_2(%arg0: i32, %arg1: i32) -> (i32, i32) {
    %c0_i32 = arith.constant 0 : i32
    %c0_i32_0 = arith.constant 0 : i32
    return %arg1, %c0_i32 : i32, i32
  }
  func.func @transform_3(%arg0: i32, %arg1: i32) -> (i32, i32) {
    %c0_i32 = arith.constant 0 : i32
    %c0_i32_0 = arith.constant 0 : i32
    return %arg1, %c0_i32 : i32, i32
  }
  func.func @transform_4(%arg0: i32, %arg1: i32) -> (i32, i32) {
    %c0_i32 = arith.constant 0 : i32
    %c0_i32_0 = arith.constant 0 : i32
    %c0_i32_1 = arith.constant 0 : i32
    return %c0_i32, %c0_i32_0 : i32, i32
  }
  func.func @transform_5(%arg0: i32, %arg1: i32) -> (i32, i32) {
    %c0_i32 = arith.constant 0 : i32
    %c0_i32_0 = arith.constant 0 : i32
    %c0_i32_1 = arith.constant 0 : i32
    return %c0_i32, %c0_i32_0 : i32, i32
  }
  func.func @transform_6(%arg0: i32, %arg1: i32) -> (i32, i32) {
    %c0_i32 = arith.constant 0 : i32
    %c0_i32_0 = arith.constant 0 : i32
    %c0_i32_1 = arith.constant 0 : i32
    return %c0_i32, %c0_i32_0 : i32, i32
  }
  func.func @transform_7(%arg0: i32, %arg1: i32) -> (i32, i32) {
    %c0_i32 = arith.constant 0 : i32
    %c0_i32_0 = arith.constant 0 : i32
    %c0_i32_1 = arith.constant 0 : i32
    return %c0_i32, %c0_i32_0 : i32, i32
  }
  func.func @transform_8(%arg0: i32, %arg1: i32) -> (i32, i32) {
    %c0_i32 = arith.constant 0 : i32
    %c0_i32_0 = arith.constant 0 : i32
    %c0_i32_1 = arith.constant 0 : i32
    return %c0_i32, %c0_i32_0 : i32, i32
  }
  func.func @transform_9(%arg0: i32, %arg1: i32) -> (i32, i32) {
    %c0_i32 = arith.constant 0 : i32
    %c0_i32_0 = arith.constant 0 : i32
    %c0_i32_1 = arith.constant 0 : i32
    return %c0_i32, %c0_i32_0 : i32, i32
  }
  func.func @transform_10(%arg0: i32, %arg1: i32) -> (i32, i32) {
    %c0_i32 = arith.constant 0 : i32
    %c0_i32_0 = arith.constant 0 : i32
    %c0_i32_1 = arith.constant 0 : i32
    return %c0_i32, %c0_i32_0 : i32, i32
  }
  func.func @transform_11(%arg0: i32, %arg1: i32) -> (i32, i32) {
    %c0_i32 = arith.constant 0 : i32
    %c0_i32_0 = arith.constant 0 : i32
    %c0_i32_1 = arith.constant 0 : i32
    return %c0_i32, %c0_i32_0 : i32, i32
  }
  func.func @transform_12(%arg0: i32, %arg1: i32) -> (i32, i32) {
    %c0_i32 = arith.constant 0 : i32
    %c0_i32_0 = arith.constant 0 : i32
    %c0_i32_1 = arith.constant 0 : i32
    return %c0_i32, %c0_i32_0 : i32, i32
  }
  func.func @transform_13(%arg0: i32, %arg1: i32) -> (i32, i32) {
    %c0_i32 = arith.constant 0 : i32
    %c0_i32_0 = arith.constant 0 : i32
    %c0_i32_1 = arith.constant 0 : i32
    return %c0_i32, %c0_i32_0 : i32, i32
  }
  func.func @transform_14(%arg0: i32, %arg1: i32) -> (i32, i32) {
    %c0_i32 = arith.constant 0 : i32
    %c0_i32_0 = arith.constant 0 : i32
    %c0_i32_1 = arith.constant 0 : i32
    return %c0_i32, %c0_i32_0 : i32, i32
  }
  func.func @transform_15(%arg0: i32, %arg1: i32) -> (i32, i32) {
    %c0_i32 = arith.constant 0 : i32
    %c0_i32_0 = arith.constant 0 : i32
    %c0_i32_1 = arith.constant 0 : i32
    return %c0_i32, %c0_i32_0 : i32, i32
  }
  func.func @transform_16(%arg0: i32, %arg1: i32) -> (i32, i32) {
    %c0_i32 = arith.constant 0 : i32
    %c0_i32_0 = arith.constant 0 : i32
    %c0_i32_1 = arith.constant 0 : i32
    return %c0_i32, %c0_i32_0 : i32, i32
  }
  func.func @transform_17(%arg0: i32, %arg1: i32) -> (i32, i32) {
    %c0_i32 = arith.constant 0 : i32
    %c0_i32_0 = arith.constant 0 : i32
    %c0_i32_1 = arith.constant 0 : i32
    return %c0_i32, %c0_i32_0 : i32, i32
  }
  func.func @transform_18(%arg0: i32, %arg1: i32) -> (i32, i32) {
    %c0_i32 = arith.constant 0 : i32
    %c0_i32_0 = arith.constant 0 : i32
    %c0_i32_1 = arith.constant 0 : i32
    return %c0_i32, %c0_i32_0 : i32, i32
  }
  func.func @transform_19(%arg0: i32, %arg1: i32) -> (i32, i32) {
    %c0_i32 = arith.constant 0 : i32
    %c0_i32_0 = arith.constant 0 : i32
    %c0_i32_1 = arith.constant 0 : i32
    return %c0_i32, %c0_i32_0 : i32, i32
  }
  func.func @transform_20(%arg0: i32, %arg1: i32) -> (i32, i32) {
    %c0_i32 = arith.constant 0 : i32
    %c0_i32_0 = arith.constant 0 : i32
    %c0_i32_1 = arith.constant 0 : i32
    return %c0_i32, %c0_i32_0 : i32, i32
  }
  func.func @transform_21(%arg0: i32, %arg1: i32) -> (i32, i32) {
    %c0_i32 = arith.constant 0 : i32
    %c0_i32_0 = arith.constant 0 : i32
    %c0_i32_1 = arith.constant 0 : i32
    return %c0_i32, %c0_i32_0 : i32, i32
  }
  func.func @transform_22(%arg0: i32, %arg1: i32) -> (i32, i32) {
    %c0_i32 = arith.constant 0 : i32
    %c0_i32_0 = arith.constant 0 : i32
    %c0_i32_1 = arith.constant 0 : i32
    return %c0_i32, %c0_i32_0 : i32, i32
  }
  func.func @transform_23(%arg0: i32, %arg1: i32) -> (i32, i32) {
    %c0_i32 = arith.constant 0 : i32
    %c0_i32_0 = arith.constant 0 : i32
    %c0_i32_1 = arith.constant 0 : i32
    return %c0_i32, %c0_i32_0 : i32, i32
  }
  func.func @transform_24(%arg0: i32, %arg1: i32) -> (i32, i32) {
    %c0_i32 = arith.constant 0 : i32
    %c0_i32_0 = arith.constant 0 : i32
    %c0_i32_1 = arith.constant 0 : i32
    return %c0_i32, %c0_i32_0 : i32, i32
  }
  func.func @transform_25(%arg0: i32, %arg1: i32) -> (i32, i32, i32) {
    %c0_i32 = arith.constant 0 : i32
    %c0_i32_0 = arith.constant 0 : i32
    return %arg0, %arg1, %c0_i32 : i32, i32, i32
  }
}

</mosaic_0001>

<bundles_post_ra>
// kernel: tpu_custom_call.1
= control target key start
LH: loop header
LB: loop body
LE: loop exit
PB: predicated region body
PF: predicated region fallthrough
CT: control target
= control target key end

     0   :  { %s4962_s0 = inlined_call_operand.vmem [shape: f32[2,8,32], index: 0, kind: input, shape index: {}]   ;;  %s4963_s1 = inlined_call_operand.vmem [shape: f32[2,8,32], index: 1, kind: input, shape index: {}]   ;;  %s4964_s2 = inlined_call_operand.hbm [shape: f32[8,8], index: 2, kind: input, shape index: {}]   ;;  %s4965_s3 = inlined_call_operand.hbm [shape: f32[8,8], index: 3, kind: input, shape index: {}]   ;;  %s4966_s4 = inlined_call_operand.vmem [shape: bf16[32,32], index: 4, kind: input, shape index: {}]   ;;  %s4967_s5 = inlined_call_operand.hbm [shape: f32[1,32], index: 5, kind: input, shape index: {}]   ;;  %s4968_s6 = inlined_call_operand.vmem [shape: bf16[32,32], index: 6, kind: input, shape index: {}]   ;;  %s4969_s7 = inlined_call_operand.hbm [shape: f32[1,32], index: 7, kind: input, shape index: {}]   ;;  %s4970_s8 = inlined_call_operand.hbm [shape: bf16[32,32], index: 8, kind: input, shape index: {}]   ;;  %s4971_s9 = inlined_call_operand.vmem [shape: f32[1,32], index: 9, kind: input, shape index: {}]   ;;  %s4972_s10 = inlined_call_operand.hbm [shape: bf16[32,32], index: 10, kind: input, shape index: {}]   ;;  %s4973_s11 = inlined_call_operand.hbm [shape: f32[1,32], index: 11, kind: input, shape index: {}]   ;;  %s4974_s12 = inlined_call_operand.vmem [shape: bf16[32,32], index: 12, kind: input, shape index: {}]   ;;  %s4975_s13 = inlined_call_operand.hbm [shape: f32[1,32], index: 13, kind: input, shape index: {}]   ;;  %s4976_s14 = inlined_call_operand.hbm [shape: bf16[32,32], index: 14, kind: input, shape index: {}]   ;;  %s4977_s15 = inlined_call_operand.hbm [shape: f32[1,32], index: 15, kind: input, shape index: {}]   ;;  %s4978_s16 = inlined_call_operand.vmem [shape: bf16[32,32], index: 16, kind: input, shape index: {}]   ;;  %s4979_s17 = inlined_call_operand.hbm [shape: f32[1,32], index: 17, kind: input, shape index: {}]   ;;  %s4980_s18 = inlined_call_operand.hbm [shape: bf16[32,32], index: 18, kind: input, shape index: {}]   ;;  %s4981_s19 = inlined_call_operand.hbm [shape: f32[1,32], index: 19, kind: input, shape index: {}]   ;;  %s4982_s20 = inlined_call_operand.vmem [shape: bf16[32,64], index: 20, kind: input, shape index: {}]   ;;  %s4983_s21 = inlined_call_operand.vmem [shape: f32[1,64], index: 21, kind: input, shape index: {}]   ;;  %s4984_s22 = inlined_call_operand.vmem [shape: bf16[64,32], index: 22, kind: input, shape index: {}]   ;;  %s4985_s23 = inlined_call_operand.vmem [shape: f32[1,32], index: 23, kind: input, shape index: {}]   ;;  %s4986_s24 = inlined_call_operand.vmem [shape: f32[3,2], index: 24, kind: input, shape index: {}]   ;;  %s4987_s25 = inlined_call_operand.hbm [shape: f32[2,8,32], index: 25, kind: output, shape index: {}]  }
   0x1   :  { %5018 = sst [smem:[#allocation48_spill]] %s4962_s0 }
   0x2   :  { %5019 = sst [smem:[#allocation49_spill]] %s4963_s1 }
   0x3   :  { %5020 = sst [smem:[#allocation50_spill]] %s4964_s2 }
   0x4   :  { %5021 = sst [smem:[#allocation51_spill]] %s4965_s3 }
   0x5   :  { %5022 = sst [smem:[#allocation52_spill]] %s4966_s4 }
   0x6   :  { %5023 = sst [smem:[#allocation53_spill]] %s4967_s5 }
   0x7   :  { %5024 = sst [smem:[#allocation54_spill]] %s4968_s6 }
   0x8   :  { %5025 = sst [smem:[#allocation55_spill]] %s4969_s7 }
   0x9   :  { %5026 = sst [smem:[#allocation56_spill]] %s4970_s8 }
   0xa   :  { %5027 = sst [smem:[#allocation57_spill]] %s4971_s9 }
   0xb   :  { %5028 = sst [smem:[#allocation58_spill]] %s4972_s10 }
   0xc   :  { %5029 = sst [smem:[#allocation59_spill]] %s4975_s13 }
   0xd   :  { %5030 = sst [smem:[#allocation60_spill]] %s4977_s15 }
   0xe   :  { %5031 = sst [smem:[#allocation61_spill]] %s4983_s21 }
   0xf   :  { %5032 = sst [smem:[#allocation62_spill]] %s4984_s22 }
  0x10   :  { %5033 = sst [smem:[#allocation63_spill]] %s4985_s23 }
  0x11   :  { %5034 = sst [smem:[#allocation64_spill]] %s4987_s25 }
  0x12   :  { %30 = vsyncpa [#allocation7], 0 }
  0x13   :  { %31 = vsyncpa [#allocation11], 0 }
  0x14   :  { %32 = vsyncpa [#allocation14], 0 }
  0x15   :  { %33 = vsyncpa [#allocation17], 0 }
  0x16   :  { %34 = vsyncpa [#allocation20], 0 }
  0x17   :  { %35 = vsyncpa [#allocation23], 0 }
  0x18   :  { %36 = vsyncpa [#allocation26], 0 }
  0x19   :  { %37 = vsyncpa [#allocation9], 0 }
  0x1a   :  { %38 = vsyncpa [#allocation8], 0 }
  0x1b   :  { %40 = vsyncpa [#allocation8 + $0x1], 0  ;;  %s4242_s29 = smov 0   ;;  %s4244_s2 = smov 0  }
  0x1c   :  { %s4246_s6 = smov 0   ;;  %s4248_s30 = smov 0  }
  0x1d   :  { %s4250_s7 = smov 0   ;;  %s4252_s3 = smov 0  }
  0x1e LB: > { %5035 = sst [smem:[#allocation39_spill]] %s4065_s29  ;;  %s2965_s26 = sadd.s32 4294967295, %s4085_s3   ;;  %s4085_s3 = sphi %s4252_s3, %s46_s3   ;;  %s4081_s7 = sphi %s4250_s7, %s5084_s7   ;;  %s4077_s30 = sphi %s4248_s30, %s5083_s30   ;;  %s4073_s6 = sphi %s4246_s6, %s5082_s6   ;;  %s4069_s2 = sphi %s4244_s2, %s5081_s2   ;;  %s4065_s29 = sphi %s4242_s29, %s5080_s29  }
  0x1f   : > { %5036 = sst [smem:[#allocation40_spill]] %s4069_s2  ;;  %s2966_s1 = sadd.s32 4294967294, %s4085_s3  }
  0x20   : > { %5037 = sst [smem:[#allocation41_spill]] %s4073_s6  ;;  %s58_s8 = sadd.s32 1, %s4081_s7 }
  0x21   : > { %5038 = sst [smem:[#allocation42_spill]] %s4081_s7  ;;  %s612_s27 = sadd.s32 1, %s4073_s6 }
  0x22   : > { %5039 = sst [smem:[#allocation43_spill]] %s4085_s3  ;;  %p60_p0 = scmp.ge.s32.totalorder %s58_s8, 2 }
  0x23   : > { %p622_p1 = scmp.ne.s32.totalorder %s4073_s6, %s4069_s2  ;;  %p623_p2 = scmp.eq.s32.totalorder %s2965_s26, 1 }
  0x24   : > { %p628_p3 = scmp.ne.s32.totalorder %s4069_s2, %s4065_s29  ;;  %s5086_s8 = smov (%p60_p0, %s58_s8), 0 }
  0x25   : > { %5040 = sst [smem:[#allocation44_spill]] %s5086_s8  ;;  %p4282_p4 = por %p623_p2, %p622_p1 }
  0x26   : > { %p629_p5 = scmp.eq.s32.totalorder %s2966_s1, 1  ;;  %s607_s28 = ssub.s32 %s4081_s7, %s5086_s8 }
  0x27   : > { %s5041_s4 = scalar_select %p4282_p4, 1, 0 }
  0x28   : > { %p2967_p6 = scmp.ge.s32.totalorder %s4085_s3, 1  ;;  %p610_p7 = scmp.eq.s32.totalorder %s607_s28, 0 }
  0x29   : > { %5042 = sst [smem:[#allocation45_spill]] %s5041_s4  ;;  %p4289_p8 = por %p629_p5, %p628_p3 }
  0x2a   : > { %p636_p9 = scmp.lt.s32.totalorder %s4085_s3, 3  ;;  %p4301_p11 = scmp.eq.s32.totalorder %s2965_s26, 0 }
  0x2b   : > { %s5043_s9 = scalar_select %p4289_p8, 1, 0 }
  0x2c   : > { %s4295_s5 = scalar_select %p610_p7, %s4073_s6, %s612_s27  }
  0x2d   : > { %5044 = sst [smem:[#allocation46_spill]] %s5043_s9  ;;  %p4297_p10 = pnand %p2967_p6, %p636_p9 }
  0x2e   : > { %5045 = sst [smem:[#allocation47_spill]] %s4295_s5  ;;  %s4087_s1 = smov [#allocation10]  }
  0x2f   : > { %s5046_s0 = scalar_select %p4297_p10, 1, 0 }
  0x30   : > { %s5047_s29 = scalar_select %p4301_p11, 1, 0 }
  0x31   : > { %p3375_p12 = pneg %p4297_p10  ;;  %s664_s28 = sshll.u32 %s4087_s1, 4  ;;  %s665_s28 = int_to_ptr.vmem [resolvable:$true] %s664_s28 }
  0x32   : > { %s4088_s8 = smov [#allocation13]   ;;  %s5049_s6 = sld [smem:[#allocation51_spill]] }
  0x33   : > { %s692_s7 = sshll.u32 %s4088_s8, 4  ;;  %p4309_p13 = pnand %p4301_p11, %p3375_p12  ;;  %s4313_s7 = int_to_ptr.vmem [resolvable:$true] %s692_s7 }
  0x35   : > { %p4323_p1 = pneg %p4309_p13 }
  0x38   : > { %s5050_s9 = smov %s5049_s6  ;;  %s3596_s3 = scalar_lea.hbm %s5049_s6, 128 }
  0x39   : > { %p3597_p0 = scmp.ne.s32.totalorder %s5050_s9, %s3596_s3  ;;  %p3603_p5 = scmp.lt.u32.totalorder %s3596_s3, %s5050_s9 }
  0x3b   : > { %p3599_p2 = pnand %p4323_p1, %p3597_p0 }
  0x3d   : > { %p3600_p3 = pneg %p3599_p2 }
  0x3f   : > { %p3605_p6 = pnand %p3603_p5, %p3600_p3 }
  0x41   : > { %3608 = shalt.err (!%p3605_p6)
}
  0x42   : > { %s3609_s6 = scalar_lea.vmem %s665_s28, 128  ;;  %p3617_p8 = scmp.lt.s32.totalorder %s665_s28, %s665_s28 }
  0x43   : > { %p3610_p7 = scmp.ne.s32.totalorder %s665_s28, %s3609_s6  ;;  %p3618_p4 = scmp.lt.s32.totalorder %s3609_s6, %s3609_s6 }
  0x45   : > { %p3612_p9 = pnand %p3610_p7, %p4323_p1  ;;  %p3619_p11 = por %p3618_p4, %p3617_p8 }
  0x47   : > { %p3613_p12 = pneg %p3612_p9 }
  0x49   : > { %p3620_p10 = pnand %p3619_p11, %p3613_p12 }
  0x4b   : > { %3623 = shalt.err (!%p3620_p10)
}
  0x4c   : > { %3381 = dma.hbm_to_vmem [thread:$0]  (!%p4309_p13), %s5050_s9, 128, %s665_s28, [#allocation11]  }
  0x4d   : > { %s5052_s5 = sld [smem:[#allocation55_spill]] }
  0x53   : > { %s3624_s26 = scalar_lea.hbm %s5052_s5, 16 }
  0x54   : > { %p3625_p0 = scmp.ne.s32.totalorder %s5052_s5, %s3624_s26  ;;  %p3631_p8 = scmp.lt.u32.totalorder %s3624_s26, %s5052_s5 }
  0x56   : > { %p3627_p2 = pnand %p3625_p0, %p4323_p1 }
  0x58   : > { %p3628_p4 = pneg %p3627_p2 }
  0x5a   : > { %p3633_p10 = pnand %p3631_p8, %p3628_p4 }
  0x5c   : > { %3636 = shalt.err (!%p3633_p10)
}
  0x5d   : > { %s3637_s28 = scalar_lea.vmem %s4313_s7, 16  ;;  %s3644_s21 = scalar_lea.vmem %s4313_s7, 32 }
  0x5e   : > { %p3638_p11 = scmp.ne.s32.totalorder %s4313_s7, %s3637_s28  ;;  %p3645_p6 = scmp.lt.s32.totalorder %s4313_s7, %s4313_s7 }
  0x5f   : > { %p3646_p7 = scmp.lt.s32.totalorder %s3644_s21, %s3637_s28 }
  0x60   : > { %p3640_p3 = pnand %p3638_p11, %p4323_p1 }
  0x61   : > { %p3647_p9 = por %p3646_p7, %p3645_p6 }
  0x62   : > { %p3641_p5 = pneg %p3640_p3 }
  0x64   : > { %p3648_p12 = pnand %p3647_p9, %p3641_p5 }
  0x66   : > { %3651 = shalt.err (!%p3648_p12)
}
  0x67   : > { %3387 = dma.hbm_to_vmem [thread:$0]  (!%p4309_p13), %s5052_s5, 16, %s4313_s7, [#allocation14]  }
  0x68   : > { %s4089_s4 = smov [#allocation16]   ;;  %s4090_s3 = smov [#allocation19]  }
  0x69   : > { %s718_s23 = sshll.u32 %s4089_s4, 4  ;;  %s746_s26 = sshll.u32 %s4090_s3, 4  ;;  %s719_s23 = int_to_ptr.vmem [resolvable:$true] %s718_s23  ;;  %s747_s26 = int_to_ptr.vmem [resolvable:$true] %s746_s26 }
  0x6a   : > { %s5053_s10 = sld [smem:[#allocation58_spill]] }
  0x70   : > { %s3652_s28 = scalar_lea.hbm %s5053_s10, 256 }
  0x71   : > { %p3653_p0 = scmp.ne.s32.totalorder %s5053_s10, %s3652_s28  ;;  %p3659_p8 = scmp.lt.u32.totalorder %s3652_s28, %s5053_s10 }
  0x73   : > { %p3655_p2 = pnand %p3653_p0, %p4323_p1 }
  0x75   : > { %p3656_p4 = pneg %p3655_p2 }
  0x77   : > { %p3661_p10 = pnand %p3659_p8, %p3656_p4 }
  0x79   : > { %3664 = shalt.err (!%p3661_p10)
}
  0x7a   : > { %s3665_s7 = scalar_lea.vmem %s719_s23, 256  ;;  %p3673_p6 = scmp.lt.s32.totalorder %s719_s23, %s719_s23 }
  0x7b   : > { %p3666_p11 = scmp.ne.s32.totalorder %s719_s23, %s3665_s7  ;;  %p3674_p7 = scmp.lt.s32.totalorder %s3665_s7, %s3665_s7 }
  0x7d   : > { %p3668_p3 = pnand %p3666_p11, %p4323_p1  ;;  %p3675_p9 = por %p3674_p7, %p3673_p6 }
  0x7f   : > { %p3669_p5 = pneg %p3668_p3 }
  0x81   : > { %p3676_p12 = pnand %p3675_p9, %p3669_p5 }
  0x83   : > { %3679 = shalt.err (!%p3676_p12)
}
  0x84   : > { %s5012_s9 = smov 64   ;;  %s5014_s25 = smov 4  }
  0x85   : > { %3393 = dma.hbm_to_vmem [thread:$0]  (!%p4309_p13), %s5053_s10, 256, %s719_s23, [#allocation17], %s5012_s9, %s5012_s9, %s5014_s25  }
  0x86   : > { %s5054_s13 = sld [smem:[#allocation59_spill]] }
  0x8c   : > { %s3680_s6 = scalar_lea.hbm %s5054_s13, 16 }
  0x8d   : > { %p3681_p0 = scmp.ne.s32.totalorder %s5054_s13, %s3680_s6  ;;  %p3687_p8 = scmp.lt.u32.totalorder %s3680_s6, %s5054_s13 }
  0x8f   : > { %p3683_p2 = pnand %p3681_p0, %p4323_p1 }
  0x91   : > { %p3684_p4 = pneg %p3683_p2 }
  0x93   : > { %p3689_p10 = pnand %p3687_p8, %p3684_p4 }
  0x95   : > { %3692 = shalt.err (!%p3689_p10)
}
  0x96   : > { %s3693_s22 = scalar_lea.vmem %s747_s26, 16  ;;  %s3700_s23 = scalar_lea.vmem %s747_s26, 32 }
  0x97   : > { %p3694_p11 = scmp.ne.s32.totalorder %s747_s26, %s3693_s22  ;;  %p3701_p6 = scmp.lt.s32.totalorder %s747_s26, %s747_s26 }
  0x98   : > { %p3702_p7 = scmp.lt.s32.totalorder %s3700_s23, %s3693_s22 }
  0x99   : > { %p3696_p3 = pnand %p3694_p11, %p4323_p1 }
  0x9a   : > { %p3703_p9 = por %p3702_p7, %p3701_p6 }
  0x9b   : > { %p3697_p5 = pneg %p3696_p3 }
  0x9d   : > { %p3704_p12 = pnand %p3703_p9, %p3697_p5 }
  0x9f   : > { %3707 = shalt.err (!%p3704_p12)
}
  0xa0   : > { %3399 = dma.hbm_to_vmem [thread:$0]  (!%p4309_p13), %s5054_s13, 16, %s747_s26, [#allocation20]  }
  0xa1   : > { %s4093_s8 = smov [#allocation22]   ;;  %s4094_s28 = smov [#allocation25]  }
  0xa2   : > { %s770_s6 = sshll.u32 %s4093_s8, 4  ;;  %s794_s21 = sshll.u32 %s4094_s28, 4  ;;  %s771_s6 = int_to_ptr.vmem [resolvable:$true] %s770_s6  ;;  %s795_s21 = int_to_ptr.vmem [resolvable:$true] %s794_s21 }
  0xa3   : > { %s5055_s15 = sld [smem:[#allocation60_spill]] }
  0xa9   : > { %s3708_s9 = scalar_lea.hbm %s5055_s15, 16 }
  0xaa   : > { %p3709_p0 = scmp.ne.s32.totalorder %s5055_s15, %s3708_s9  ;;  %p3715_p8 = scmp.lt.u32.totalorder %s3708_s9, %s5055_s15 }
  0xac   : > { %p3711_p2 = pnand %p3709_p0, %p4323_p1 }
  0xae   : > { %p3712_p4 = pneg %p3711_p2 }
  0xb0   : > { %p3717_p10 = pnand %p3715_p8, %p3712_p4 }
  0xb2   : > { %3720 = shalt.err (!%p3717_p10)
}
  0xb3   : > { %s3721_s26 = scalar_lea.vmem %s771_s6, 16  ;;  %s3728_s3 = scalar_lea.vmem %s771_s6, 32 }
  0xb4   : > { %p3722_p11 = scmp.ne.s32.totalorder %s771_s6, %s3721_s26  ;;  %p3729_p6 = scmp.lt.s32.totalorder %s771_s6, %s771_s6 }
  0xb5   : > { %p3730_p7 = scmp.lt.s32.totalorder %s3728_s3, %s3721_s26 }
  0xb6   : > { %p3724_p3 = pnand %p3722_p11, %p4323_p1 }
  0xb7   : > { %p3731_p9 = por %p3730_p7, %p3729_p6 }
  0xb8   : > { %p3725_p5 = pneg %p3724_p3 }
  0xba   : > { %p3732_p12 = pnand %p3731_p9, %p3725_p5 }
  0xbc   : > { %3735 = shalt.err (!%p3732_p12)
}
  0xbd   : > { %3405 = dma.hbm_to_vmem [thread:$0]  (!%p4309_p13), %s5055_s15, 16, %s771_s6, [#allocation23]  }
  0xbe   : > { %s3736_s2 = scalar_lea.hbm %s4980_s18, 256 }
  0xbf   : > { %p3737_p0 = scmp.ne.s32.totalorder %s4980_s18, %s3736_s2  ;;  %p3743_p8 = scmp.lt.u32.totalorder %s3736_s2, %s4980_s18 }
  0xc1   : > { %p3739_p2 = pnand %p3737_p0, %p4323_p1 }
  0xc3   : > { %p3740_p4 = pneg %p3739_p2 }
  0xc5   : > { %p3745_p10 = pnand %p3743_p8, %p3740_p4 }
  0xc7   : > { %3748 = shalt.err (!%p3745_p10)
}
  0xc8   : > { %s3749_s26 = scalar_lea.vmem %s795_s21, 256  ;;  %p3757_p6 = scmp.lt.s32.totalorder %s795_s21, %s795_s21 }
  0xc9   : > { %p3750_p11 = scmp.ne.s32.totalorder %s795_s21, %s3749_s26  ;;  %p3758_p7 = scmp.lt.s32.totalorder %s3749_s26, %s3749_s26 }
  0xcb   : > { %p3752_p3 = pnand %p3750_p11, %p4323_p1  ;;  %p3759_p9 = por %p3758_p7, %p3757_p6 }
  0xcd   : > { %p3753_p5 = pneg %p3752_p3 }
  0xcf   : > { %p3760_p12 = pnand %p3759_p9, %p3753_p5 }
  0xd1   : > { %3763 = shalt.err (!%p3760_p12)
}
  0xd2   : > { %s5056_s6 = smov 4   ;;  %s5057_s3 = smov 64  }
  0xd3   : > { %3411 = dma.hbm_to_vmem [thread:$0]  (!%p4309_p13), %s4980_s18, 256, %s795_s21, [#allocation26], %s5057_s3, %s5057_s3, %s5056_s6  }
  0xd4   : > { %s4095_s9 = smov [#allocation6]   ;;  %s4096_s2 = smov [#allocation12]  }
  0xd5   : > { %s651_s25 = sshll.u32 %s4095_s9, 4  ;;  %s678_s7 = sshll.u32 %s4096_s2, 4  ;;  %s652_s25 = int_to_ptr.vmem [resolvable:$true] %s651_s25  ;;  %s679_s7 = int_to_ptr.vmem [resolvable:$true] %s678_s7 }
  0xd6   : > { %s5058_s4 = sld [smem:[#allocation50_spill]] }
  0xdc   : > { %s3764_s26 = scalar_lea.hbm %s5058_s4, 128 }
  0xdd   : > { %p3765_p0 = scmp.ne.s32.totalorder %s5058_s4, %s3764_s26  ;;  %p3771_p8 = scmp.lt.u32.totalorder %s3764_s26, %s5058_s4 }
  0xdf   : > { %p3767_p2 = pnand %p3765_p0, %p4323_p1 }
  0xe1   : > { %p3768_p4 = pneg %p3767_p2 }
  0xe3   : > { %p3773_p10 = pnand %p3771_p8, %p3768_p4 }
  0xe5   : > { %3776 = shalt.err (!%p3773_p10)
}
  0xe6   : > { %s3777_s21 = scalar_lea.vmem %s652_s25, 128  ;;  %p3785_p6 = scmp.lt.s32.totalorder %s652_s25, %s652_s25 }
  0xe7   : > { %p3778_p11 = scmp.ne.s32.totalorder %s652_s25, %s3777_s21  ;;  %p3786_p7 = scmp.lt.s32.totalorder %s3777_s21, %s3777_s21 }
  0xe9   : > { %p3780_p3 = pnand %p3778_p11, %p4323_p1  ;;  %p3787_p9 = por %p3786_p7, %p3785_p6 }
  0xeb   : > { %p3781_p5 = pneg %p3780_p3 }
  0xed   : > { %p3788_p12 = pnand %p3787_p9, %p3781_p5 }
  0xef   : > { %3791 = shalt.err (!%p3788_p12)
}
  0xf0   : > { %3378 = dma.hbm_to_vmem [thread:$0]  (!%p4309_p13), %s5058_s4, 128, %s652_s25, [#allocation7]  }
  0xf1   : > { %s5059_s9 = sld [smem:[#allocation53_spill]] }
  0xf7   : > { %s3792_s2 = scalar_lea.hbm %s5059_s9, 16 }
  0xf8   : > { %p3793_p0 = scmp.ne.s32.totalorder %s5059_s9, %s3792_s2  ;;  %p3799_p8 = scmp.lt.u32.totalorder %s3792_s2, %s5059_s9 }
  0xfa   : > { %p3795_p2 = pnand %p3793_p0, %p4323_p1 }
  0xfc   : > { %p3796_p4 = pneg %p3795_p2 }
  0xfe   : > { %p3801_p10 = pnand %p3799_p8, %p3796_p4 }
 0x100   : > { %3804 = shalt.err (!%p3801_p10)
}
 0x101   : > { %s3805_s21 = scalar_lea.vmem %s679_s7, 16  ;;  %s3812_s25 = scalar_lea.vmem %s679_s7, 32 }
 0x102   : > { %p3806_p11 = scmp.ne.s32.totalorder %s679_s7, %s3805_s21  ;;  %p3813_p6 = scmp.lt.s32.totalorder %s679_s7, %s679_s7 }
 0x103   : > { %p3814_p7 = scmp.lt.s32.totalorder %s3812_s25, %s3805_s21 }
 0x104   : > { %p3808_p3 = pnand %p3806_p11, %p4323_p1 }
 0x105   : > { %p3815_p9 = por %p3814_p7, %p3813_p6 }
 0x106   : > { %p3809_p5 = pneg %p3808_p3 }
 0x108   : > { %p3816_p12 = pnand %p3815_p9, %p3809_p5 }
 0x10a   : > { %3819 = shalt.err (!%p3816_p12)
}
 0x10b   : > { %3384 = dma.hbm_to_vmem [thread:$0]  (!%p4309_p13), %s5059_s9, 16, %s679_s7, [#allocation11]  }
 0x10c   : > { %s4097_s13 = smov [#allocation15]   ;;  %s4098_s2 = smov [#allocation18]  }
 0x10d   : > { %s702_s28 = sshll.u32 %s4097_s13, 4  ;;  %s732_s22 = sshll.u32 %s4098_s2, 4  ;;  %s703_s28 = int_to_ptr.vmem [resolvable:$true] %s702_s28  ;;  %s733_s22 = int_to_ptr.vmem [resolvable:$true] %s732_s22 }
 0x10e   : > { %s5060_s8 = sld [smem:[#allocation56_spill]] }
 0x114   : > { %s3820_s4 = scalar_lea.hbm %s5060_s8, 256 }
 0x115   : > { %p3821_p0 = scmp.ne.s32.totalorder %s5060_s8, %s3820_s4  ;;  %p3827_p8 = scmp.lt.u32.totalorder %s3820_s4, %s5060_s8 }
 0x117   : > { %p3823_p2 = pnand %p3821_p0, %p4323_p1 }
 0x119   : > { %p3824_p4 = pneg %p3823_p2 }
 0x11b   : > { %p3829_p10 = pnand %p3827_p8, %p3824_p4 }
 0x11d   : > { %3832 = shalt.err (!%p3829_p10)
}
 0x11e   : > { %s3833_s7 = scalar_lea.vmem %s703_s28, 256  ;;  %p3841_p6 = scmp.lt.s32.totalorder %s703_s28, %s703_s28 }
 0x11f   : > { %p3834_p11 = scmp.ne.s32.totalorder %s703_s28, %s3833_s7  ;;  %p3842_p7 = scmp.lt.s32.totalorder %s3833_s7, %s3833_s7 }
 0x121   : > { %p3836_p3 = pnand %p3834_p11, %p4323_p1  ;;  %p3843_p9 = por %p3842_p7, %p3841_p6 }
 0x123   : > { %p3837_p5 = pneg %p3836_p3 }
 0x125   : > { %p3844_p12 = pnand %p3843_p9, %p3837_p5 }
 0x127   : > { %3847 = shalt.err (!%p3844_p12)
}
 0x128   : > { %3390 = dma.hbm_to_vmem [thread:$0]  (!%p4309_p13), %s5060_s8, 256, %s703_s28, [#allocation14], %s5057_s3, %s5057_s3, %s5056_s6  }
 0x129   : > { %s3848_s2 = scalar_lea.hbm %s4973_s11, 16 }
 0x12a   : > { %p3849_p0 = scmp.ne.s32.totalorder %s4973_s11, %s3848_s2  ;;  %p3855_p8 = scmp.lt.u32.totalorder %s3848_s2, %s4973_s11 }
 0x12c   : > { %p3851_p2 = pnand %p3849_p0, %p4323_p1 }
 0x12e   : > { %p3852_p4 = pneg %p3851_p2 }
 0x130   : > { %p3857_p10 = pnand %p3855_p8, %p3852_p4 }
 0x132   : > { %3860 = shalt.err (!%p3857_p10)
}
 0x133   : > { %s3861_s10 = scalar_lea.vmem %s733_s22, 16  ;;  %s3868_s28 = scalar_lea.vmem %s733_s22, 32 }
 0x134   : > { %p3862_p11 = scmp.ne.s32.totalorder %s733_s22, %s3861_s10  ;;  %p3869_p6 = scmp.lt.s32.totalorder %s733_s22, %s733_s22 }
 0x135   : > { %p3870_p7 = scmp.lt.s32.totalorder %s3868_s28, %s3861_s10 }
 0x136   : > { %p3864_p3 = pnand %p3862_p11, %p4323_p1 }
 0x137   : > { %p3871_p9 = por %p3870_p7, %p3869_p6 }
 0x138   : > { %p3865_p5 = pneg %p3864_p3 }
 0x13a   : > { %p3872_p12 = pnand %p3871_p9, %p3865_p5 }
 0x13c   : > { %3875 = shalt.err (!%p3872_p12)
}
 0x13d   : > { %3396 = dma.hbm_to_vmem [thread:$0]  (!%p4309_p13), %s4973_s11, 16, %s733_s22, [#allocation17]  }
 0x13e   : > { %s4099_s4 = smov [#allocation21]   ;;  %s4100_s13 = smov [#allocation24]  }
 0x13f   : > { %s756_s5 = sshll.u32 %s4099_s4, 4  ;;  %s784_s2 = sshll.u32 %s4100_s13, 4  ;;  %s757_s5 = int_to_ptr.vmem [resolvable:$true] %s756_s5  ;;  %s785_s2 = int_to_ptr.vmem [resolvable:$true] %s784_s2 }
 0x140   : > { %s3876_s21 = scalar_lea.hbm %s4976_s14, 256 }
 0x141   : > { %p3877_p0 = scmp.ne.s32.totalorder %s4976_s14, %s3876_s21  ;;  %p3883_p8 = scmp.lt.u32.totalorder %s3876_s21, %s4976_s14 }
 0x143   : > { %p3879_p2 = pnand %p3877_p0, %p4323_p1 }
 0x145   : > { %p3880_p4 = pneg %p3879_p2 }
 0x147   : > { %p3885_p10 = pnand %p3883_p8, %p3880_p4 }
 0x149   : > { %3888 = shalt.err (!%p3885_p10)
}
 0x14a   : > { %s3889_s22 = scalar_lea.vmem %s757_s5, 256  ;;  %p3897_p6 = scmp.lt.s32.totalorder %s757_s5, %s757_s5 }
 0x14b   : > { %p3890_p11 = scmp.ne.s32.totalorder %s757_s5, %s3889_s22  ;;  %p3898_p7 = scmp.lt.s32.totalorder %s3889_s22, %s3889_s22 }
 0x14d   : > { %p3892_p3 = pnand %p3890_p11, %p4323_p1  ;;  %p3899_p9 = por %p3898_p7, %p3897_p6 }
 0x14f   : > { %p3893_p5 = pneg %p3892_p3 }
 0x151   : > { %p3900_p12 = pnand %p3899_p9, %p3893_p5 }
 0x153   : > { %3903 = shalt.err (!%p3900_p12)
}
 0x154   : > { %3402 = dma.hbm_to_vmem [thread:$0]  (!%p4309_p13), %s4976_s14, 256, %s757_s5, [#allocation20], %s5057_s3, %s5057_s3, %s5056_s6  }
 0x155   : > { %s3904_s26 = scalar_lea.hbm %s4979_s17, 16 }
 0x156   : > { %p3905_p0 = scmp.ne.s32.totalorder %s4979_s17, %s3904_s26  ;;  %p3911_p8 = scmp.lt.u32.totalorder %s3904_s26, %s4979_s17 }
 0x158   : > { %p3907_p2 = pnand %p3905_p0, %p4323_p1 }
 0x15a   : > { %p3908_p4 = pneg %p3907_p2 }
 0x15c   : > { %p3913_p10 = pnand %p3911_p8, %p3908_p4 }
 0x15e   : > { %3916 = shalt.err (!%p3913_p10)
}
 0x15f   : > { %s3917_s7 = scalar_lea.vmem %s785_s2, 16  ;;  %s3924_s6 = scalar_lea.vmem %s785_s2, 32 }
 0x160   : > { %p3918_p11 = scmp.ne.s32.totalorder %s785_s2, %s3917_s7  ;;  %p3925_p6 = scmp.lt.s32.totalorder %s785_s2, %s785_s2 }
 0x161   : > { %p3926_p7 = scmp.lt.s32.totalorder %s3924_s6, %s3917_s7 }
 0x162   : > { %p3920_p3 = pnand %p3918_p11, %p4323_p1 }
 0x163   : > { %p3927_p9 = por %p3926_p7, %p3925_p6 }
 0x164   : > { %p3921_p5 = pneg %p3920_p3 }
 0x166   : > { %p3928_p12 = pnand %p3927_p9, %p3921_p5 }
 0x168   : > { %3931 = shalt.err (!%p3928_p12)
}
 0x169   : > { %3408 = dma.hbm_to_vmem [thread:$0]  (!%p4309_p13), %s4979_s17, 16, %s785_s2, [#allocation23]  }
 0x16a   : > { %s4101_s22 = smov [#allocation27]   ;;  %s831_s23 = sshll.u32 %s4986_s24, 4  ;;  %s4558_s23 = int_to_ptr.vmem [resolvable:$true] %s831_s23 }
 0x16b   : > { %s808_s15 = sshll.u32 %s4101_s22, 4  ;;  %s3932_s25 = scalar_lea.hbm %s4981_s19, 16  ;;  %s809_s15 = int_to_ptr.vmem [resolvable:$true] %s808_s15 }
 0x16c   : > { %p3933_p0 = scmp.ne.s32.totalorder %s4981_s19, %s3932_s25  ;;  %p3939_p8 = scmp.lt.u32.totalorder %s3932_s25, %s4981_s19 }
 0x16e   : > { %p3935_p2 = pnand %p3933_p0, %p4323_p1 }
 0x170   : > { %p3936_p4 = pneg %p3935_p2 }
 0x172   : > { %p3941_p10 = pnand %p3939_p8, %p3936_p4 }
 0x174   : > { %3944 = shalt.err (!%p3941_p10)
}
 0x175   : > { %s3945_s6 = scalar_lea.vmem %s809_s15, 16  ;;  %s3952_s3 = scalar_lea.vmem %s809_s15, 32 }
 0x176   : > { %p3946_p11 = scmp.ne.s32.totalorder %s809_s15, %s3945_s6  ;;  %p3953_p6 = scmp.lt.s32.totalorder %s809_s15, %s809_s15 }
 0x177   : > { %p3954_p7 = scmp.lt.s32.totalorder %s3952_s3, %s3945_s6 }
 0x178   : > { %p3948_p3 = pnand %p3946_p11, %p4323_p1 }
 0x179   : > { %p3955_p9 = por %p3954_p7, %p3953_p6 }
 0x17a   : > { %p3949_p5 = pneg %p3948_p3 }
 0x17c   : > { %p3956_p12 = pnand %p3955_p9, %p3949_p5 }
 0x17e   : > { %3959 = shalt.err (!%p3956_p12)
}
 0x17f   : > { %3414 = dma.hbm_to_vmem [thread:$0]  (!%p4309_p13), %s4981_s19, 16, %s809_s15, [#allocation26]  }
 0x180   : > { %s3960_s4 = scalar_lea.vmem %s4558_s23, 64  ;;  %p3968_p8 = scmp.lt.s32.totalorder %s4558_s23, %s4558_s23 }
 0x181   : > { %p3961_p0 = scmp.ne.s32.totalorder %s4558_s23, %s3960_s4  ;;  %p3969_p10 = scmp.lt.s32.totalorder %s3960_s4, %s3960_s4 }
 0x183   : > { %p3963_p2 = pnand %p3961_p0, %p4323_p1  ;;  %p3970_p11 = por %p3969_p10, %p3968_p8 }
 0x185   : > { %p3964_p4 = pneg %p3963_p2 }
 0x187   : > { %p3971_p3 = pnand %p3970_p11, %p3964_p4 }
 0x189   : > { %3974 = shalt.err (!%p3971_p3)
}
 0x18a   : > { %s4102_s13 = smov [#allocation28]   ;;  %p5061_p5 = scmp.ne.s32.totalorder %s5046_s0, 0 }
 0x18b   : > { %3417 = dma.vmem_to_smem (!%p4309_p13), %s4558_s23, 64, %s4102_s13, [#allocation9]  }
 0x18c   : > { %858 = sbr.rel (%p5061_p5) target bundleno = 4798 (0x12be), region = 120  ;;  %p5062_p6 = scmp.ne.s32.totalorder (!%p5061_p5), %s5047_s29, 0 }
 0x193   : > { %4028 = dma.done.wait (%p5062_p6), [#allocation7], 128  }
 0x194   : > { %4030 = vsyncadd (%p5062_p6), [#allocation7], 4294967168 }
 0x195   : > { %4032 = dma.done.wait (%p5062_p6), [#allocation11], 144  }
 0x196   : > { %4034 = vsyncadd (%p5062_p6), [#allocation11], 4294967152 }
 0x197   : > { %4036 = dma.done.wait (%p5062_p6), [#allocation14], 272  }
 0x198   : > { %4038 = vsyncadd (%p5062_p6), [#allocation14], 4294967024 }
 0x199   : > { %4040 = dma.done.wait (%p5062_p6), [#allocation17], 272  }
 0x19a   : > { %4042 = vsyncadd (%p5062_p6), [#allocation17], 4294967024 }
 0x19b   : > { %4044 = dma.done.wait (%p5062_p6), [#allocation20], 272  }
 0x19c   : > { %4046 = vsyncadd (%p5062_p6), [#allocation20], 4294967024 }
 0x19d   : > { %4048 = dma.done.wait (%p5062_p6), [#allocation23], 32  }
 0x19e   : > { %4050 = vsyncadd (%p5062_p6), [#allocation23], 4294967264 }
 0x19f   : > { %4052 = dma.done.wait (%p5062_p6), [#allocation26], 272  }
 0x1a0   : > { %4054 = vsyncadd (%p5062_p6), [#allocation26], 4294967024 }
 0x1a1   : > { %4056 = dma.done.wait (%p5062_p6), [#allocation9], 64  }
 0x1a2   : > { %4058 = vsyncadd (%p5062_p6), [#allocation9], 4294967232 }
 0x1a3   : > { %916 = sfence }
 0x1a4   : > { %p982_p13 = scmp.lt.s32.totalorder %s4077_s30, 1  ;;  %vm998_vm0 = vcmask 261120   ;;  %s5063_s23 = sld [smem:[#allocation48_spill]]  ;;  %v3524_v13 = vld [vmem:[#allocation15] sm:$0xff]   ;;  %v4103_v14 = vmov 0.0   ;;  %v3526_v16 = vld [vmem:[#allocation15 + $0x8] sm:$0xff]  }
 0x1a5   : > { %s5064_s25 = sld [smem:[#allocation54_spill]]  ;;  %3137 = vmatprep.subr.bf16.mxu0 %v4103_v14  ;;  %3145 = vmatprep.subr.bf16.mxu1 %v4103_v14  ;;  %vm4104_vm1 = vmmov 0   ;;  %s996_s2 = sld [smem:[#allocation28]]  ;;  %v3527_v39 = vld [vmem:[#allocation21] sm:$0xff]   ;;  %v3528_v42 = vld [vmem:[#allocation21 + $0x8] sm:$0xff]   ;;  %v3531_v51 = vld [vmem:[%s4978_s16] sm:$0xff]  }
 0x1a6   : > { %s4623_s0 = scalar_select %p982_p13, %s4077_s30, 1  ;;  %3146 = vmatpush3.bf16.msra.mxu1 %v3524_v13  ;;  %3141 = vmatprep.mubr.msk.bf16.mxu0 %vm4104_vm1, %v4103_v14  ;;  %v3532_v52 = vld [vmem:[%s4978_s16 + $0x8] sm:$0xff]   ;;  %v3002_v53 = vld [vmem:[#allocation13] ss:$0 sm:$0xff]  ;;  %vm1094_vm6 = vcmask 257024   ;;  %vm1401_vm7 = vcmask 64512  }
 0x1a7   : > { %3147 = vmatprep.subr.bf16.mxu1 %v4103_v14  ;;  %3149 = vmatprep.mubr.msk.bf16.mxu1 %vm4104_vm1, %v4103_v14  ;;  %s4659_s7 = sld [smem:[#allocation28 + $0x1]]  ;;  %s5065_s5 = sld [smem:[#allocation49_spill]]  ;;  %vm1463_vm8 = vcmask 1043456   ;;  %vm1857_vm9 = vcmask 130048   ;;  %vm1859_vm10 = vcmask 195584   ;;  %vm2672_vm15 = vcmask 523264  }
 0x1a8   : > { %s2999_s27 = sshll.u32 %s4623_s0, 3  ;;  %s5066_s0 = sld [smem:[#allocation52_spill]] }
 0x1a9   : > { %s5067_s28 = sld [smem:[#allocation57_spill]]  ;;  %s4107_s6 = smov 112  }
 0x1aa   : > { %s985_s26 = scalar_lea.vmem %s5063_s23, %s2999_s27  ;;  %3148 = vmatpush3.bf16.msra.mxu1 %v3526_v16  ;;  %s4108_s3 = smov 8  }
 0x1ab   : > { %v4631_v0 = vld [vmem:[%s985_s26] sm:$0xff]  ;;  %v3525_v15 = vld [vmem:[%s5064_s25 + $0x8] sm:$0xff]   ;;  %3161 = vmatprep.subr.bf16.mxu1 %v4103_v14  ;;  %v1010_v32 = vstv %s996_s2  ;;  %s4105_s2 = smov 120   ;;  %s3037_s15 = sld [smem:[#allocation28 + $0x80]] }
 0x1ac   : > { %v999_v1 = vsel %vm998_vm0, %v4631_v0, 0.0  ;;  %v3523_v12 = vld [vmem:[%s5064_s25] sm:$0xff]   ;;  %s3038_s23 = sld [smem:[#allocation28 + $0x81]]  ;;  %s5070_s1 = sld [smem:[#allocation40_spill]] }
 0x1ad   : > { %1000 = vadd.xlane.f32.xlu0 %v999_v1  ;;  %3138 = vmatpush3.bf16.msra.mxu0 %v3523_v12  ;;  %v1022_v36 = vstv %s4659_s7  ;;  %s989_s22 = scalar_lea.vmem %s5065_s5, %s2999_s27  ;;  %s4106_s7 = smov 104  }
 0x1ae   : > { %3139 = vmatprep.subr.bf16.mxu0 %v4103_v14  ;;  %v1025_v41 = vld [vmem:[%s989_s22] sm:$0xff]  ;;  %v3530_v48 = vld [vmem:[%s5066_s0 + $0x8] sm:$0xff]   ;;  %s4109_s5 = smov 16   ;;  %s4110_s22 = smov 24  }
 0x1af   : > { %v1026_v44 = vpack.c.bf16 %v1025_v41, %v1025_v41  ;;  %v3529_v46 = vld [vmem:[%s5066_s0] sm:$0xff]   ;;  %s3058_s4 = sld [smem:[#allocation28 + $0x101]]  ;;  %s5071_s21 = sld [smem:[#allocation61_spill]] }
 0x1b0   : > { %v3006_v54 = vld [vmem:[%s5067_s28] ss:$0 sm:$0xff]  ;;  %s4111_s29 = smov [#allocation29]  }
 0x1b1   : > { %1301 = vadd.xlane.f32.xlu0 %v999_v1  ;;  %3140 = vmatpush3.bf16.msra.mxu0 %v3525_v15 }
 0x1b2   : > { %3153 = vmatprep.subr.bf16.mxu0 %v4103_v14  ;;  %s979_s10 = sand.u32 1, %s5070_s1  }
 0x1b3   : > { %s2998_s28 = sshll.u32 %s979_s10, 3 }
 0x23a   : > { %v1001_v2 = vpop.xlane.xlu0 %1000 }
 0x23b   : > { %v1003_v3 = vmul.f32 0.03125, %v1001_v2 }
 0x23d   : > { %v1004_v4 = vsub.f32 %v4631_v0, %v1003_v3 }
 0x23e   : > { %v1302_v5 = vpop.xlane.xlu0 %1301 }
 0x23f   : > { %v1304_v6 = vmul.f32 0.03125, %v1302_v5  ;;  %v1005_v7 = vmul.f32 %v1004_v4, %v1004_v4  ;;  %v1011_v34 = vmul.f32 %v1010_v32, %v1004_v4  ;;  %v3010_v4 = vld [vmem:[#allocation22] ss:$0 sm:$0xff] }
 0x241   : > { %v4637_v8 = vsub.f32 %v4631_v0, %v1304_v6  ;;  %v1006_v9 = vsel %vm998_vm0, %v1005_v7, 0.0 }
 0x242   : > { %1007 = vadd.xlane.f32.xlu1 %v1006_v9 }
 0x243   : > { %v1306_v10 = vmul.f32 %v4637_v8, %v4637_v8  ;;  %v1312_v45 = vmul.f32 %v4637_v8, %v1010_v32 }
 0x245   : > { %v1307_v11 = vsel %vm998_vm0, %v1306_v10, 0.0 }
 0x246   : > { %1308 = vadd.xlane.f32.xlu1 %v1307_v11 }
 0x2cf   : > { %v1008_v17 = vpop.xlane.xlu1 %1007 }
 0x2d0   : > { %v1009_v18 = vmul.f32 0.032258064, %v1008_v17  ;;  %v3019_v17 = vld [vmem:[#allocation12] ss:$0 sm:$0xff] }
 0x2d2   : > { %3548 = vrsqrt.f32 %v1009_v18  ;;  %vm1014_vm2 = vcmp.eq.f32.partialorder %v1009_v18, inf  ;;  %v1017_v23 = vand.u32 2147483648, %v1009_v18  ;;  %vm1016_vm3 = vcmp.eq.f32.partialorder %v1009_v18, 0.0 }
 0x2d3   : > { %v1309_v19 = vpop.xlane.xlu1 %1308 }
 0x2d4   : > { %v1310_v20 = vmul.f32 0.032258064, %v1309_v19 }
 0x2d6   : > { %3550 = vrsqrt.f32 %v1310_v20  ;;  %vm1315_vm4 = vcmp.eq.f32.partialorder %v1310_v20, inf  ;;  %v1318_v29 = vand.u32 2147483648, %v1310_v20  ;;  %vm1317_vm5 = vcmp.eq.f32.partialorder %v1310_v20, 0.0 }
 0x2dc   : > { %v3549_v21 = vpop.eup %3548 }
 0x2dd   : > { %v1013_v22 = vmul.f32 %v3549_v21, %v1009_v18 }
 0x2df   : > { %v1015_v24 = vsel %vm1014_vm2, %v1009_v18, %v1013_v22 }
 0x2e0   : > { %v3551_v25 = vpop.eup %3550  ;;  %v1018_v26 = vsel %vm1016_vm3, %v1017_v23, %v1015_v24  ;;  %v3014_v24 = vld [vmem:[#allocation24] ss:$0 sm:$0xff] }
 0x2e1   : > { %v1019_v27 = vadd.f32 1e-06, %v1018_v26  ;;  %v1314_v28 = vmul.f32 %v3551_v25, %v1310_v20 }
 0x2e3   : > { %v1316_v30 = vsel %vm1315_vm4, %v1310_v20, %v1314_v28  ;;  %3552 = vrcp.f32 %v1019_v27 }
 0x2e4   : > { %v1319_v31 = vsel %vm1317_vm5, %v1318_v29, %v1316_v30 }
 0x2e5   : > { %v1320_v33 = vadd.f32 1e-06, %v1319_v31 }
 0x2e7   : > { %3554 = vrcp.f32 %v1320_v33 }
 0x2ed   : > { %v3553_v35 = vpop.eup %3552 }
 0x2ee   : > { %v1021_v37 = vmul.f32 %v3553_v35, %v1011_v34 }
 0x2f0   : > { %v1023_v38 = vadd.f32 %v1022_v36, %v1021_v37 }
 0x2f1   : > { %v3555_v43 = vpop.eup %3554 }
 0x2f2   : > { %v1024_v40 = vpack.c.bf16 %v1023_v38, %v1023_v38  ;;  %v1322_v47 = vmul.f32 %v3555_v43, %v1312_v45 }
 0x2f4   : > { %3142 = vmatmul.mubr.msk.bf16.vlgmr.msra.gmra.mrb[0].mxu0 %vm998_vm0, %v1024_v40  ;;  %3150 = vmatmul.mubr.msk.bf16.vlgmr.msra.gmra.mrb[0].mxu1 %vm998_vm0, %v1024_v40  ;;  %v1324_v49 = vadd.f32 %v1322_v47, %v1022_v36  ;;  %v1337_v40 = vld [vmem:[#allocation6] sm:$0xff] }
 0x2f5   : > { %3154 = vmatpush3.bf16.msra.mxu0 %v3527_v39  ;;  %3157 = vmatprep.mubr.msk.bf16.mxu0 %vm4104_vm1, %v4103_v14 }
 0x2f6   : > { %3155 = vmatprep.subr.bf16.mxu0 %v4103_v14  ;;  %3165 = vmatprep.mubr.msk.bf16.mxu1 %vm4104_vm1, %v4103_v14  ;;  %v1338_v50 = vpack.c.bf16 %v1324_v49, %v1324_v49 }
 0x2f7   : > { %3162 = vmatpush3.bf16.msra.mxu1 %v3531_v51 }
 0x2f8   : > { %3163 = vmatprep.subr.bf16.mxu1 %v4103_v14 }
 0x2f9   : > { %3156 = vmatpush3.bf16.msra.mxu0 %v3528_v42 }
 0x2fa   : > { %3169 = vmatprep.subr.bf16.mxu0 %v4103_v14 }
 0x2fb   : > { %3164 = vmatpush3.bf16.msra.mxu1 %v3532_v52 }
 0x2fc   : > { %3158 = vmatmul.mubr.msk.bf16.vlgmr.msra.gmra.mrb[4].mxu0 %vm998_vm0, %v1026_v44  ;;  %3177 = vmatprep.subr.bf16.mxu1 %v4103_v14 }
 0x2fd   : > { %3170 = vmatpush3.bf16.msra.mxu0 %v3529_v46  ;;  %3173 = vmatprep.mubr.msk.bf16.mxu0 %vm4104_vm1, %v4103_v14 }
 0x2fe   : > { %3171 = vmatprep.subr.bf16.mxu0 %v4103_v14  ;;  %3166 = vmatmul.mubr.msk.bf16.vlgmr.msra.gmra.mrb[4].mxu1 %vm998_vm0, %v1026_v44 }
 0x2ff   : > { %3179 = vmatprep.mubr.msk.bf16.mxu1 %vm4104_vm1, %v4103_v14 }
 0x301   : > { %3172 = vmatpush3.bf16.msra.mxu0 %v3530_v48 }
 0x302   : > { %3183 = vmatprep.subr.bf16.mxu0 %v4103_v14 }
 0x304   : > { %3174 = vmatmul.mubr.msk.bf16.vlgmr.msra.gmra.mrb[8].mxu0 %vm998_vm0, %v1338_v50 }
 0x305   : > { %3185 = vmatprep.mubr.msk.bf16.mxu0 %vm4104_vm1, %v4103_v14 }
 0x3c7   : > { %v1087_v55 = vpop.f32.mrb[0].mxu0  ;;  %v1153_v56 = vpop.f32.mrb[0].mxu1 }
 0x3c8   : > { %v1088_v57 = vadd.f32 %v3002_v53, %v1087_v55  ;;  %v1154_v58 = vadd.f32 %v3006_v54, %v1153_v56  ;;  %v3143_v59 = vpop.f32.mrb[1].mxu0  ;;  %v3151_v60 = vpop.f32.mrb[1].mxu1 }
 0x3c9   : > { %v1090_v61 = vpop.f32.mrb[2].mxu0  ;;  %v1156_v62 = vpop.f32.mrb[2].mxu1 }
 0x3ca   : > { %v1093_v63 = vpack.c.bf16 %v1088_v57, %v1088_v57  ;;  %v1159_v1 = vpack.c.bf16 %v1154_v58, %v1154_v58  ;;  %v3144_v2 = vpop.f32.mrb[3].mxu0  ;;  %v3152_v3 = vpop.f32.mrb[3].mxu1 }
 0x3cc   : > { %1095 = vst.msk [vmem:[#allocation2] sm:$0xf] %vm1094_vm6, %v1093_v63  ;;  %1160 = vst.msk [vmem:[#allocation3] sm:$0xf] %vm1094_vm6, %v1159_v1 }
 0x3cf   : > { %v1221_v5 = vpop.f32.mrb[4].mxu0 }
 0x3d0   : > { %v1222_v6 = vadd.f32 %v3010_v4, %v1221_v5  ;;  %v3159_v7 = vpop.f32.mrb[5].mxu0 }
 0x3d1   : > { %v1224_v8 = vpop.f32.mrb[6].mxu0  ;;  %v1286_v25 = vpop.f32.mrb[4].mxu1 }
 0x3d2   : > { %v1227_v9 = vpack.c.bf16 %v1222_v6, %v1222_v6  ;;  %v3160_v10 = vpop.f32.mrb[7].mxu0  ;;  %v1287_v26 = vadd.f32 %v3014_v24, %v1286_v25  ;;  %v3167_v27 = vpop.f32.mrb[5].mxu1 }
 0x3d3   : > { %v1325_v11 = vld [vmem:[#allocation2] sm:$0xf]  ;;  %v4706_v12 = vld [vmem:[#allocation3] sm:$0xf]  ;;  %v1289_v28 = vpop.f32.mrb[6].mxu1 }
 0x3d4   : > { %1228 = vst.msk [vmem:[#allocation4] sm:$0xf] %vm1094_vm6, %v1227_v9  ;;  %v1406_v13 = vsel %vm1401_vm7, %v1325_v11, 0  ;;  %v1465_v15 = vsel %vm1463_vm8, %v4706_v12, 0  ;;  %v3025_v16 = vcombine.low %v1325_v11, %v1325_v11  ;;  %v1292_v29 = vpack.c.bf16 %v1287_v26, %v1287_v26  ;;  %v3168_v30 = vpop.f32.mrb[7].mxu1 }
 0x3d5   : > { %3178 = vmatpush3.bf16.xpose.msra.mxu1 %v1406_v13  ;;  %3184 = vmatpush3.bf16.msra.mxu0 %v1465_v15 }
 0x3d6   : > { %1513 = vrot.lane.b32.xlu0 %v3025_v16, %s4105_s2  ;;  %3189 = vmatprep.subr.bf16.mxu1 %v4103_v14  ;;  %1293 = vst.msk [vmem:[#allocation5] sm:$0xf] %vm1094_vm6, %v1292_v29 }
 0x3d7   : > { %v1394_v18 = vpop.f32.mrb[8].mxu0  ;;  %3195 = vmatprep.subr.bf16.mxu0 %v4103_v14 }
 0x3d8   : > { %v1395_v19 = vadd.f32 %v3019_v17, %v1394_v18  ;;  %v3175_v20 = vpop.f32.mrb[9].mxu0 }
 0x3d9   : > { %v1397_v21 = vpop.f32.mrb[10].mxu0 }
 0x3da   : > { %v1400_v22 = vpack.c.bf16 %v1395_v19, %v1395_v19  ;;  %1736 = vrot.lane.b32.xlu0 %v3025_v16, %s4106_s7  ;;  %v3176_v23 = vpop.f32.mrb[11].mxu0  ;;  %v3027_v19 = vcombine.low %v4706_v12, %v4706_v12 }
 0x3dc   : > { %1508 = vrot.lane.b32.xlu1 %v1400_v22, %s4105_s2  ;;  %3180 = vmatmul.mubr.msk.bf16.vlgmr.msra.gmra.mrb[8].mxu1 %vm1401_vm7, %v1400_v22 }
 0x3dd   : > { %3191 = vmatprep.mubr.msk.bf16.mxu1 %vm4104_vm1, %v4103_v14 }
 0x3e0   : > { %1626 = vrot.lane.b32.xlu1 %v3025_v16, %s4107_s6 }
 0x3e4   : > { %1624 = vrot.lane.b32.xlu1 %v1400_v22, %s4107_s6 }
 0x3e8   : > { %1734 = vrot.lane.b32.xlu1 %v1400_v22, %s4106_s7 }
 0x448   : > { %v1514_v31 = vpop.permute.xlu0 %1513 }
 0x449   : > { %v1519_v32 = vsel %vm1401_vm7, %v1514_v31, 0 }
 0x44a   : > { %3190 = vmatpush3.bf16.xpose.msra.mxu1 %v1519_v32 }
 0x44b   : > { %3201 = vmatprep.subr.bf16.mxu1 %v4103_v14 }
 0x44c   : > { %v1737_v36 = vpop.permute.xlu0 %1736 }
 0x44d   : > { %v1742_v38 = vsel %vm1401_vm7, %v1737_v36, 0 }
 0x44e   : > { %v1509_v33 = vpop.permute.xlu1 %1508 }
 0x451   : > { %3192 = vmatmul.mubr.msk.bf16.vlgmr.msra.gmra.mrb[12].mxu1 %vm1401_vm7, %v1509_v33 }
 0x452   : > { %v1627_v34 = vpop.permute.xlu1 %1626  ;;  %3203 = vmatprep.mubr.msk.bf16.mxu1 %vm4104_vm1, %v4103_v14 }
 0x453   : > { %v1632_v35 = vsel %vm1401_vm7, %v1627_v34, 0 }
 0x454   : > { %3202 = vmatpush3.bf16.xpose.msra.mxu1 %v1632_v35 }
 0x455   : > { %3213 = vmatprep.subr.bf16.mxu1 %v4103_v14 }
 0x456   : > { %v1625_v37 = vpop.permute.xlu1 %1624 }
 0x45a   : > { %v1735_v39 = vpop.permute.xlu1 %1734 }
 0x45b   : > { %3204 = vmatmul.mubr.msk.bf16.vlgmr.msra.gmra.mrb[16].mxu1 %vm1401_vm7, %v1625_v37 }
 0x45c   : > { %3214 = vmatpush3.bf16.xpose.msra.mxu1 %v1742_v38  ;;  %3215 = vmatprep.mubr.msk.bf16.mxu1 %vm4104_vm1, %v4103_v14 }
 0x45d   : > { %3225 = vmatprep.subr.bf16.mxu1 %v4103_v14 }
 0x463   : > { %3216 = vmatmul.mubr.msk.bf16.vlgmr.msra.gmra.mrb[20].mxu1 %vm1401_vm7, %v1735_v39 }
 0x464   : > { %3229 = vmatprep.mubr.msk.bf16.mxu1 %vm4104_vm1, %v4103_v14 }
 0x4af   : > { %v1442_v41 = vpop.f32.mrb[8].mxu1 }
 0x4b0   : > { %v1443_v42 = vadd.f32 %v1442_v41, %v1337_v40  ;;  %v3181_v43 = vpop.f32.mrb[9].mxu1 }
 0x4b1   : > { %v1445_v44 = vpop.f32.mrb[10].mxu1 }
 0x4b2   : > { %v3182_v45 = vpop.f32.mrb[11].mxu1  ;;  %v1448_v46 = vsel %vm1401_vm7, %v1443_v42, -inf }
 0x4b3   : > { %1449 = vmax.xlane.f32.xlu0 %v1448_v46 }
 0x524   : > { %v1555_v47 = vpop.f32.mrb[12].mxu1 }
 0x525   : > { %v1556_v48 = vadd.f32 %v1555_v47, %v1337_v40  ;;  %v3193_v49 = vpop.f32.mrb[13].mxu1 }
 0x526   : > { %v1558_v50 = vpop.f32.mrb[14].mxu1 }
 0x527   : > { %v3194_v51 = vpop.f32.mrb[15].mxu1  ;;  %v1561_v52 = vsel %vm1401_vm7, %v1556_v48, -inf  ;;  %v3534_v50 = vld [vmem:[#allocation16] sm:$0xff]  }
 0x528   : > { %1562 = vmax.xlane.f32.xlu1 %v1561_v52  ;;  %3226 = vmatpush3.bf16.msra.mxu1 %v3534_v50  ;;  %v3535_v51 = vld [vmem:[#allocation16 + $0x8] sm:$0xff]  }
 0x529   : > { %3227 = vmatprep.subr.bf16.mxu1 %v4103_v14 }
 0x52c   : > { %3228 = vmatpush3.bf16.msra.mxu1 %v3535_v51 }
 0x52d   : > { %3241 = vmatprep.subr.bf16.mxu1 %v4103_v14 }
 0x52e   : > { %v1668_v53 = vpop.f32.mrb[16].mxu1 }
 0x52f   : > { %v1669_v54 = vadd.f32 %v1668_v53, %v1337_v40  ;;  %v3205_v55 = vpop.f32.mrb[17].mxu1 }
 0x530   : > { %v1671_v56 = vpop.f32.mrb[18].mxu1 }
 0x531   : > { %v3206_v57 = vpop.f32.mrb[19].mxu1  ;;  %v1674_v58 = vsel %vm1401_vm7, %v1669_v54, -inf }
 0x532   : > { %1675 = vmax.xlane.f32.xlu0 %v1674_v58 }
 0x536   : > { %v1778_v59 = vpop.f32.mrb[20].mxu1 }
 0x537   : > { %v1779_v60 = vadd.f32 %v1778_v59, %v1337_v40  ;;  %v3217_v61 = vpop.f32.mrb[21].mxu1 }
 0x538   : > { %v1781_v62 = vpop.f32.mrb[22].mxu1 }
 0x539   : > { %v3218_v63 = vpop.f32.mrb[23].mxu1  ;;  %v1784_v1 = vsel %vm1401_vm7, %v1779_v60, -inf }
 0x53a   : > { %1785 = vmax.xlane.f32.xlu0 %v1784_v1 }
 0x540   : > { %v1450_v2 = vpop.xlane.xlu0 %1449 }
 0x541   : > { %v1451_v3 = vsub.f32 %v1443_v42, %v1450_v2 }
 0x543   : > { %v1452_v4 = vmul.f32 1.442695, %v1451_v3 }
 0x545   : > { %3556 = vpow2.f32 %v1452_v4 }
 0x54f   : > { %v3557_v5 = vpop.eup %3556 }
 0x550   : > { %v1454_v6 = vsel %vm1401_vm7, %v3557_v5, 0.0 }
 0x551   : > { %1455 = vadd.xlane.f32.xlu0 %v1454_v6 }
 0x5b5   : > { %v1563_v7 = vpop.xlane.xlu1 %1562 }
 0x5b6   : > { %v1564_v8 = vsub.f32 %v1556_v48, %v1563_v7  ;;  %v1950_v7 = vld [vmem:[#allocation4] sm:$0xf] }
 0x5b8   : > { %v1565_v9 = vmul.f32 1.442695, %v1564_v8 }
 0x5ba   : > { %3558 = vpow2.f32 %v1565_v9  ;;  %v2030_v9 = vsel %vm1401_vm7, %v1950_v7, 0 }
 0x5bf   : > { %v1676_v10 = vpop.xlane.xlu0 %1675 }
 0x5c0   : > { %v1677_v11 = vsub.f32 %v1669_v54, %v1676_v10  ;;  %v3033_v10 = vld [vmem:[#allocation18] ss:$0 sm:$0xff] }
 0x5c2   : > { %v1678_v13 = vmul.f32 1.442695, %v1677_v11 }
 0x5c4   : > { %v3559_v15 = vpop.eup %3558  ;;  %3560 = vpow2.f32 %v1678_v13 }
 0x5c5   : > { %v1567_v16 = vsel %vm1401_vm7, %v3559_v15, 0.0 }
 0x5c6   : > { %1568 = vadd.xlane.f32.xlu1 %v1567_v16 }
 0x5c7   : > { %v1786_v20 = vpop.xlane.xlu0 %1785 }
 0x5c8   : > { %v1787_v22 = vsub.f32 %v1779_v60, %v1786_v20  ;;  %v3045_v20 = vcombine.low %v1950_v7, %v1950_v7 }
 0x5ca   : > { %v1788_v24 = vmul.f32 1.442695, %v1787_v22 }
 0x5ce   : > { %v3561_v17 = vpop.eup %3560 }
 0x5cf   : > { %v1680_v18 = vsel %vm1401_vm7, %v3561_v17, 0.0 }
 0x5d0   : > { %1681 = vadd.xlane.f32.xlu0 %v1680_v18 }
 0x5d7   : > { %1686 = vrot.lane.b32.xlu1 %v3027_v19, %s4107_s6 }
 0x5de   : > { %v1456_v21 = vpop.xlane.xlu0 %1455 }
 0x5df   : > { %3562 = vrcp.f32 %v1456_v21 }
 0x5e0   : > { %3564 = vpow2.f32 %v1788_v24 }
 0x5e6   : > { %1576 = vrot.lane.b32.xlu0 %v3027_v19, %s4105_s2 }
 0x5e9   : > { %v3563_v23 = vpop.eup %3562 }
 0x5ea   : > { %v1458_v25 = vmul.f32 %v3563_v23, %v3557_v5  ;;  %v3565_v27 = vpop.eup %3564 }
 0x5eb   : > { %v1790_v12 = vsel %vm1401_vm7, %v3565_v27, 0.0 }
 0x5ec   : > { %v1459_v26 = vpack.c.bf16 %v1458_v25, %v1458_v25  ;;  %v3537_v25 = vld [vmem:[%s4974_s12] sm:$0xff]  }
 0x5ee   : > { %3186 = vmatmul.mubr.msk.bf16.vlgmr.msra.gmra.mrb[12].mxu0 %vm1401_vm7, %v1459_v26  ;;  %v3538_v26 = vld [vmem:[%s4974_s12 + $0x8] sm:$0xff]  }
 0x5ef   : > { %3197 = vmatprep.mubr.msk.bf16.mxu0 %vm4104_vm1, %v4103_v14 }
 0x5fb   : > { %1791 = vadd.xlane.f32.xlu1 %v1790_v12 }
 0x60c   : > { %1796 = vrot.lane.b32.xlu1 %v3027_v19, %s4106_s7 }
 0x653   : > { %v1569_v28 = vpop.xlane.xlu1 %1568 }
 0x654   : > { %3566 = vrcp.f32 %v1569_v28 }
 0x657   : > { %v1687_v34 = vpop.permute.xlu1 %1686 }
 0x658   : > { %v1692_v36 = vsel %vm1463_vm8, %v1687_v34, 0  ;;  %v1936_v34 = vstv %s3037_s15 }
 0x65d   : > { %v1682_v29 = vpop.xlane.xlu0 %1681 }
 0x65e   : > { %v3567_v30 = vpop.eup %3566  ;;  %3568 = vrcp.f32 %v1682_v29 }
 0x65f   : > { %v1571_v31 = vmul.f32 %v3567_v30, %v3559_v15 }
 0x661   : > { %v1577_v32 = vpop.permute.xlu0 %1576  ;;  %v1572_v35 = vpack.c.bf16 %v1571_v31, %v1571_v31 }
 0x662   : > { %v1582_v33 = vsel %vm1463_vm8, %v1577_v32, 0 }
 0x663   : > { %3196 = vmatpush3.bf16.msra.mxu0 %v1582_v33 }
 0x664   : > { %3207 = vmatprep.subr.bf16.mxu0 %v4103_v14 }
 0x666   : > { %3198 = vmatmul.mubr.msk.bf16.vlgmr.msra.gmra.mrb[16].mxu0 %vm1401_vm7, %v1572_v35 }
 0x667   : > { %3208 = vmatpush3.bf16.msra.mxu0 %v1692_v36  ;;  %3209 = vmatprep.mubr.msk.bf16.mxu0 %vm4104_vm1, %v4103_v14 }
 0x668   : > { %v3569_v37 = vpop.eup %3568  ;;  %3219 = vmatprep.subr.bf16.mxu0 %v4103_v14 }
 0x669   : > { %v1684_v38 = vmul.f32 %v3569_v37, %v3561_v17  ;;  %v1948_v37 = vstv %s3038_s23  ;;  %s5074_s23 = sld [smem:[#allocation64_spill]] }
 0x66b   : > { %v1685_v39 = vpack.c.bf16 %v1684_v38, %v1684_v38 }
 0x66e   : > { %3210 = vmatmul.mubr.msk.bf16.vlgmr.msra.gmra.mrb[20].mxu0 %vm1401_vm7, %v1685_v39 }
 0x66f   : > { %3221 = vmatprep.mubr.msk.bf16.mxu0 %vm4104_vm1, %v4103_v14 }
 0x688   : > { %v1792_v40 = vpop.xlane.xlu1 %1791 }
 0x689   : > { %3570 = vrcp.f32 %v1792_v40  ;;  %v4801_v40 = vld [vmem:[#allocation5] sm:$0xf] }
 0x68c   : > { %v1797_v41 = vpop.permute.xlu1 %1796 }
 0x68d   : > { %v1802_v42 = vsel %vm1463_vm8, %v1797_v41, 0 }
 0x68e   : > { %3220 = vmatpush3.bf16.msra.mxu0 %v1802_v42  ;;  %v2088_v42 = vsel %vm1463_vm8, %v4801_v40, 0 }
 0x68f   : > { %3233 = vmatprep.subr.bf16.mxu0 %v4103_v14 }
 0x693   : > { %v3571_v43 = vpop.eup %3570 }
 0x694   : > { %v1794_v44 = vmul.f32 %v3571_v43, %v3565_v27  ;;  %v3039_v43 = vld [vmem:[#allocation19] ss:$0 sm:$0xff] }
 0x696   : > { %v1795_v45 = vpack.c.bf16 %v1794_v44, %v1794_v44 }
 0x698   : > { %3222 = vmatmul.mubr.msk.bf16.vlgmr.msra.gmra.mrb[24].mxu0 %vm1401_vm7, %v1795_v45 }
 0x699   : > { %3237 = vmatprep.mubr.msk.bf16.mxu0 %vm4104_vm1, %v4103_v14  ;;  %3234 = vmatpush3.bf16.msra.mxu0 %v3537_v25 }
 0x69a   : > { %3235 = vmatprep.subr.bf16.mxu0 %v4103_v14 }
 0x69d   : > { %3236 = vmatpush3.bf16.msra.mxu0 %v3538_v26 }
 0x69e   : > { %3247 = vmatprep.subr.bf16.mxu0 %v4103_v14 }
 0x6c1   : > { %v1501_v46 = vpop.f32.mrb[12].mxu0 }
 0x6c2   : > { %v3187_v47 = vpop.f32.mrb[13].mxu0 }
 0x6c3   : > { %v1504_v48 = vpop.f32.mrb[14].mxu0 }
 0x6c4   : > { %v3188_v49 = vpop.f32.mrb[15].mxu0 }
 0x739   : > { %v1618_v52 = vpop.f32.mrb[16].mxu0 }
 0x73a   : > { %1845 = vrot.lane.b32.xlu1 %v1618_v52, %s4108_s3  ;;  %v3199_v53 = vpop.f32.mrb[17].mxu0 }
 0x73b   : > { %v1621_v54 = vpop.f32.mrb[18].mxu0 }
 0x73c   : > { %v3200_v55 = vpop.f32.mrb[19].mxu0 }
 0x741   : > { %v1728_v56 = vpop.f32.mrb[20].mxu0 }
 0x742   : > { %1849 = vrot.lane.b32.xlu0 %v1728_v56, %s4109_s5  ;;  %v3211_v57 = vpop.f32.mrb[21].mxu0 }
 0x743   : > { %v1731_v58 = vpop.f32.mrb[22].mxu0 }
 0x744   : > { %v3212_v59 = vpop.f32.mrb[23].mxu0 }
 0x745   : > { %v1962_v59 = vld [vmem:[#allocation10] sm:$0xff] }
 0x76b   : > { %v1838_v60 = vpop.f32.mrb[24].mxu0 }
 0x76c   : > { %1853 = vrot.lane.b32.xlu1 %v1838_v60, %s4110_s22  ;;  %v3223_v61 = vpop.f32.mrb[25].mxu0 }
 0x76d   : > { %v1841_v62 = vpop.f32.mrb[26].mxu0 }
 0x76e   : > { %v3224_v63 = vpop.f32.mrb[27].mxu0 }
 0x7ac   : > { %v1846_v1 = vpop.permute.xlu1 %1845 }
 0x7ad   : > { %v1856_v3 = vsel %vm1401_vm7, %v1501_v46, %v1846_v1 }
 0x7b4   : > { %v1850_v2 = vpop.permute.xlu0 %1849 }
 0x7b5   : > { %v1858_v4 = vsel %vm1857_vm9, %v1856_v3, %v1850_v2 }
 0x7de   : > { %v1854_v5 = vpop.permute.xlu1 %1853 }
 0x7df   : > { %v1860_v6 = vsel %vm1859_vm10, %v1858_v4, %v1854_v5 }
 0x7e0   : > { %v1861_v8 = vpack.c.bf16 %v1860_v6, %v1860_v6 }
 0x7e2   : > { %3230 = vmatmul.mubr.msk.bf16.vlgmr.msra.gmra.mrb[24].mxu1 %vm998_vm0, %v1861_v8 }
 0x7e3   : > { %3242 = vmatpush3.bf16.xpose.msra.mxu1 %v2030_v9  ;;  %3243 = vmatprep.mubr.msk.bf16.mxu1 %vm4104_vm1, %v4103_v14 }
 0x7e4   : > { %3253 = vmatprep.subr.bf16.mxu1 %v4103_v14 }
 0x8b5   : > { %v1917_v11 = vpop.f32.mrb[24].mxu1 }
 0x8b6   : > { %v1918_v13 = vadd.f32 %v3033_v10, %v1917_v11  ;;  %v3231_v15 = vpop.f32.mrb[25].mxu1 }
 0x8b7   : > { %v1920_v16 = vpop.f32.mrb[26].mxu1 }
 0x8b8   : > { %v4784_v17 = vadd.f32 %v1918_v13, %v4631_v0  ;;  %v3232_v18 = vpop.f32.mrb[27].mxu1 }
 0x8ba   : > { %v1926_v19 = vsel %vm998_vm0, %v4784_v17, 0.0 }
 0x8bb   : > { %1927 = vadd.xlane.f32.xlu0 %v1926_v19 }
 0x8d1   : > { %2136 = vrot.lane.b32.xlu0 %v3045_v20, %s4105_s2 }
 0x8d5   : > { %2249 = vrot.lane.b32.xlu0 %v3045_v20, %s4107_s6 }
 0x8d9   : > { %2359 = vrot.lane.b32.xlu0 %v3045_v20, %s4106_s7 }
 0x948   : > { %v1928_v21 = vpop.xlane.xlu0 %1927 }
 0x949   : > { %v1929_v22 = vmul.f32 0.03125, %v1928_v21 }
 0x94b   : > { %v1930_v23 = vsub.f32 %v4784_v17, %v1929_v22 }
 0x94c   : > { %v2137_v47 = vpop.permute.xlu0 %2136 }
 0x94d   : > { %v1931_v24 = vmul.f32 %v1930_v23, %v1930_v23  ;;  %v1937_v35 = vmul.f32 %v1936_v34, %v1930_v23  ;;  %v2142_v51 = vsel %vm1401_vm7, %v2137_v47, 0 }
 0x94f   : > { %v1932_v0 = vsel %vm998_vm0, %v1931_v24, 0.0 }
 0x950   : > { %1933 = vadd.xlane.f32.xlu1 %v1932_v0  ;;  %v2250_v52 = vpop.permute.xlu0 %2249 }
 0x951   : > { %v2255_v54 = vsel %vm1401_vm7, %v2250_v52, 0 }
 0x954   : > { %v2360_v55 = vpop.permute.xlu0 %2359 }
 0x955   : > { %v2365_v57 = vsel %vm1401_vm7, %v2360_v55, 0 }
 0x9dd   : > { %v1934_v27 = vpop.xlane.xlu1 %1933 }
 0x9de   : > { %v1935_v12 = vmul.f32 0.032258064, %v1934_v27 }
 0x9e0   : > { %3572 = vrsqrt.f32 %v1935_v12  ;;  %vm1940_vm11 = vcmp.eq.f32.partialorder %v1935_v12, inf  ;;  %v1943_v30 = vand.u32 2147483648, %v1935_v12  ;;  %vm1942_vm12 = vcmp.eq.f32.partialorder %v1935_v12, 0.0 }
 0x9ea   : > { %v3573_v28 = vpop.eup %3572 }
 0x9eb   : > { %v1939_v29 = vmul.f32 %v3573_v28, %v1935_v12 }
 0x9ed   : > { %v1941_v31 = vsel %vm1940_vm11, %v1935_v12, %v1939_v29 }
 0x9ee   : > { %v1944_v32 = vsel %vm1942_vm12, %v1943_v30, %v1941_v31 }
 0x9ef   : > { %v1945_v33 = vadd.f32 1e-06, %v1944_v32 }
 0x9f1   : > { %3574 = vrcp.f32 %v1945_v33 }
 0x9fb   : > { %v3575_v36 = vpop.eup %3574 }
 0x9fc   : > { %v1947_v38 = vmul.f32 %v3575_v36, %v1937_v35 }
 0x9fe   : > { %v1949_v39 = vadd.f32 %v1948_v37, %v1947_v38  ;;  %v3047_v37 = vcombine.low %v4801_v40, %v4801_v40 }
 0xa00   : > { %v1963_v41 = vpack.c.bf16 %v1949_v39, %v1949_v39 }
 0xa02   : > { %3238 = vmatmul.mubr.msk.bf16.vlgmr.msra.gmra.mrb[28].mxu0 %vm998_vm0, %v1963_v41 }
 0xa03   : > { %3248 = vmatpush3.bf16.msra.mxu0 %v2088_v42  ;;  %3249 = vmatprep.mubr.msk.bf16.mxu0 %vm4104_vm1, %v4103_v14 }
 0xa04   : > { %3259 = vmatprep.subr.bf16.mxu0 %v4103_v14 }
 0xad5   : > { %v2019_v44 = vpop.f32.mrb[28].mxu0 }
 0xad6   : > { %v2020_v45 = vadd.f32 %v3039_v43, %v2019_v44  ;;  %v3239_v46 = vpop.f32.mrb[29].mxu0 }
 0xad7   : > { %v2022_v48 = vpop.f32.mrb[30].mxu0 }
 0xad8   : > { %v2025_v49 = vpack.c.bf16 %v2020_v45, %v2020_v45  ;;  %v3240_v50 = vpop.f32.mrb[31].mxu0 }
 0xada   : > { %2131 = vrot.lane.b32.xlu1 %v2025_v49, %s4105_s2  ;;  %3244 = vmatmul.mubr.msk.bf16.vlgmr.msra.gmra.mrb[28].mxu1 %vm1401_vm7, %v2025_v49 }
 0xadb   : > { %3254 = vmatpush3.bf16.xpose.msra.mxu1 %v2142_v51  ;;  %3255 = vmatprep.mubr.msk.bf16.mxu1 %vm4104_vm1, %v4103_v14 }
 0xadc   : > { %3265 = vmatprep.subr.bf16.mxu1 %v4103_v14 }
 0xade   : > { %2247 = vrot.lane.b32.xlu1 %v2025_v49, %s4107_s6 }
 0xae2   : > { %2357 = vrot.lane.b32.xlu1 %v2025_v49, %s4106_s7 }
 0xb4c   : > { %v2132_v53 = vpop.permute.xlu1 %2131 }
 0xb4d   : > { %3256 = vmatmul.mubr.msk.bf16.vlgmr.msra.gmra.mrb[32].mxu1 %vm1401_vm7, %v2132_v53 }
 0xb4e   : > { %3266 = vmatpush3.bf16.xpose.msra.mxu1 %v2255_v54  ;;  %3267 = vmatprep.mubr.msk.bf16.mxu1 %vm4104_vm1, %v4103_v14 }
 0xb4f   : > { %3277 = vmatprep.subr.bf16.mxu1 %v4103_v14 }
 0xb50   : > { %v2248_v56 = vpop.permute.xlu1 %2247 }
 0xb54   : > { %v2358_v58 = vpop.permute.xlu1 %2357 }
 0xb55   : > { %3268 = vmatmul.mubr.msk.bf16.vlgmr.msra.gmra.mrb[36].mxu1 %vm1401_vm7, %v2248_v56 }
 0xb56   : > { %3278 = vmatpush3.bf16.xpose.msra.mxu1 %v2365_v57  ;;  %3279 = vmatprep.mubr.msk.bf16.mxu1 %vm4104_vm1, %v4103_v14 }
 0xb57   : > { %3289 = vmatprep.subr.bf16.mxu1 %v4103_v14 }
 0xb5d   : > { %3280 = vmatmul.mubr.msk.bf16.vlgmr.msra.gmra.mrb[40].mxu1 %vm1401_vm7, %v2358_v58 }
 0xb5e   : > { %3293 = vmatprep.mubr.msk.bf16.mxu1 %vm4104_vm1, %v4103_v14 }
 0xbad   : > { %v2066_v60 = vpop.f32.mrb[28].mxu1 }
 0xbae   : > { %v2067_v61 = vadd.f32 %v2066_v60, %v1962_v59  ;;  %v3245_v62 = vpop.f32.mrb[29].mxu1 }
 0xbaf   : > { %v2069_v63 = vpop.f32.mrb[30].mxu1 }
 0xbb0   : > { %v3246_v1 = vpop.f32.mrb[31].mxu1  ;;  %v2072_v2 = vsel %vm1401_vm7, %v2067_v61, -inf }
 0xbb1   : > { %2073 = vmax.xlane.f32.xlu0 %v2072_v2 }
 0xc20   : > { %v2178_v3 = vpop.f32.mrb[32].mxu1 }
 0xc21   : > { %v2179_v4 = vadd.f32 %v2178_v3, %v1962_v59  ;;  %v3257_v5 = vpop.f32.mrb[33].mxu1 }
 0xc22   : > { %v2181_v6 = vpop.f32.mrb[34].mxu1 }
 0xc23   : > { %v3258_v7 = vpop.f32.mrb[35].mxu1  ;;  %v2184_v8 = vsel %vm1401_vm7, %v2179_v4, -inf  ;;  %v3540_v6 = vld [vmem:[#allocation25] sm:$0xff]  }
 0xc24   : > { %2185 = vmax.xlane.f32.xlu1 %v2184_v8  ;;  %3290 = vmatpush3.bf16.msra.mxu1 %v3540_v6 }
 0xc25   : > { %3291 = vmatprep.subr.bf16.mxu1 %v4103_v14 }
 0xc28   : > { %v2291_v9 = vpop.f32.mrb[36].mxu1 }
 0xc29   : > { %v2292_v10 = vadd.f32 %v2291_v9, %v1962_v59  ;;  %v3269_v11 = vpop.f32.mrb[37].mxu1 }
 0xc2a   : > { %v2294_v13 = vpop.f32.mrb[38].mxu1 }
 0xc2b   : > { %v3270_v15 = vpop.f32.mrb[39].mxu1  ;;  %v2297_v16 = vsel %vm1401_vm7, %v2292_v10, -inf }
 0xc2c   : > { %2298 = vmax.xlane.f32.xlu0 %v2297_v16 }
 0xc30   : > { %v2401_v18 = vpop.f32.mrb[40].mxu1 }
 0xc31   : > { %v2402_v19 = vadd.f32 %v2401_v18, %v1962_v59  ;;  %v3281_v20 = vpop.f32.mrb[41].mxu1  ;;  %v3541_v18 = vld [vmem:[#allocation25 + $0x8] sm:$0xff]  }
 0xc32   : > { %v2404_v21 = vpop.f32.mrb[42].mxu1  ;;  %3292 = vmatpush3.bf16.msra.mxu1 %v3541_v18 }
 0xc33   : > { %v3282_v22 = vpop.f32.mrb[43].mxu1  ;;  %v2407_v23 = vsel %vm1401_vm7, %v2402_v19, -inf  ;;  %3305 = vmatprep.subr.bf16.mxu1 %v4103_v14 }
 0xc34   : > { %2408 = vmax.xlane.f32.xlu0 %v2407_v23 }
 0xc3e   : > { %v2074_v24 = vpop.xlane.xlu0 %2073 }
 0xc3f   : > { %v2075_v0 = vsub.f32 %v2067_v61, %v2074_v24 }
 0xc41   : > { %v2076_v25 = vmul.f32 1.442695, %v2075_v0 }
 0xc43   : > { %3576 = vpow2.f32 %v2076_v25 }
 0xc4d   : > { %v3577_v26 = vpop.eup %3576 }
 0xc4e   : > { %v2078_v27 = vsel %vm1401_vm7, %v3577_v26, 0.0 }
 0xc4f   : > { %2079 = vadd.xlane.f32.xlu0 %v2078_v27 }
 0xcb1   : > { %v2186_v12 = vpop.xlane.xlu1 %2185 }
 0xcb2   : > { %v2187_v28 = vsub.f32 %v2179_v4, %v2186_v12 }
 0xcb4   : > { %v2188_v29 = vmul.f32 1.442695, %v2187_v28  ;;  %v3053_v28 = vld [vmem:[#allocation27] ss:$0 sm:$0xff] }
 0xcb6   : > { %3578 = vpow2.f32 %v2188_v29 }
 0xcb9   : > { %v2299_v30 = vpop.xlane.xlu0 %2298 }
 0xcba   : > { %v2300_v31 = vsub.f32 %v2292_v10, %v2299_v30 }
 0xcbc   : > { %v2301_v32 = vmul.f32 1.442695, %v2300_v31 }
 0xcbe   : > { %3580 = vpow2.f32 %v2301_v32 }
 0xcc0   : > { %v3579_v33 = vpop.eup %3578 }
 0xcc1   : > { %v2190_v34 = vsel %vm1401_vm7, %v3579_v33, 0.0  ;;  %v2409_v38 = vpop.xlane.xlu0 %2408 }
 0xcc2   : > { %2191 = vadd.xlane.f32.xlu1 %v2190_v34  ;;  %v2410_v41 = vsub.f32 %v2402_v19, %v2409_v38 }
 0xcc4   : > { %v2411_v42 = vmul.f32 1.442695, %v2410_v41 }
 0xcc8   : > { %v3581_v35 = vpop.eup %3580 }
 0xcc9   : > { %v2303_v36 = vsel %vm1401_vm7, %v3581_v35, 0.0 }
 0xcca   : > { %2304 = vadd.xlane.f32.xlu0 %v2303_v36 }
 0xcd3   : > { %2309 = vrot.lane.b32.xlu1 %v3047_v37, %s4107_s6  ;;  %s5072_s6 = sld [smem:[#allocation63_spill]] }
 0xcd9   : > { %v3068_v6 = vld [vmem:[%s5072_s6] ss:$0 sm:$0xff] }
 0xcdc   : > { %v2080_v39 = vpop.xlane.xlu0 %2079 }
 0xcdd   : > { %3582 = vrcp.f32 %v2080_v39 }
 0xcde   : > { %3584 = vpow2.f32 %v2411_v42  ;;  %v3542_v42 = vld [vmem:[%s4982_s20] sm:$0xff]  }
 0xce0   : > { %2199 = vrot.lane.b32.xlu0 %v3047_v37, %s4105_s2 }
 0xce7   : > { %v3583_v43 = vpop.eup %3582 }
 0xce8   : > { %v2082_v44 = vmul.f32 %v3583_v43, %v3577_v26  ;;  %v3585_v46 = vpop.eup %3584 }
 0xce9   : > { %v2413_v40 = vsel %vm1401_vm7, %v3585_v46, 0.0 }
 0xcea   : > { %v2083_v45 = vpack.c.bf16 %v2082_v44, %v2082_v44 }
 0xcec   : > { %3250 = vmatmul.mubr.msk.bf16.vlgmr.msra.gmra.mrb[32].mxu0 %vm1401_vm7, %v2083_v45 }
 0xced   : > { %3261 = vmatprep.mubr.msk.bf16.mxu0 %vm4104_vm1, %v4103_v14 }
 0xcf7   : > { %2414 = vadd.xlane.f32.xlu1 %v2413_v40 }
 0xd08   : > { %2419 = vrot.lane.b32.xlu1 %v3047_v37, %s4106_s7  ;;  %s5068_s7 = sld [smem:[#allocation62_spill]] }
 0xd0e   : > { %v3544_v43 = vld [vmem:[%s5068_s7] sm:$0xff]  }
 0xd4f   : > { %v2192_v47 = vpop.xlane.xlu1 %2191 }
 0xd50   : > { %3586 = vrcp.f32 %v2192_v47 }
 0xd53   : > { %v2310_v53 = vpop.permute.xlu1 %2309 }
 0xd54   : > { %v2315_v55 = vsel %vm1463_vm8, %v2310_v53, 0 }
 0xd57   : > { %v2305_v48 = vpop.xlane.xlu0 %2304 }
 0xd58   : > { %3588 = vrcp.f32 %v2305_v48 }
 0xd5a   : > { %v3587_v49 = vpop.eup %3586 }
 0xd5b   : > { %v2194_v50 = vmul.f32 %v3587_v49, %v3579_v33  ;;  %v2200_v51 = vpop.permute.xlu0 %2199 }
 0xd5c   : > { %v2205_v52 = vsel %vm1463_vm8, %v2200_v51, 0 }
 0xd5d   : > { %3260 = vmatpush3.bf16.msra.mxu0 %v2205_v52  ;;  %v2195_v54 = vpack.c.bf16 %v2194_v50, %v2194_v50 }
 0xd5e   : > { %3271 = vmatprep.subr.bf16.mxu0 %v4103_v14 }
 0xd60   : > { %3262 = vmatmul.mubr.msk.bf16.vlgmr.msra.gmra.mrb[36].mxu0 %vm1401_vm7, %v2195_v54 }
 0xd61   : > { %3272 = vmatpush3.bf16.msra.mxu0 %v2315_v55  ;;  %3273 = vmatprep.mubr.msk.bf16.mxu0 %vm4104_vm1, %v4103_v14  ;;  %v2569_v55 = vstv %s3058_s4  ;;  %s981_s4 = scalar_lea.vmem [#allocation29], %s2998_s28 }
 0xd62   : > { %v3589_v56 = vpop.eup %3588  ;;  %3283 = vmatprep.subr.bf16.mxu0 %v4103_v14  ;;  %s2741_s13 = sshll.u32 %s981_s4, 4  ;;  %s4916_s13 = int_to_ptr.vmem [resolvable:$true] %s2741_s13 }
 0xd63   : > { %v2307_v57 = vmul.f32 %v3589_v56, %v3581_v35  ;;  %s3975_s26 = scalar_lea.vmem %s4916_s13, 128 }
 0xd64   : > { %p3976_p1 = scmp.ne.s32.totalorder %s4916_s13, %s3975_s26 }
 0xd65   : > { %v2308_v58 = vpack.c.bf16 %v2307_v57, %v2307_v57 }
 0xd68   : > { %3274 = vmatmul.mubr.msk.bf16.vlgmr.msra.gmra.mrb[40].mxu0 %vm1401_vm7, %v2308_v58 }
 0xd69   : > { %3285 = vmatprep.mubr.msk.bf16.mxu0 %vm4104_vm1, %v4103_v14 }
 0xd84   : > { %v2415_v59 = vpop.xlane.xlu1 %2414 }
 0xd85   : > { %3590 = vrcp.f32 %v2415_v59 }
 0xd88   : > { %v2420_v60 = vpop.permute.xlu1 %2419 }
 0xd89   : > { %v2425_v61 = vsel %vm1463_vm8, %v2420_v60, 0 }
 0xd8a   : > { %3284 = vmatpush3.bf16.msra.mxu0 %v2425_v61  ;;  %v3059_v61 = vld [vmem:[%s5071_s21] ss:$0 sm:$0xff]  ;;  %s3979_s21 = sshll.u32 %s4111_s29, 4  ;;  %s3980_s21 = int_to_ptr.vmem [resolvable:$false] %s3979_s21 }
 0xd8b   : > { %3297 = vmatprep.subr.bf16.mxu0 %v4103_v14  ;;  %s3981_s28 = scalar_lea.vmem %s3980_s21, 256  ;;  %p3982_p0 = scmp.lt.s32.totalorder %s4916_s13, %s3980_s21 }
 0xd8c   : > { %p3983_p2 = scmp.lt.s32.totalorder %s3981_s28, %s3975_s26 }
 0xd8e   : > { %p3984_p4 = por %p3983_p2, %p3982_p0 }
 0xd8f   : > { %v3591_v62 = vpop.eup %3590 }
 0xd90   : > { %v2417_v63 = vmul.f32 %v3591_v62, %v3585_v46 }
 0xd92   : > { %v2418_v1 = vpack.c.bf16 %v2417_v63, %v2417_v63 }
 0xd94   : > { %3286 = vmatmul.mubr.msk.bf16.vlgmr.msra.gmra.mrb[44].mxu0 %vm1401_vm7, %v2418_v1 }
 0xd95   : > { %3301 = vmatprep.mubr.msk.bf16.mxu0 %vm4104_vm1, %v4103_v14  ;;  %3298 = vmatpush3.bf16.msra.mxu0 %v3542_v42 }
 0xd96   : > { %3299 = vmatprep.subr.bf16.mxu0 %v4103_v14 }
 0xdbf   : > { %v2124_v2 = vpop.f32.mrb[32].mxu0 }
 0xdc0   : > { %v3251_v3 = vpop.f32.mrb[33].mxu0 }
 0xdc1   : > { %v2127_v4 = vpop.f32.mrb[34].mxu0 }
 0xdc2   : > { %v3252_v5 = vpop.f32.mrb[35].mxu0 }
 0xe33   : > { %v2241_v7 = vpop.f32.mrb[36].mxu0 }
 0xe34   : > { %2468 = vrot.lane.b32.xlu1 %v2241_v7, %s4108_s3  ;;  %v3263_v8 = vpop.f32.mrb[37].mxu0  ;;  %s5073_s3 = sld [smem:[#allocation45_spill]] }
 0xe35   : > { %v2244_v9 = vpop.f32.mrb[38].mxu0 }
 0xe36   : > { %v3264_v10 = vpop.f32.mrb[39].mxu0 }
 0xe3a   : > { %p5075_p7 = scmp.ne.s32.totalorder %s5073_s3, 0 }
 0xe3b   : > { %v2351_v11 = vpop.f32.mrb[40].mxu0 }
 0xe3c   : > { %2472 = vrot.lane.b32.xlu0 %v2351_v11, %s4109_s5  ;;  %v3275_v13 = vpop.f32.mrb[41].mxu0  ;;  %s5069_s5 = smov %s5068_s7  ;;  %p3977_p9 = pnand %p3976_p1, %p5075_p7 }
 0xe3d   : > { %v2354_v15 = vpop.f32.mrb[42].mxu0  ;;  %v3545_v44 = vld [vmem:[%s5069_s5 + $0x8] sm:$0xff]   ;;  %v3546_v59 = vld [vmem:[%s5069_s5 + $0x10] sm:$0xff]   ;;  %v3547_v60 = vld [vmem:[%s5069_s5 + $0x18] sm:$0xff]  }
 0xe3e   : > { %v3276_v16 = vpop.f32.mrb[43].mxu0  ;;  %p3978_p12 = pneg %p3977_p9 }
 0xe40   : > { %p3985_p8 = pnand %p3984_p4, %p3978_p12 }
 0xe67   : > { %v2461_v19 = vpop.f32.mrb[44].mxu0 }
 0xe68   : > { %2476 = vrot.lane.b32.xlu1 %v2461_v19, %s4110_s22  ;;  %v3287_v20 = vpop.f32.mrb[45].mxu0  ;;  %s3057_s22 = sld [smem:[#allocation28 + $0x100]] }
 0xe69   : > { %v2464_v21 = vpop.f32.mrb[46].mxu0 }
 0xe6a   : > { %v3288_v22 = vpop.f32.mrb[47].mxu0 }
 0xe6e   : > { %v2557_v52 = vstv %s3057_s22  ;;  %s3070_s22 = sshll.u32 %s4077_s30, 7  ;;  %s2727_s30 = scalar_lea.sflag [#allocation8], %s979_s10 }
 0xe6f   : > { %s4914_s1 = scalar_lea.hbm %s5074_s23, %s3070_s22 }
 0xea6   : > { %v2469_v23 = vpop.permute.xlu1 %2468 }
 0xea7   : > { %v2479_v0 = vsel %vm1401_vm7, %v2124_v2, %v2469_v23 }
 0xeae   : > { %v2473_v24 = vpop.permute.xlu0 %2472 }
 0xeaf   : > { %v2480_v25 = vsel %vm1857_vm9, %v2479_v0, %v2473_v24 }
 0xeda   : > { %v2477_v26 = vpop.permute.xlu1 %2476 }
 0xedb   : > { %v2481_v27 = vsel %vm1859_vm10, %v2480_v25, %v2477_v26 }
 0xedc   : > { %v2482_v12 = vpack.c.bf16 %v2481_v27, %v2481_v27 }
 0xede   : > { %3294 = vmatmul.mubr.msk.bf16.vlgmr.msra.gmra.mrb[44].mxu1 %vm998_vm0, %v2482_v12 }
 0xedf   : > { %3313 = vmatprep.mubr.msk.bf16.mxu1 %vm4104_vm1, %v4103_v14  ;;  %3306 = vmatpush3.bf16.msra.mxu1 %v3544_v43 }
 0xee0   : > { %3307 = vmatprep.subr.bf16.mxu1 %v4103_v14 }
 0xee3   : > { %3308 = vmatpush3.bf16.msra.mxu1 %v3545_v44 }
 0xee4   : > { %3309 = vmatprep.subr.bf16.mxu1 %v4103_v14 }
 0xee7   : > { %3310 = vmatpush3.bf16.msra.mxu1 %v3546_v59 }
 0xee8   : > { %3311 = vmatprep.subr.bf16.mxu1 %v4103_v14 }
 0xeeb   : > { %3312 = vmatpush3.bf16.msra.mxu1 %v3547_v60 }
 0xfb1   : > { %v2538_v29 = vpop.f32.mrb[44].mxu1 }
 0xfb2   : > { %v2539_v30 = vadd.f32 %v3053_v28, %v2538_v29  ;;  %v3295_v31 = vpop.f32.mrb[45].mxu1 }
 0xfb3   : > { %v2541_v32 = vpop.f32.mrb[46].mxu1 }
 0xfb4   : > { %v4873_v33 = vadd.f32 %v2539_v30, %v4784_v17  ;;  %v3296_v34 = vpop.f32.mrb[47].mxu1  ;;  %v3543_v17 = vld [vmem:[%s4982_s20 + $0x8] sm:$0xff]  }
 0xfb5   : > { %3300 = vmatpush3.bf16.msra.mxu0 %v3543_v17 }
 0xfb6   : > { %v2547_v35 = vsel %vm998_vm0, %v4873_v33, 0.0 }
 0xfb7   : > { %2548 = vadd.xlane.f32.xlu0 %v2547_v35 }
0x1044   : > { %v2549_v36 = vpop.xlane.xlu0 %2548 }
0x1045   : > { %v2550_v37 = vmul.f32 0.03125, %v2549_v36 }
0x1047   : > { %v2551_v38 = vsub.f32 %v4873_v33, %v2550_v37 }
0x1049   : > { %v2552_v39 = vmul.f32 %v2551_v38, %v2551_v38  ;;  %v2558_v53 = vmul.f32 %v2557_v52, %v2551_v38 }
0x104b   : > { %v2553_v41 = vsel %vm998_vm0, %v2552_v39, 0.0 }
0x104c   : > { %2554 = vadd.xlane.f32.xlu1 %v2553_v41 }
0x10d9   : > { %v2555_v45 = vpop.xlane.xlu1 %2554 }
0x10da   : > { %v2556_v46 = vmul.f32 0.032258064, %v2555_v45 }
0x10dc   : > { %3592 = vrsqrt.f32 %v2556_v46  ;;  %vm2561_vm13 = vcmp.eq.f32.partialorder %v2556_v46, inf  ;;  %v2564_v48 = vand.u32 2147483648, %v2556_v46  ;;  %vm2563_vm14 = vcmp.eq.f32.partialorder %v2556_v46, 0.0 }
0x10e6   : > { %v3593_v40 = vpop.eup %3592 }
0x10e7   : > { %v2560_v47 = vmul.f32 %v3593_v40, %v2556_v46 }
0x10e9   : > { %v2562_v49 = vsel %vm2561_vm13, %v2556_v46, %v2560_v47 }
0x10ea   : > { %v2565_v50 = vsel %vm2563_vm14, %v2564_v48, %v2562_v49 }
0x10eb   : > { %v2566_v51 = vadd.f32 1e-06, %v2565_v50 }
0x10ed   : > { %3594 = vrcp.f32 %v2566_v51 }
0x10f7   : > { %v3595_v54 = vpop.eup %3594 }
0x10f8   : > { %v2568_v56 = vmul.f32 %v3595_v54, %v2558_v53 }
0x10fa   : > { %v2570_v57 = vadd.f32 %v2569_v55, %v2568_v56 }
0x10fc   : > { %v2571_v58 = vpack.c.bf16 %v2570_v57, %v2570_v57 }
0x10fe   : > { %3302 = vmatmul.mubr.msk.bf16.vlgmr.msra.gmra.mrb[48].mxu0 %vm998_vm0, %v2571_v58 }
0x11d1   : > { %v2632_v62 = vpop.f32.mrb[48].mxu0 }
0x11d2   : > { %v2633_v63 = vadd.f32 %v3059_v61, %v2632_v62  ;;  %v3303_v1 = vpop.f32.mrb[49].mxu0 }
0x11d3   : > { %v2635_v2 = vpop.f32.mrb[50].mxu0 }
0x11d4   : > { %v2638_v3 = vmax.f32 %v2633_v63, 0.0  ;;  %v3304_v4 = vpop.f32.mrb[51].mxu0 }
0x11d6   : > { %v2639_v5 = vpack.c.bf16 %v2638_v3, %v2638_v3 }
0x11d8   : > { %3314 = vmatmul.mubr.msk.bf16.vlgmr.msra.gmra.mrb[48].mxu1 %vm2672_vm15, %v2639_v5 }
0x12ab   : > { %v2710_v14 = vpop.f32.mrb[48].mxu1 }
0x12ac   : > { %v2716_v7 = vadd.f32 %v2710_v14, %v4873_v33  ;;  %v3315_v8 = vpop.f32.mrb[49].mxu1 }
0x12ad   : > { %v2713_v9 = vpop.f32.mrb[50].mxu1 }
0x12ae   : > { %v2724_v10 = vadd.f32 %v3068_v6, %v2716_v7  ;;  %v3316_v11 = vpop.f32.mrb[51].mxu1 }
0x12b0   : > { %2725 = vst.msk [vmem:[%s981_s4] sm:$0xff] %vm998_vm0, %v2724_v10 }
0x12b1   : > { %3988 = shalt.err (!%p3985_p8)
}
0x12b2   : > { %s3989_s10 = scalar_lea.hbm %s4914_s1, 128  ;;  %s3993_s6 = scalar_lea.hbm %s5074_s23, 256 }
0x12b3   : > { %p3990_p10 = scmp.ne.s32.totalorder %s4914_s1, %s3989_s10  ;;  %p3994_p5 = scmp.lt.u32.totalorder %s4914_s1, %s5074_s23 }
0x12b4   : > { %p3995_p6 = scmp.lt.u32.totalorder %s3993_s6, %s3989_s10  ;;  %p3997_p1 = scmp.lt.u32.totalorder %s3989_s10, %s4914_s1 }
0x12b5   : > { %p3991_p11 = pnand %p3990_p10, %p5075_p7 }
0x12b6   : > { %p3996_p13 = por %p3995_p6, %p3994_p5 }
0x12b7   : > { %p3992_p3 = pneg %p3991_p11 }
0x12b8   : > { %p3998_p9 = por %p3997_p1, %p3996_p13 }
0x12ba   : > { %p3999_p12 = pnand %p3998_p9, %p3992_p3 }
0x12bc   : > { %4002 = shalt.err (!%p3999_p12)
}
0x12bd   : > { %3373 = dma.vmem_to_hbm [thread:$0]  (%p5075_p7), %s4916_s13, 128, %s4914_s1, %s2727_s30  }
0x12be PF: > { %s5076_s27 = sld [smem:[#allocation43_spill]]  ;;  %s5077_s15 = sld [smem:[#allocation39_spill]] }
0x12bf   : > { %s5078_s26 = sld [smem:[#allocation46_spill]] }
0x12c4   : > { %p3450_p0 = scmp.ge.s32.totalorder %s5076_s27, 2  ;;  %s2753_s29 = sand.u32 1, %s5077_s15  }
0x12c5   : > { %p5079_p2 = scmp.ne.s32.totalorder %s5078_s26, 0  ;;  %s2754_s21 = scalar_lea.sflag [#allocation8], %s2753_s29 }
0x12c7   : > { %p3419_p4 = pnand %p3450_p0, %p5079_p2 }
0x12c9   : > { %4060 = dma.done.wait (!%p3419_p4), %s2754_s21, 128  }
0x12ca   : > { %4062 = vsyncadd (!%p3419_p4), %s2754_s21, 4294967168  ;;  %s46_s3 = sadd.s32 1, %s5076_s27   ;;  %s5080_s29 = sld [smem:[#allocation40_spill]] }
0x12cb   : > { %p43_p8 = scmp.ge.s32.totalorder %s46_s3, 4   ;;  %s5081_s2 = sld [smem:[#allocation41_spill]] }
0x12cc   : > { %s5082_s6 = sld [smem:[#allocation47_spill]]  ;;  %s5083_s30 = sld [smem:[#allocation42_spill]] }
0x12cd   : > { %s5084_s7 = sld [smem:[#allocation44_spill]]  ;;  %45 = sbr.rel (!%p43_p8) target bundleno = 30 (0x1e), region = 223 }
0x12d4   :  { %2759 = vsyncpa [#allocation7], 1 }
0x12d5   :  { %2761 = vsyncpa [#allocation7 + $0x1], 1 }
0x12d6   :  { %2762 = vsyncpa [#allocation11], 1 }
0x12d7   :  { %2763 = vsyncpa [#allocation14], 1 }
0x12d8   :  { %2764 = vsyncpa [#allocation17], 1 }
0x12d9   :  { %2765 = vsyncpa [#allocation20], 1 }
0x12da   :  { %2766 = vsyncpa [#allocation23], 1 }
0x12db   :  { %2767 = vsyncpa [#allocation26], 1 }
0x12dc   :  { %2768 = vsyncpa [#allocation8], 1 }
0x12dd   :  { %2770 = vsyncpa [#allocation8 + $0x1], 1 }
0x12de   :  { %2771 = vsyncpa [#allocation9], 1 }
0x12df   :  { %2773 = vsyncpa [#allocation9 + $0x1], 1 }

// kernel: tpu_custom_call.1
= control target key start
LH: loop header
LB: loop body
LE: loop exit
PB: predicated region body
PF: predicated region fallthrough
CT: control target
= control target key end

     0   :  { %s4962_s0 = inlined_call_operand.vmem [shape: f32[2,8,32], index: 0, kind: input, shape index: {}]   ;;  %s4963_s1 = inlined_call_operand.vmem [shape: f32[2,8,32], index: 1, kind: input, shape index: {}]   ;;  %s4964_s2 = inlined_call_operand.hbm [shape: f32[8,8], index: 2, kind: input, shape index: {}]   ;;  %s4965_s3 = inlined_call_operand.hbm [shape: f32[8,8], index: 3, kind: input, shape index: {}]   ;;  %s4966_s4 = inlined_call_operand.vmem [shape: bf16[32,32], index: 4, kind: input, shape index: {}]   ;;  %s4967_s5 = inlined_call_operand.hbm [shape: f32[1,32], index: 5, kind: input, shape index: {}]   ;;  %s4968_s6 = inlined_call_operand.vmem [shape: bf16[32,32], index: 6, kind: input, shape index: {}]   ;;  %s4969_s7 = inlined_call_operand.hbm [shape: f32[1,32], index: 7, kind: input, shape index: {}]   ;;  %s4970_s8 = inlined_call_operand.hbm [shape: bf16[32,32], index: 8, kind: input, shape index: {}]   ;;  %s4971_s9 = inlined_call_operand.vmem [shape: f32[1,32], index: 9, kind: input, shape index: {}]   ;;  %s4972_s10 = inlined_call_operand.hbm [shape: bf16[32,32], index: 10, kind: input, shape index: {}]   ;;  %s4973_s11 = inlined_call_operand.hbm [shape: f32[1,32], index: 11, kind: input, shape index: {}]   ;;  %s4974_s12 = inlined_call_operand.vmem [shape: bf16[32,32], index: 12, kind: input, shape index: {}]   ;;  %s4975_s13 = inlined_call_operand.hbm [shape: f32[1,32], index: 13, kind: input, shape index: {}]   ;;  %s4976_s14 = inlined_call_operand.hbm [shape: bf16[32,32], index: 14, kind: input, shape index: {}]   ;;  %s4977_s15 = inlined_call_operand.hbm [shape: f32[1,32], index: 15, kind: input, shape index: {}]   ;;  %s4978_s16 = inlined_call_operand.vmem [shape: bf16[32,32], index: 16, kind: input, shape index: {}]   ;;  %s4979_s17 = inlined_call_operand.hbm [shape: f32[1,32], index: 17, kind: input, shape index: {}]   ;;  %s4980_s18 = inlined_call_operand.hbm [shape: bf16[32,32], index: 18, kind: input, shape index: {}]   ;;  %s4981_s19 = inlined_call_operand.hbm [shape: f32[1,32], index: 19, kind: input, shape index: {}]   ;;  %s4982_s20 = inlined_call_operand.vmem [shape: bf16[32,64], index: 20, kind: input, shape index: {}]   ;;  %s4983_s21 = inlined_call_operand.vmem [shape: f32[1,64], index: 21, kind: input, shape index: {}]   ;;  %s4984_s22 = inlined_call_operand.vmem [shape: bf16[64,32], index: 22, kind: input, shape index: {}]   ;;  %s4985_s23 = inlined_call_operand.vmem [shape: f32[1,32], index: 23, kind: input, shape index: {}]   ;;  %s4986_s24 = inlined_call_operand.vmem [shape: f32[3,2], index: 24, kind: input, shape index: {}]   ;;  %s4987_s25 = inlined_call_operand.hbm [shape: f32[2,8,32], index: 25, kind: output, shape index: {}]  }
   0x1   :  { %5018 = sst [smem:[#allocation48_spill]] %s4962_s0 }
   0x2   :  { %5019 = sst [smem:[#allocation49_spill]] %s4963_s1 }
   0x3   :  { %5020 = sst [smem:[#allocation50_spill]] %s4964_s2 }
   0x4   :  { %5021 = sst [smem:[#allocation51_spill]] %s4965_s3 }
   0x5   :  { %5022 = sst [smem:[#allocation52_spill]] %s4966_s4 }
   0x6   :  { %5023 = sst [smem:[#allocation53_spill]] %s4967_s5 }
   0x7   :  { %5024 = sst [smem:[#allocation54_spill]] %s4968_s6 }
   0x8   :  { %5025 = sst [smem:[#allocation55_spill]] %s4969_s7 }
   0x9   :  { %5026 = sst [smem:[#allocation56_spill]] %s4970_s8 }
   0xa   :  { %5027 = sst [smem:[#allocation57_spill]] %s4971_s9 }
   0xb   :  { %5028 = sst [smem:[#allocation58_spill]] %s4972_s10 }
   0xc   :  { %5029 = sst [smem:[#allocation59_spill]] %s4975_s13 }
   0xd   :  { %5030 = sst [smem:[#allocation60_spill]] %s4977_s15 }
   0xe   :  { %5031 = sst [smem:[#allocation61_spill]] %s4983_s21 }
   0xf   :  { %5032 = sst [smem:[#allocation62_spill]] %s4984_s22 }
  0x10   :  { %5033 = sst [smem:[#allocation63_spill]] %s4985_s23 }
  0x11   :  { %5034 = sst [smem:[#allocation64_spill]] %s4987_s25 }
  0x12   :  { %30 = vsyncpa [#allocation7], 0 }
  0x13   :  { %31 = vsyncpa [#allocation11], 0 }
  0x14   :  { %32 = vsyncpa [#allocation14], 0 }
  0x15   :  { %33 = vsyncpa [#allocation17], 0 }
  0x16   :  { %34 = vsyncpa [#allocation20], 0 }
  0x17   :  { %35 = vsyncpa [#allocation23], 0 }
  0x18   :  { %36 = vsyncpa [#allocation26], 0 }
  0x19   :  { %37 = vsyncpa [#allocation9], 0 }
  0x1a   :  { %38 = vsyncpa [#allocation8], 0 }
  0x1b   :  { %40 = vsyncpa [#allocation8 + $0x1], 0  ;;  %s4242_s29 = smov 0   ;;  %s4244_s2 = smov 0  }
  0x1c   :  { %s4246_s6 = smov 0   ;;  %s4248_s30 = smov 0  }
  0x1d   :  { %s4250_s7 = smov 0   ;;  %s4252_s3 = smov 0  }
  0x1e LB: > { %5035 = sst [smem:[#allocation39_spill]] %s4065_s29  ;;  %s2965_s26 = sadd.s32 4294967295, %s4085_s3   ;;  %s4085_s3 = sphi %s4252_s3, %s46_s3   ;;  %s4081_s7 = sphi %s4250_s7, %s5084_s7   ;;  %s4077_s30 = sphi %s4248_s30, %s5083_s30   ;;  %s4073_s6 = sphi %s4246_s6, %s5082_s6   ;;  %s4069_s2 = sphi %s4244_s2, %s5081_s2   ;;  %s4065_s29 = sphi %s4242_s29, %s5080_s29  }
  0x1f   : > { %5036 = sst [smem:[#allocation40_spill]] %s4069_s2  ;;  %s2966_s1 = sadd.s32 4294967294, %s4085_s3  }
  0x20   : > { %5037 = sst [smem:[#allocation41_spill]] %s4073_s6  ;;  %s58_s8 = sadd.s32 1, %s4081_s7 }
  0x21   : > { %5038 = sst [smem:[#allocation42_spill]] %s4081_s7  ;;  %s612_s27 = sadd.s32 1, %s4073_s6 }
  0x22   : > { %5039 = sst [smem:[#allocation43_spill]] %s4085_s3  ;;  %p60_p0 = scmp.ge.s32.totalorder %s58_s8, 2 }
  0x23   : > { %p622_p1 = scmp.ne.s32.totalorder %s4073_s6, %s4069_s2  ;;  %p623_p2 = scmp.eq.s32.totalorder %s2965_s26, 1 }
  0x24   : > { %p628_p3 = scmp.ne.s32.totalorder %s4069_s2, %s4065_s29  ;;  %s5086_s8 = smov (%p60_p0, %s58_s8), 0 }
  0x25   : > { %5040 = sst [smem:[#allocation44_spill]] %s5086_s8  ;;  %p4282_p4 = por %p623_p2, %p622_p1 }
  0x26   : > { %p629_p5 = scmp.eq.s32.totalorder %s2966_s1, 1  ;;  %s607_s28 = ssub.s32 %s4081_s7, %s5086_s8 }
  0x27   : > { %s5041_s4 = scalar_select %p4282_p4, 1, 0 }
  0x28   : > { %p2967_p6 = scmp.ge.s32.totalorder %s4085_s3, 1  ;;  %p610_p7 = scmp.eq.s32.totalorder %s607_s28, 0 }
  0x29   : > { %5042 = sst [smem:[#allocation45_spill]] %s5041_s4  ;;  %p4289_p8 = por %p629_p5, %p628_p3 }
  0x2a   : > { %p636_p9 = scmp.lt.s32.totalorder %s4085_s3, 3  ;;  %p4301_p11 = scmp.eq.s32.totalorder %s2965_s26, 0 }
  0x2b   : > { %s5043_s9 = scalar_select %p4289_p8, 1, 0 }
  0x2c   : > { %s4295_s5 = scalar_select %p610_p7, %s4073_s6, %s612_s27  }
  0x2d   : > { %5044 = sst [smem:[#allocation46_spill]] %s5043_s9  ;;  %p4297_p10 = pnand %p2967_p6, %p636_p9 }
  0x2e   : > { %5045 = sst [smem:[#allocation47_spill]] %s4295_s5  ;;  %s4087_s1 = smov [#allocation10]  }
  0x2f   : > { %s5046_s0 = scalar_select %p4297_p10, 1, 0 }
  0x30   : > { %s5047_s29 = scalar_select %p4301_p11, 1, 0 }
  0x31   : > { %p3375_p12 = pneg %p4297_p10  ;;  %s664_s28 = sshll.u32 %s4087_s1, 4  ;;  %s665_s28 = int_to_ptr.vmem [resolvable:$true] %s664_s28 }
  0x32   : > { %s4088_s8 = smov [#allocation13]   ;;  %s5049_s6 = sld [smem:[#allocation51_spill]] }
  0x33   : > { %s692_s7 = sshll.u32 %s4088_s8, 4  ;;  %p4309_p13 = pnand %p4301_p11, %p3375_p12  ;;  %s4313_s7 = int_to_ptr.vmem [resolvable:$true] %s692_s7 }
  0x35   : > { %p4323_p1 = pneg %p4309_p13 }
  0x38   : > { %s5050_s9 = smov %s5049_s6  ;;  %s3596_s3 = scalar_lea.hbm %s5049_s6, 128 }
  0x39   : > { %p3597_p0 = scmp.ne.s32.totalorder %s5050_s9, %s3596_s3  ;;  %p3603_p5 = scmp.lt.u32.totalorder %s3596_s3, %s5050_s9 }
  0x3b   : > { %p3599_p2 = pnand %p4323_p1, %p3597_p0 }
  0x3d   : > { %p3600_p3 = pneg %p3599_p2 }
  0x3f   : > { %p3605_p6 = pnand %p3603_p5, %p3600_p3 }
  0x41   : > { %3608 = shalt.err (!%p3605_p6)
}
  0x42   : > { %s3609_s6 = scalar_lea.vmem %s665_s28, 128  ;;  %p3617_p8 = scmp.lt.s32.totalorder %s665_s28, %s665_s28 }
  0x43   : > { %p3610_p7 = scmp.ne.s32.totalorder %s665_s28, %s3609_s6  ;;  %p3618_p4 = scmp.lt.s32.totalorder %s3609_s6, %s3609_s6 }
  0x45   : > { %p3612_p9 = pnand %p3610_p7, %p4323_p1  ;;  %p3619_p11 = por %p3618_p4, %p3617_p8 }
  0x47   : > { %p3613_p12 = pneg %p3612_p9 }
  0x49   : > { %p3620_p10 = pnand %p3619_p11, %p3613_p12 }
  0x4b   : > { %3623 = shalt.err (!%p3620_p10)
}
  0x4c   : > { %3381 = dma.hbm_to_vmem [thread:$0]  (!%p4309_p13), %s5050_s9, 128, %s665_s28, [#allocation11]  }
  0x4d   : > { %s5052_s5 = sld [smem:[#allocation55_spill]] }
  0x53   : > { %s3624_s26 = scalar_lea.hbm %s5052_s5, 16 }
  0x54   : > { %p3625_p0 = scmp.ne.s32.totalorder %s5052_s5, %s3624_s26  ;;  %p3631_p8 = scmp.lt.u32.totalorder %s3624_s26, %s5052_s5 }
  0x56   : > { %p3627_p2 = pnand %p3625_p0, %p4323_p1 }
  0x58   : > { %p3628_p4 = pneg %p3627_p2 }
  0x5a   : > { %p3633_p10 = pnand %p3631_p8, %p3628_p4 }
  0x5c   : > { %3636 = shalt.err (!%p3633_p10)
}
  0x5d   : > { %s3637_s28 = scalar_lea.vmem %s4313_s7, 16  ;;  %s3644_s21 = scalar_lea.vmem %s4313_s7, 32 }
  0x5e   : > { %p3638_p11 = scmp.ne.s32.totalorder %s4313_s7, %s3637_s28  ;;  %p3645_p6 = scmp.lt.s32.totalorder %s4313_s7, %s4313_s7 }
  0x5f   : > { %p3646_p7 = scmp.lt.s32.totalorder %s3644_s21, %s3637_s28 }
  0x60   : > { %p3640_p3 = pnand %p3638_p11, %p4323_p1 }
  0x61   : > { %p3647_p9 = por %p3646_p7, %p3645_p6 }
  0x62   : > { %p3641_p5 = pneg %p3640_p3 }
  0x64   : > { %p3648_p12 = pnand %p3647_p9, %p3641_p5 }
  0x66   : > { %3651 = shalt.err (!%p3648_p12)
}
  0x67   : > { %3387 = dma.hbm_to_vmem [thread:$0]  (!%p4309_p13), %s5052_s5, 16, %s4313_s7, [#allocation14]  }
  0x68   : > { %s4089_s4 = smov [#allocation16]   ;;  %s4090_s3 = smov [#allocation19]  }
  0x69   : > { %s718_s23 = sshll.u32 %s4089_s4, 4  ;;  %s746_s26 = sshll.u32 %s4090_s3, 4  ;;  %s719_s23 = int_to_ptr.vmem [resolvable:$true] %s718_s23  ;;  %s747_s26 = int_to_ptr.vmem [resolvable:$true] %s746_s26 }
  0x6a   : > { %s5053_s10 = sld [smem:[#allocation58_spill]] }
  0x70   : > { %s3652_s28 = scalar_lea.hbm %s5053_s10, 256 }
  0x71   : > { %p3653_p0 = scmp.ne.s32.totalorder %s5053_s10, %s3652_s28  ;;  %p3659_p8 = scmp.lt.u32.totalorder %s3652_s28, %s5053_s10 }
  0x73   : > { %p3655_p2 = pnand %p3653_p0, %p4323_p1 }
  0x75   : > { %p3656_p4 = pneg %p3655_p2 }
  0x77   : > { %p3661_p10 = pnand %p3659_p8, %p3656_p4 }
  0x79   : > { %3664 = shalt.err (!%p3661_p10)
}
  0x7a   : > { %s3665_s7 = scalar_lea.vmem %s719_s23, 256  ;;  %p3673_p6 = scmp.lt.s32.totalorder %s719_s23, %s719_s23 }
  0x7b   : > { %p3666_p11 = scmp.ne.s32.totalorder %s719_s23, %s3665_s7  ;;  %p3674_p7 = scmp.lt.s32.totalorder %s3665_s7, %s3665_s7 }
  0x7d   : > { %p3668_p3 = pnand %p3666_p11, %p4323_p1  ;;  %p3675_p9 = por %p3674_p7, %p3673_p6 }
  0x7f   : > { %p3669_p5 = pneg %p3668_p3 }
  0x81   : > { %p3676_p12 = pnand %p3675_p9, %p3669_p5 }
  0x83   : > { %3679 = shalt.err (!%p3676_p12)
}
  0x84   : > { %s5012_s9 = smov 64   ;;  %s5014_s25 = smov 4  }
  0x85   : > { %3393 = dma.hbm_to_vmem [thread:$0]  (!%p4309_p13), %s5053_s10, 256, %s719_s23, [#allocation17], %s5012_s9, %s5012_s9, %s5014_s25  }
  0x86   : > { %s5054_s13 = sld [smem:[#allocation59_spill]] }
  0x8c   : > { %s3680_s6 = scalar_lea.hbm %s5054_s13, 16 }
  0x8d   : > { %p3681_p0 = scmp.ne.s32.totalorder %s5054_s13, %s3680_s6  ;;  %p3687_p8 = scmp.lt.u32.totalorder %s3680_s6, %s5054_s13 }
  0x8f   : > { %p3683_p2 = pnand %p3681_p0, %p4323_p1 }
  0x91   : > { %p3684_p4 = pneg %p3683_p2 }
  0x93   : > { %p3689_p10 = pnand %p3687_p8, %p3684_p4 }
  0x95   : > { %3692 = shalt.err (!%p3689_p10)
}
  0x96   : > { %s3693_s22 = scalar_lea.vmem %s747_s26, 16  ;;  %s3700_s23 = scalar_lea.vmem %s747_s26, 32 }
  0x97   : > { %p3694_p11 = scmp.ne.s32.totalorder %s747_s26, %s3693_s22  ;;  %p3701_p6 = scmp.lt.s32.totalorder %s747_s26, %s747_s26 }
  0x98   : > { %p3702_p7 = scmp.lt.s32.totalorder %s3700_s23, %s3693_s22 }
  0x99   : > { %p3696_p3 = pnand %p3694_p11, %p4323_p1 }
  0x9a   : > { %p3703_p9 = por %p3702_p7, %p3701_p6 }
  0x9b   : > { %p3697_p5 = pneg %p3696_p3 }
  0x9d   : > { %p3704_p12 = pnand %p3703_p9, %p3697_p5 }
  0x9f   : > { %3707 = shalt.err (!%p3704_p12)
}
  0xa0   : > { %3399 = dma.hbm_to_vmem [thread:$0]  (!%p4309_p13), %s5054_s13, 16, %s747_s26, [#allocation20]  }
  0xa1   : > { %s4093_s8 = smov [#allocation22]   ;;  %s4094_s28 = smov [#allocation25]  }
  0xa2   : > { %s770_s6 = sshll.u32 %s4093_s8, 4  ;;  %s794_s21 = sshll.u32 %s4094_s28, 4  ;;  %s771_s6 = int_to_ptr.vmem [resolvable:$true] %s770_s6  ;;  %s795_s21 = int_to_ptr.vmem [resolvable:$true] %s794_s21 }
  0xa3   : > { %s5055_s15 = sld [smem:[#allocation60_spill]] }
  0xa9   : > { %s3708_s9 = scalar_lea.hbm %s5055_s15, 16 }
  0xaa   : > { %p3709_p0 = scmp.ne.s32.totalorder %s5055_s15, %s3708_s9  ;;  %p3715_p8 = scmp.lt.u32.totalorder %s3708_s9, %s5055_s15 }
  0xac   : > { %p3711_p2 = pnand %p3709_p0, %p4323_p1 }
  0xae   : > { %p3712_p4 = pneg %p3711_p2 }
  0xb0   : > { %p3717_p10 = pnand %p3715_p8, %p3712_p4 }
  0xb2   : > { %3720 = shalt.err (!%p3717_p10)
}
  0xb3   : > { %s3721_s26 = scalar_lea.vmem %s771_s6, 16  ;;  %s3728_s3 = scalar_lea.vmem %s771_s6, 32 }
  0xb4   : > { %p3722_p11 = scmp.ne.s32.totalorder %s771_s6, %s3721_s26  ;;  %p3729_p6 = scmp.lt.s32.totalorder %s771_s6, %s771_s6 }
  0xb5   : > { %p3730_p7 = scmp.lt.s32.totalorder %s3728_s3, %s3721_s26 }
  0xb6   : > { %p3724_p3 = pnand %p3722_p11, %p4323_p1 }
  0xb7   : > { %p3731_p9 = por %p3730_p7, %p3729_p6 }
  0xb8   : > { %p3725_p5 = pneg %p3724_p3 }
  0xba   : > { %p3732_p12 = pnand %p3731_p9, %p3725_p5 }
  0xbc   : > { %3735 = shalt.err (!%p3732_p12)
}
  0xbd   : > { %3405 = dma.hbm_to_vmem [thread:$0]  (!%p4309_p13), %s5055_s15, 16, %s771_s6, [#allocation23]  }
  0xbe   : > { %s3736_s2 = scalar_lea.hbm %s4980_s18, 256 }
  0xbf   : > { %p3737_p0 = scmp.ne.s32.totalorder %s4980_s18, %s3736_s2  ;;  %p3743_p8 = scmp.lt.u32.totalorder %s3736_s2, %s4980_s18 }
  0xc1   : > { %p3739_p2 = pnand %p3737_p0, %p4323_p1 }
  0xc3   : > { %p3740_p4 = pneg %p3739_p2 }
  0xc5   : > { %p3745_p10 = pnand %p3743_p8, %p3740_p4 }
  0xc7   : > { %3748 = shalt.err (!%p3745_p10)
}
  0xc8   : > { %s3749_s26 = scalar_lea.vmem %s795_s21, 256  ;;  %p3757_p6 = scmp.lt.s32.totalorder %s795_s21, %s795_s21 }
  0xc9   : > { %p3750_p11 = scmp.ne.s32.totalorder %s795_s21, %s3749_s26  ;;  %p3758_p7 = scmp.lt.s32.totalorder %s3749_s26, %s3749_s26 }
  0xcb   : > { %p3752_p3 = pnand %p3750_p11, %p4323_p1  ;;  %p3759_p9 = por %p3758_p7, %p3757_p6 }
  0xcd   : > { %p3753_p5 = pneg %p3752_p3 }
  0xcf   : > { %p3760_p12 = pnand %p3759_p9, %p3753_p5 }
  0xd1   : > { %3763 = shalt.err (!%p3760_p12)
}
  0xd2   : > { %s5056_s6 = smov 4   ;;  %s5057_s3 = smov 64  }
  0xd3   : > { %3411 = dma.hbm_to_vmem [thread:$0]  (!%p4309_p13), %s4980_s18, 256, %s795_s21, [#allocation26], %s5057_s3, %s5057_s3, %s5056_s6  }
  0xd4   : > { %s4095_s9 = smov [#allocation6]   ;;  %s4096_s2 = smov [#allocation12]  }
  0xd5   : > { %s651_s25 = sshll.u32 %s4095_s9, 4  ;;  %s678_s7 = sshll.u32 %s4096_s2, 4  ;;  %s652_s25 = int_to_ptr.vmem [resolvable:$true] %s651_s25  ;;  %s679_s7 = int_to_ptr.vmem [resolvable:$true] %s678_s7 }
  0xd6   : > { %s5058_s4 = sld [smem:[#allocation50_spill]] }
  0xdc   : > { %s3764_s26 = scalar_lea.hbm %s5058_s4, 128 }
  0xdd   : > { %p3765_p0 = scmp.ne.s32.totalorder %s5058_s4, %s3764_s26  ;;  %p3771_p8 = scmp.lt.u32.totalorder %s3764_s26, %s5058_s4 }
  0xdf   : > { %p3767_p2 = pnand %p3765_p0, %p4323_p1 }
  0xe1   : > { %p3768_p4 = pneg %p3767_p2 }
  0xe3   : > { %p3773_p10 = pnand %p3771_p8, %p3768_p4 }
  0xe5   : > { %3776 = shalt.err (!%p3773_p10)
}
  0xe6   : > { %s3777_s21 = scalar_lea.vmem %s652_s25, 128  ;;  %p3785_p6 = scmp.lt.s32.totalorder %s652_s25, %s652_s25 }
  0xe7   : > { %p3778_p11 = scmp.ne.s32.totalorder %s652_s25, %s3777_s21  ;;  %p3786_p7 = scmp.lt.s32.totalorder %s3777_s21, %s3777_s21 }
  0xe9   : > { %p3780_p3 = pnand %p3778_p11, %p4323_p1  ;;  %p3787_p9 = por %p3786_p7, %p3785_p6 }
  0xeb   : > { %p3781_p5 = pneg %p3780_p3 }
  0xed   : > { %p3788_p12 = pnand %p3787_p9, %p3781_p5 }
  0xef   : > { %3791 = shalt.err (!%p3788_p12)
}
  0xf0   : > { %3378 = dma.hbm_to_vmem [thread:$0]  (!%p4309_p13), %s5058_s4, 128, %s652_s25, [#allocation7]  }
  0xf1   : > { %s5059_s9 = sld [smem:[#allocation53_spill]] }
  0xf7   : > { %s3792_s2 = scalar_lea.hbm %s5059_s9, 16 }
  0xf8   : > { %p3793_p0 = scmp.ne.s32.totalorder %s5059_s9, %s3792_s2  ;;  %p3799_p8 = scmp.lt.u32.totalorder %s3792_s2, %s5059_s9 }
  0xfa   : > { %p3795_p2 = pnand %p3793_p0, %p4323_p1 }
  0xfc   : > { %p3796_p4 = pneg %p3795_p2 }
  0xfe   : > { %p3801_p10 = pnand %p3799_p8, %p3796_p4 }
 0x100   : > { %3804 = shalt.err (!%p3801_p10)
}
 0x101   : > { %s3805_s21 = scalar_lea.vmem %s679_s7, 16  ;;  %s3812_s25 = scalar_lea.vmem %s679_s7, 32 }
 0x102   : > { %p3806_p11 = scmp.ne.s32.totalorder %s679_s7, %s3805_s21  ;;  %p3813_p6 = scmp.lt.s32.totalorder %s679_s7, %s679_s7 }
 0x103   : > { %p3814_p7 = scmp.lt.s32.totalorder %s3812_s25, %s3805_s21 }
 0x104   : > { %p3808_p3 = pnand %p3806_p11, %p4323_p1 }
 0x105   : > { %p3815_p9 = por %p3814_p7, %p3813_p6 }
 0x106   : > { %p3809_p5 = pneg %p3808_p3 }
 0x108   : > { %p3816_p12 = pnand %p3815_p9, %p3809_p5 }
 0x10a   : > { %3819 = shalt.err (!%p3816_p12)
}
 0x10b   : > { %3384 = dma.hbm_to_vmem [thread:$0]  (!%p4309_p13), %s5059_s9, 16, %s679_s7, [#allocation11]  }
 0x10c   : > { %s4097_s13 = smov [#allocation15]   ;;  %s4098_s2 = smov [#allocation18]  }
 0x10d   : > { %s702_s28 = sshll.u32 %s4097_s13, 4  ;;  %s732_s22 = sshll.u32 %s4098_s2, 4  ;;  %s703_s28 = int_to_ptr.vmem [resolvable:$true] %s702_s28  ;;  %s733_s22 = int_to_ptr.vmem [resolvable:$true] %s732_s22 }
 0x10e   : > { %s5060_s8 = sld [smem:[#allocation56_spill]] }
 0x114   : > { %s3820_s4 = scalar_lea.hbm %s5060_s8, 256 }
 0x115   : > { %p3821_p0 = scmp.ne.s32.totalorder %s5060_s8, %s3820_s4  ;;  %p3827_p8 = scmp.lt.u32.totalorder %s3820_s4, %s5060_s8 }
 0x117   : > { %p3823_p2 = pnand %p3821_p0, %p4323_p1 }
 0x119   : > { %p3824_p4 = pneg %p3823_p2 }
 0x11b   : > { %p3829_p10 = pnand %p3827_p8, %p3824_p4 }
 0x11d   : > { %3832 = shalt.err (!%p3829_p10)
}
 0x11e   : > { %s3833_s7 = scalar_lea.vmem %s703_s28, 256  ;;  %p3841_p6 = scmp.lt.s32.totalorder %s703_s28, %s703_s28 }
 0x11f   : > { %p3834_p11 = scmp.ne.s32.totalorder %s703_s28, %s3833_s7  ;;  %p3842_p7 = scmp.lt.s32.totalorder %s3833_s7, %s3833_s7 }
 0x121   : > { %p3836_p3 = pnand %p3834_p11, %p4323_p1  ;;  %p3843_p9 = por %p3842_p7, %p3841_p6 }
 0x123   : > { %p3837_p5 = pneg %p3836_p3 }
 0x125   : > { %p3844_p12 = pnand %p3843_p9, %p3837_p5 }
 0x127   : > { %3847 = shalt.err (!%p3844_p12)
}
 0x128   : > { %3390 = dma.hbm_to_vmem [thread:$0]  (!%p4309_p13), %s5060_s8, 256, %s703_s28, [#allocation14], %s5057_s3, %s5057_s3, %s5056_s6  }
 0x129   : > { %s3848_s2 = scalar_lea.hbm %s4973_s11, 16 }
 0x12a   : > { %p3849_p0 = scmp.ne.s32.totalorder %s4973_s11, %s3848_s2  ;;  %p3855_p8 = scmp.lt.u32.totalorder %s3848_s2, %s4973_s11 }
 0x12c   : > { %p3851_p2 = pnand %p3849_p0, %p4323_p1 }
 0x12e   : > { %p3852_p4 = pneg %p3851_p2 }
 0x130   : > { %p3857_p10 = pnand %p3855_p8, %p3852_p4 }
 0x132   : > { %3860 = shalt.err (!%p3857_p10)
}
 0x133   : > { %s3861_s10 = scalar_lea.vmem %s733_s22, 16  ;;  %s3868_s28 = scalar_lea.vmem %s733_s22, 32 }
 0x134   : > { %p3862_p11 = scmp.ne.s32.totalorder %s733_s22, %s3861_s10  ;;  %p3869_p6 = scmp.lt.s32.totalorder %s733_s22, %s733_s22 }
 0x135   : > { %p3870_p7 = scmp.lt.s32.totalorder %s3868_s28, %s3861_s10 }
 0x136   : > { %p3864_p3 = pnand %p3862_p11, %p4323_p1 }
 0x137   : > { %p3871_p9 = por %p3870_p7, %p3869_p6 }
 0x138   : > { %p3865_p5 = pneg %p3864_p3 }
 0x13a   : > { %p3872_p12 = pnand %p3871_p9, %p3865_p5 }
 0x13c   : > { %3875 = shalt.err (!%p3872_p12)
}
 0x13d   : > { %3396 = dma.hbm_to_vmem [thread:$0]  (!%p4309_p13), %s4973_s11, 16, %s733_s22, [#allocation17]  }
 0x13e   : > { %s4099_s4 = smov [#allocation21]   ;;  %s4100_s13 = smov [#allocation24]  }
 0x13f   : > { %s756_s5 = sshll.u32 %s4099_s4, 4  ;;  %s784_s2 = sshll.u32 %s4100_s13, 4  ;;  %s757_s5 = int_to_ptr.vmem [resolvable:$true] %s756_s5  ;;  %s785_s2 = int_to_ptr.vmem [resolvable:$true] %s784_s2 }
 0x140   : > { %s3876_s21 = scalar_lea.hbm %s4976_s14, 256 }
 0x141   : > { %p3877_p0 = scmp.ne.s32.totalorder %s4976_s14, %s3876_s21  ;;  %p3883_p8 = scmp.lt.u32.totalorder %s3876_s21, %s4976_s14 }
 0x143   : > { %p3879_p2 = pnand %p3877_p0, %p4323_p1 }
 0x145   : > { %p3880_p4 = pneg %p3879_p2 }
 0x147   : > { %p3885_p10 = pnand %p3883_p8, %p3880_p4 }
 0x149   : > { %3888 = shalt.err (!%p3885_p10)
}
 0x14a   : > { %s3889_s22 = scalar_lea.vmem %s757_s5, 256  ;;  %p3897_p6 = scmp.lt.s32.totalorder %s757_s5, %s757_s5 }
 0x14b   : > { %p3890_p11 = scmp.ne.s32.totalorder %s757_s5, %s3889_s22  ;;  %p3898_p7 = scmp.lt.s32.totalorder %s3889_s22, %s3889_s22 }
 0x14d   : > { %p3892_p3 = pnand %p3890_p11, %p4323_p1  ;;  %p3899_p9 = por %p3898_p7, %p3897_p6 }
 0x14f   : > { %p3893_p5 = pneg %p3892_p3 }
 0x151   : > { %p3900_p12 = pnand %p3899_p9, %p3893_p5 }
 0x153   : > { %3903 = shalt.err (!%p3900_p12)
}
 0x154   : > { %3402 = dma.hbm_to_vmem [thread:$0]  (!%p4309_p13), %s4976_s14, 256, %s757_s5, [#allocation20], %s5057_s3, %s5057_s3, %s5056_s6  }
 0x155   : > { %s3904_s26 = scalar_lea.hbm %s4979_s17, 16 }
 0x156   : > { %p3905_p0 = scmp.ne.s32.totalorder %s4979_s17, %s3904_s26  ;;  %p3911_p8 = scmp.lt.u32.totalorder %s3904_s26, %s4979_s17 }
 0x158   : > { %p3907_p2 = pnand %p3905_p0, %p4323_p1 }
 0x15a   : > { %p3908_p4 = pneg %p3907_p2 }
 0x15c   : > { %p3913_p10 = pnand %p3911_p8, %p3908_p4 }
 0x15e   : > { %3916 = shalt.err (!%p3913_p10)
}
 0x15f   : > { %s3917_s7 = scalar_lea.vmem %s785_s2, 16  ;;  %s3924_s6 = scalar_lea.vmem %s785_s2, 32 }
 0x160   : > { %p3918_p11 = scmp.ne.s32.totalorder %s785_s2, %s3917_s7  ;;  %p3925_p6 = scmp.lt.s32.totalorder %s785_s2, %s785_s2 }
 0x161   : > { %p3926_p7 = scmp.lt.s32.totalorder %s3924_s6, %s3917_s7 }
 0x162   : > { %p3920_p3 = pnand %p3918_p11, %p4323_p1 }
 0x163   : > { %p3927_p9 = por %p3926_p7, %p3925_p6 }
 0x164   : > { %p3921_p5 = pneg %p3920_p3 }
 0x166   : > { %p3928_p12 = pnand %p3927_p9, %p3921_p5 }
 0x168   : > { %3931 = shalt.err (!%p3928_p12)
}
 0x169   : > { %3408 = dma.hbm_to_vmem [thread:$0]  (!%p4309_p13), %s4979_s17, 16, %s785_s2, [#allocation23]  }
 0x16a   : > { %s4101_s22 = smov [#allocation27]   ;;  %s831_s23 = sshll.u32 %s4986_s24, 4  ;;  %s4558_s23 = int_to_ptr.vmem [resolvable:$true] %s831_s23 }
 0x16b   : > { %s808_s15 = sshll.u32 %s4101_s22, 4  ;;  %s3932_s25 = scalar_lea.hbm %s4981_s19, 16  ;;  %s809_s15 = int_to_ptr.vmem [resolvable:$true] %s808_s15 }
 0x16c   : > { %p3933_p0 = scmp.ne.s32.totalorder %s4981_s19, %s3932_s25  ;;  %p3939_p8 = scmp.lt.u32.totalorder %s3932_s25, %s4981_s19 }
 0x16e   : > { %p3935_p2 = pnand %p3933_p0, %p4323_p1 }
 0x170   : > { %p3936_p4 = pneg %p3935_p2 }
 0x172   : > { %p3941_p10 = pnand %p3939_p8, %p3936_p4 }
 0x174   : > { %3944 = shalt.err (!%p3941_p10)
}
 0x175   : > { %s3945_s6 = scalar_lea.vmem %s809_s15, 16  ;;  %s3952_s3 = scalar_lea.vmem %s809_s15, 32 }
 0x176   : > { %p3946_p11 = scmp.ne.s32.totalorder %s809_s15, %s3945_s6  ;;  %p3953_p6 = scmp.lt.s32.totalorder %s809_s15, %s809_s15 }
 0x177   : > { %p3954_p7 = scmp.lt.s32.totalorder %s3952_s3, %s3945_s6 }
 0x178   : > { %p3948_p3 = pnand %p3946_p11, %p4323_p1 }
 0x179   : > { %p3955_p9 = por %p3954_p7, %p3953_p6 }
 0x17a   : > { %p3949_p5 = pneg %p3948_p3 }
 0x17c   : > { %p3956_p12 = pnand %p3955_p9, %p3949_p5 }
 0x17e   : > { %3959 = shalt.err (!%p3956_p12)
}
 0x17f   : > { %3414 = dma.hbm_to_vmem [thread:$0]  (!%p4309_p13), %s4981_s19, 16, %s809_s15, [#allocation26]  }
 0x180   : > { %s3960_s4 = scalar_lea.vmem %s4558_s23, 64  ;;  %p3968_p8 = scmp.lt.s32.totalorder %s4558_s23, %s4558_s23 }
 0x181   : > { %p3961_p0 = scmp.ne.s32.totalorder %s4558_s23, %s3960_s4  ;;  %p3969_p10 = scmp.lt.s32.totalorder %s3960_s4, %s3960_s4 }
 0x183   : > { %p3963_p2 = pnand %p3961_p0, %p4323_p1  ;;  %p3970_p11 = por %p3969_p10, %p3968_p8 }
 0x185   : > { %p3964_p4 = pneg %p3963_p2 }
 0x187   : > { %p3971_p3 = pnand %p3970_p11, %p3964_p4 }
 0x189   : > { %3974 = shalt.err (!%p3971_p3)
}
 0x18a   : > { %s4102_s13 = smov [#allocation28]   ;;  %p5061_p5 = scmp.ne.s32.totalorder %s5046_s0, 0 }
 0x18b   : > { %3417 = dma.vmem_to_smem (!%p4309_p13), %s4558_s23, 64, %s4102_s13, [#allocation9]  }
 0x18c   : > { %858 = sbr.rel (%p5061_p5) target bundleno = 4798 (0x12be), region = 120  ;;  %p5062_p6 = scmp.ne.s32.totalorder (!%p5061_p5), %s5047_s29, 0 }
 0x193   : > { %4028 = dma.done.wait (%p5062_p6), [#allocation7], 128  }
 0x194   : > { %4030 = vsyncadd (%p5062_p6), [#allocation7], 4294967168 }
 0x195   : > { %4032 = dma.done.wait (%p5062_p6), [#allocation11], 144  }
 0x196   : > { %4034 = vsyncadd (%p5062_p6), [#allocation11], 4294967152 }
 0x197   : > { %4036 = dma.done.wait (%p5062_p6), [#allocation14], 272  }
 0x198   : > { %4038 = vsyncadd (%p5062_p6), [#allocation14], 4294967024 }
 0x199   : > { %4040 = dma.done.wait (%p5062_p6), [#allocation17], 272  }
 0x19a   : > { %4042 = vsyncadd (%p5062_p6), [#allocation17], 4294967024 }
 0x19b   : > { %4044 = dma.done.wait (%p5062_p6), [#allocation20], 272  }
 0x19c   : > { %4046 = vsyncadd (%p5062_p6), [#allocation20], 4294967024 }
 0x19d   : > { %4048 = dma.done.wait (%p5062_p6), [#allocation23], 32  }
 0x19e   : > { %4050 = vsyncadd (%p5062_p6), [#allocation23], 4294967264 }
 0x19f   : > { %4052 = dma.done.wait (%p5062_p6), [#allocation26], 272  }
 0x1a0   : > { %4054 = vsyncadd (%p5062_p6), [#allocation26], 4294967024 }
 0x1a1   : > { %4056 = dma.done.wait (%p5062_p6), [#allocation9], 64  }
 0x1a2   : > { %4058 = vsyncadd (%p5062_p6), [#allocation9], 4294967232 }
 0x1a3   : > { %916 = sfence }
 0x1a4   : > { %p982_p13 = scmp.lt.s32.totalorder %s4077_s30, 1  ;;  %vm998_vm0 = vcmask 261120   ;;  %s5063_s23 = sld [smem:[#allocation48_spill]]  ;;  %v3524_v13 = vld [vmem:[#allocation15] sm:$0xff]   ;;  %v4103_v14 = vmov 0.0   ;;  %v3526_v16 = vld [vmem:[#allocation15 + $0x8] sm:$0xff]  }
 0x1a5   : > { %s5064_s25 = sld [smem:[#allocation54_spill]]  ;;  %3137 = vmatprep.subr.bf16.mxu0 %v4103_v14  ;;  %3145 = vmatprep.subr.bf16.mxu1 %v4103_v14  ;;  %vm4104_vm1 = vmmov 0   ;;  %s996_s2 = sld [smem:[#allocation28]]  ;;  %v3527_v39 = vld [vmem:[#allocation21] sm:$0xff]   ;;  %v3528_v42 = vld [vmem:[#allocation21 + $0x8] sm:$0xff]   ;;  %v3531_v51 = vld [vmem:[%s4978_s16] sm:$0xff]  }
 0x1a6   : > { %s4623_s0 = scalar_select %p982_p13, %s4077_s30, 1  ;;  %3146 = vmatpush3.bf16.msra.mxu1 %v3524_v13  ;;  %3141 = vmatprep.mubr.msk.bf16.mxu0 %vm4104_vm1, %v4103_v14  ;;  %v3532_v52 = vld [vmem:[%s4978_s16 + $0x8] sm:$0xff]   ;;  %v3002_v53 = vld [vmem:[#allocation13] ss:$0 sm:$0xff]  ;;  %vm1094_vm6 = vcmask 257024   ;;  %vm1401_vm7 = vcmask 64512  }
 0x1a7   : > { %3147 = vmatprep.subr.bf16.mxu1 %v4103_v14  ;;  %3149 = vmatprep.mubr.msk.bf16.mxu1 %vm4104_vm1, %v4103_v14  ;;  %s4659_s7 = sld [smem:[#allocation28 + $0x1]]  ;;  %s5065_s5 = sld [smem:[#allocation49_spill]]  ;;  %vm1463_vm8 = vcmask 1043456   ;;  %vm1857_vm9 = vcmask 130048   ;;  %vm1859_vm10 = vcmask 195584   ;;  %vm2672_vm15 = vcmask 523264  }
 0x1a8   : > { %s2999_s27 = sshll.u32 %s4623_s0, 3  ;;  %s5066_s0 = sld [smem:[#allocation52_spill]] }
 0x1a9   : > { %s5067_s28 = sld [smem:[#allocation57_spill]]  ;;  %s4107_s6 = smov 112  }
 0x1aa   : > { %s985_s26 = scalar_lea.vmem %s5063_s23, %s2999_s27  ;;  %3148 = vmatpush3.bf16.msra.mxu1 %v3526_v16  ;;  %s4108_s3 = smov 8  }
 0x1ab   : > { %v4631_v0 = vld [vmem:[%s985_s26] sm:$0xff]  ;;  %v3525_v15 = vld [vmem:[%s5064_s25 + $0x8] sm:$0xff]   ;;  %3161 = vmatprep.subr.bf16.mxu1 %v4103_v14  ;;  %v1010_v32 = vstv %s996_s2  ;;  %s4105_s2 = smov 120   ;;  %s3037_s15 = sld [smem:[#allocation28 + $0x80]] }
 0x1ac   : > { %v999_v1 = vsel %vm998_vm0, %v4631_v0, 0.0  ;;  %v3523_v12 = vld [vmem:[%s5064_s25] sm:$0xff]   ;;  %s3038_s23 = sld [smem:[#allocation28 + $0x81]]  ;;  %s5070_s1 = sld [smem:[#allocation40_spill]] }
 0x1ad   : > { %1000 = vadd.xlane.f32.xlu0 %v999_v1  ;;  %3138 = vmatpush3.bf16.msra.mxu0 %v3523_v12  ;;  %v1022_v36 = vstv %s4659_s7  ;;  %s989_s22 = scalar_lea.vmem %s5065_s5, %s2999_s27  ;;  %s4106_s7 = smov 104  }
 0x1ae   : > { %3139 = vmatprep.subr.bf16.mxu0 %v4103_v14  ;;  %v1025_v41 = vld [vmem:[%s989_s22] sm:$0xff]  ;;  %v3530_v48 = vld [vmem:[%s5066_s0 + $0x8] sm:$0xff]   ;;  %s4109_s5 = smov 16   ;;  %s4110_s22 = smov 24  }
 0x1af   : > { %v1026_v44 = vpack.c.bf16 %v1025_v41, %v1025_v41  ;;  %v3529_v46 = vld [vmem:[%s5066_s0] sm:$0xff]   ;;  %s3058_s4 = sld [smem:[#allocation28 + $0x101]]  ;;  %s5071_s21 = sld [smem:[#allocation61_spill]] }
 0x1b0   : > { %v3006_v54 = vld [vmem:[%s5067_s28] ss:$0 sm:$0xff]  ;;  %s4111_s29 = smov [#allocation29]  }
 0x1b1   : > { %1301 = vadd.xlane.f32.xlu0 %v999_v1  ;;  %3140 = vmatpush3.bf16.msra.mxu0 %v3525_v15 }
 0x1b2   : > { %3153 = vmatprep.subr.bf16.mxu0 %v4103_v14  ;;  %s979_s10 = sand.u32 1, %s5070_s1  }
 0x1b3   : > { %s2998_s28 = sshll.u32 %s979_s10, 3 }
 0x23a   : > { %v1001_v2 = vpop.xlane.xlu0 %1000 }
 0x23b   : > { %v1003_v3 = vmul.f32 0.03125, %v1001_v2 }
 0x23d   : > { %v1004_v4 = vsub.f32 %v4631_v0, %v1003_v3 }
 0x23e   : > { %v1302_v5 = vpop.xlane.xlu0 %1301 }
 0x23f   : > { %v1304_v6 = vmul.f32 0.03125, %v1302_v5  ;;  %v1005_v7 = vmul.f32 %v1004_v4, %v1004_v4  ;;  %v1011_v34 = vmul.f32 %v1010_v32, %v1004_v4  ;;  %v3010_v4 = vld [vmem:[#allocation22] ss:$0 sm:$0xff] }
 0x241   : > { %v4637_v8 = vsub.f32 %v4631_v0, %v1304_v6  ;;  %v1006_v9 = vsel %vm998_vm0, %v1005_v7, 0.0 }
 0x242   : > { %1007 = vadd.xlane.f32.xlu1 %v1006_v9 }
 0x243   : > { %v1306_v10 = vmul.f32 %v4637_v8, %v4637_v8  ;;  %v1312_v45 = vmul.f32 %v4637_v8, %v1010_v32 }
 0x245   : > { %v1307_v11 = vsel %vm998_vm0, %v1306_v10, 0.0 }
 0x246   : > { %1308 = vadd.xlane.f32.xlu1 %v1307_v11 }
 0x2cf   : > { %v1008_v17 = vpop.xlane.xlu1 %1007 }
 0x2d0   : > { %v1009_v18 = vmul.f32 0.032258064, %v1008_v17  ;;  %v3019_v17 = vld [vmem:[#allocation12] ss:$0 sm:$0xff] }
 0x2d2   : > { %3548 = vrsqrt.f32 %v1009_v18  ;;  %vm1014_vm2 = vcmp.eq.f32.partialorder %v1009_v18, inf  ;;  %v1017_v23 = vand.u32 2147483648, %v1009_v18  ;;  %vm1016_vm3 = vcmp.eq.f32.partialorder %v1009_v18, 0.0 }
 0x2d3   : > { %v1309_v19 = vpop.xlane.xlu1 %1308 }
 0x2d4   : > { %v1310_v20 = vmul.f32 0.032258064, %v1309_v19 }
 0x2d6   : > { %3550 = vrsqrt.f32 %v1310_v20  ;;  %vm1315_vm4 = vcmp.eq.f32.partialorder %v1310_v20, inf  ;;  %v1318_v29 = vand.u32 2147483648, %v1310_v20  ;;  %vm1317_vm5 = vcmp.eq.f32.partialorder %v1310_v20, 0.0 }
 0x2dc   : > { %v3549_v21 = vpop.eup %3548 }
 0x2dd   : > { %v1013_v22 = vmul.f32 %v3549_v21, %v1009_v18 }
 0x2df   : > { %v1015_v24 = vsel %vm1014_vm2, %v1009_v18, %v1013_v22 }
 0x2e0   : > { %v3551_v25 = vpop.eup %3550  ;;  %v1018_v26 = vsel %vm1016_vm3, %v1017_v23, %v1015_v24  ;;  %v3014_v24 = vld [vmem:[#allocation24] ss:$0 sm:$0xff] }
 0x2e1   : > { %v1019_v27 = vadd.f32 1e-06, %v1018_v26  ;;  %v1314_v28 = vmul.f32 %v3551_v25, %v1310_v20 }
 0x2e3   : > { %v1316_v30 = vsel %vm1315_vm4, %v1310_v20, %v1314_v28  ;;  %3552 = vrcp.f32 %v1019_v27 }
 0x2e4   : > { %v1319_v31 = vsel %vm1317_vm5, %v1318_v29, %v1316_v30 }
 0x2e5   : > { %v1320_v33 = vadd.f32 1e-06, %v1319_v31 }
 0x2e7   : > { %3554 = vrcp.f32 %v1320_v33 }
 0x2ed   : > { %v3553_v35 = vpop.eup %3552 }
 0x2ee   : > { %v1021_v37 = vmul.f32 %v3553_v35, %v1011_v34 }
 0x2f0   : > { %v1023_v38 = vadd.f32 %v1022_v36, %v1021_v37 }
 0x2f1   : > { %v3555_v43 = vpop.eup %3554 }
 0x2f2   : > { %v1024_v40 = vpack.c.bf16 %v1023_v38, %v1023_v38  ;;  %v1322_v47 = vmul.f32 %v3555_v43, %v1312_v45 }
 0x2f4   : > { %3142 = vmatmul.mubr.msk.bf16.vlgmr.msra.gmra.mrb[0].mxu0 %vm998_vm0, %v1024_v40  ;;  %3150 = vmatmul.mubr.msk.bf16.vlgmr.msra.gmra.mrb[0].mxu1 %vm998_vm0, %v1024_v40  ;;  %v1324_v49 = vadd.f32 %v1322_v47, %v1022_v36  ;;  %v1337_v40 = vld [vmem:[#allocation6] sm:$0xff] }
 0x2f5   : > { %3154 = vmatpush3.bf16.msra.mxu0 %v3527_v39  ;;  %3157 = vmatprep.mubr.msk.bf16.mxu0 %vm4104_vm1, %v4103_v14 }
 0x2f6   : > { %3155 = vmatprep.subr.bf16.mxu0 %v4103_v14  ;;  %3165 = vmatprep.mubr.msk.bf16.mxu1 %vm4104_vm1, %v4103_v14  ;;  %v1338_v50 = vpack.c.bf16 %v1324_v49, %v1324_v49 }
 0x2f7   : > { %3162 = vmatpush3.bf16.msra.mxu1 %v3531_v51 }
 0x2f8   : > { %3163 = vmatprep.subr.bf16.mxu1 %v4103_v14 }
 0x2f9   : > { %3156 = vmatpush3.bf16.msra.mxu0 %v3528_v42 }
 0x2fa   : > { %3169 = vmatprep.subr.bf16.mxu0 %v4103_v14 }
 0x2fb   : > { %3164 = vmatpush3.bf16.msra.mxu1 %v3532_v52 }
 0x2fc   : > { %3158 = vmatmul.mubr.msk.bf16.vlgmr.msra.gmra.mrb[4].mxu0 %vm998_vm0, %v1026_v44  ;;  %3177 = vmatprep.subr.bf16.mxu1 %v4103_v14 }
 0x2fd   : > { %3170 = vmatpush3.bf16.msra.mxu0 %v3529_v46  ;;  %3173 = vmatprep.mubr.msk.bf16.mxu0 %vm4104_vm1, %v4103_v14 }
 0x2fe   : > { %3171 = vmatprep.subr.bf16.mxu0 %v4103_v14  ;;  %3166 = vmatmul.mubr.msk.bf16.vlgmr.msra.gmra.mrb[4].mxu1 %vm998_vm0, %v1026_v44 }
 0x2ff   : > { %3179 = vmatprep.mubr.msk.bf16.mxu1 %vm4104_vm1, %v4103_v14 }
 0x301   : > { %3172 = vmatpush3.bf16.msra.mxu0 %v3530_v48 }
 0x302   : > { %3183 = vmatprep.subr.bf16.mxu0 %v4103_v14 }
 0x304   : > { %3174 = vmatmul.mubr.msk.bf16.vlgmr.msra.gmra.mrb[8].mxu0 %vm998_vm0, %v1338_v50 }
 0x305   : > { %3185 = vmatprep.mubr.msk.bf16.mxu0 %vm4104_vm1, %v4103_v14 }
 0x3c7   : > { %v1087_v55 = vpop.f32.mrb[0].mxu0  ;;  %v1153_v56 = vpop.f32.mrb[0].mxu1 }
 0x3c8   : > { %v1088_v57 = vadd.f32 %v3002_v53, %v1087_v55  ;;  %v1154_v58 = vadd.f32 %v3006_v54, %v1153_v56  ;;  %v3143_v59 = vpop.f32.mrb[1].mxu0  ;;  %v3151_v60 = vpop.f32.mrb[1].mxu1 }
 0x3c9   : > { %v1090_v61 = vpop.f32.mrb[2].mxu0  ;;  %v1156_v62 = vpop.f32.mrb[2].mxu1 }
 0x3ca   : > { %v1093_v63 = vpack.c.bf16 %v1088_v57, %v1088_v57  ;;  %v1159_v1 = vpack.c.bf16 %v1154_v58, %v1154_v58  ;;  %v3144_v2 = vpop.f32.mrb[3].mxu0  ;;  %v3152_v3 = vpop.f32.mrb[3].mxu1 }
 0x3cc   : > { %1095 = vst.msk [vmem:[#allocation2] sm:$0xf] %vm1094_vm6, %v1093_v63  ;;  %1160 = vst.msk [vmem:[#allocation3] sm:$0xf] %vm1094_vm6, %v1159_v1 }
 0x3cf   : > { %v1221_v5 = vpop.f32.mrb[4].mxu0 }
 0x3d0   : > { %v1222_v6 = vadd.f32 %v3010_v4, %v1221_v5  ;;  %v3159_v7 = vpop.f32.mrb[5].mxu0 }
 0x3d1   : > { %v1224_v8 = vpop.f32.mrb[6].mxu0  ;;  %v1286_v25 = vpop.f32.mrb[4].mxu1 }
 0x3d2   : > { %v1227_v9 = vpack.c.bf16 %v1222_v6, %v1222_v6  ;;  %v3160_v10 = vpop.f32.mrb[7].mxu0  ;;  %v1287_v26 = vadd.f32 %v3014_v24, %v1286_v25  ;;  %v3167_v27 = vpop.f32.mrb[5].mxu1 }
 0x3d3   : > { %v1325_v11 = vld [vmem:[#allocation2] sm:$0xf]  ;;  %v4706_v12 = vld [vmem:[#allocation3] sm:$0xf]  ;;  %v1289_v28 = vpop.f32.mrb[6].mxu1 }
 0x3d4   : > { %1228 = vst.msk [vmem:[#allocation4] sm:$0xf] %vm1094_vm6, %v1227_v9  ;;  %v1406_v13 = vsel %vm1401_vm7, %v1325_v11, 0  ;;  %v1465_v15 = vsel %vm1463_vm8, %v4706_v12, 0  ;;  %v3025_v16 = vcombine.low %v1325_v11, %v1325_v11  ;;  %v1292_v29 = vpack.c.bf16 %v1287_v26, %v1287_v26  ;;  %v3168_v30 = vpop.f32.mrb[7].mxu1 }
 0x3d5   : > { %3178 = vmatpush3.bf16.xpose.msra.mxu1 %v1406_v13  ;;  %3184 = vmatpush3.bf16.msra.mxu0 %v1465_v15 }
 0x3d6   : > { %1513 = vrot.lane.b32.xlu0 %v3025_v16, %s4105_s2  ;;  %3189 = vmatprep.subr.bf16.mxu1 %v4103_v14  ;;  %1293 = vst.msk [vmem:[#allocation5] sm:$0xf] %vm1094_vm6, %v1292_v29 }
 0x3d7   : > { %v1394_v18 = vpop.f32.mrb[8].mxu0  ;;  %3195 = vmatprep.subr.bf16.mxu0 %v4103_v14 }
 0x3d8   : > { %v1395_v19 = vadd.f32 %v3019_v17, %v1394_v18  ;;  %v3175_v20 = vpop.f32.mrb[9].mxu0 }
 0x3d9   : > { %v1397_v21 = vpop.f32.mrb[10].mxu0 }
 0x3da   : > { %v1400_v22 = vpack.c.bf16 %v1395_v19, %v1395_v19  ;;  %1736 = vrot.lane.b32.xlu0 %v3025_v16, %s4106_s7  ;;  %v3176_v23 = vpop.f32.mrb[11].mxu0  ;;  %v3027_v19 = vcombine.low %v4706_v12, %v4706_v12 }
 0x3dc   : > { %1508 = vrot.lane.b32.xlu1 %v1400_v22, %s4105_s2  ;;  %3180 = vmatmul.mubr.msk.bf16.vlgmr.msra.gmra.mrb[8].mxu1 %vm1401_vm7, %v1400_v22 }
 0x3dd   : > { %3191 = vmatprep.mubr.msk.bf16.mxu1 %vm4104_vm1, %v4103_v14 }
 0x3e0   : > { %1626 = vrot.lane.b32.xlu1 %v3025_v16, %s4107_s6 }
 0x3e4   : > { %1624 = vrot.lane.b32.xlu1 %v1400_v22, %s4107_s6 }
 0x3e8   : > { %1734 = vrot.lane.b32.xlu1 %v1400_v22, %s4106_s7 }
 0x448   : > { %v1514_v31 = vpop.permute.xlu0 %1513 }
 0x449   : > { %v1519_v32 = vsel %vm1401_vm7, %v1514_v31, 0 }
 0x44a   : > { %3190 = vmatpush3.bf16.xpose.msra.mxu1 %v1519_v32 }
 0x44b   : > { %3201 = vmatprep.subr.bf16.mxu1 %v4103_v14 }
 0x44c   : > { %v1737_v36 = vpop.permute.xlu0 %1736 }
 0x44d   : > { %v1742_v38 = vsel %vm1401_vm7, %v1737_v36, 0 }
 0x44e   : > { %v1509_v33 = vpop.permute.xlu1 %1508 }
 0x451   : > { %3192 = vmatmul.mubr.msk.bf16.vlgmr.msra.gmra.mrb[12].mxu1 %vm1401_vm7, %v1509_v33 }
 0x452   : > { %v1627_v34 = vpop.permute.xlu1 %1626  ;;  %3203 = vmatprep.mubr.msk.bf16.mxu1 %vm4104_vm1, %v4103_v14 }
 0x453   : > { %v1632_v35 = vsel %vm1401_vm7, %v1627_v34, 0 }
 0x454   : > { %3202 = vmatpush3.bf16.xpose.msra.mxu1 %v1632_v35 }
 0x455   : > { %3213 = vmatprep.subr.bf16.mxu1 %v4103_v14 }
 0x456   : > { %v1625_v37 = vpop.permute.xlu1 %1624 }
 0x45a   : > { %v1735_v39 = vpop.permute.xlu1 %1734 }
 0x45b   : > { %3204 = vmatmul.mubr.msk.bf16.vlgmr.msra.gmra.mrb[16].mxu1 %vm1401_vm7, %v1625_v37 }
 0x45c   : > { %3214 = vmatpush3.bf16.xpose.msra.mxu1 %v1742_v38  ;;  %3215 = vmatprep.mubr.msk.bf16.mxu1 %vm4104_vm1, %v4103_v14 }
 0x45d   : > { %3225 = vmatprep.subr.bf16.mxu1 %v4103_v14 }
 0x463   : > { %3216 = vmatmul.mubr.msk.bf16.vlgmr.msra.gmra.mrb[20].mxu1 %vm1401_vm7, %v1735_v39 }
 0x464   : > { %3229 = vmatprep.mubr.msk.bf16.mxu1 %vm4104_vm1, %v4103_v14 }
 0x4af   : > { %v1442_v41 = vpop.f32.mrb[8].mxu1 }
 0x4b0   : > { %v1443_v42 = vadd.f32 %v1442_v41, %v1337_v40  ;;  %v3181_v43 = vpop.f32.mrb[9].mxu1 }
 0x4b1   : > { %v1445_v44 = vpop.f32.mrb[10].mxu1 }
 0x4b2   : > { %v3182_v45 = vpop.f32.mrb[11].mxu1  ;;  %v1448_v46 = vsel %vm1401_vm7, %v1443_v42, -inf }
 0x4b3   : > { %1449 = vmax.xlane.f32.xlu0 %v1448_v46 }
 0x524   : > { %v1555_v47 = vpop.f32.mrb[12].mxu1 }
 0x525   : > { %v1556_v48 = vadd.f32 %v1555_v47, %v1337_v40  ;;  %v3193_v49 = vpop.f32.mrb[13].mxu1 }
 0x526   : > { %v1558_v50 = vpop.f32.mrb[14].mxu1 }
 0x527   : > { %v3194_v51 = vpop.f32.mrb[15].mxu1  ;;  %v1561_v52 = vsel %vm1401_vm7, %v1556_v48, -inf  ;;  %v3534_v50 = vld [vmem:[#allocation16] sm:$0xff]  }
 0x528   : > { %1562 = vmax.xlane.f32.xlu1 %v1561_v52  ;;  %3226 = vmatpush3.bf16.msra.mxu1 %v3534_v50  ;;  %v3535_v51 = vld [vmem:[#allocation16 + $0x8] sm:$0xff]  }
 0x529   : > { %3227 = vmatprep.subr.bf16.mxu1 %v4103_v14 }
 0x52c   : > { %3228 = vmatpush3.bf16.msra.mxu1 %v3535_v51 }
 0x52d   : > { %3241 = vmatprep.subr.bf16.mxu1 %v4103_v14 }
 0x52e   : > { %v1668_v53 = vpop.f32.mrb[16].mxu1 }
 0x52f   : > { %v1669_v54 = vadd.f32 %v1668_v53, %v1337_v40  ;;  %v3205_v55 = vpop.f32.mrb[17].mxu1 }
 0x530   : > { %v1671_v56 = vpop.f32.mrb[18].mxu1 }
 0x531   : > { %v3206_v57 = vpop.f32.mrb[19].mxu1  ;;  %v1674_v58 = vsel %vm1401_vm7, %v1669_v54, -inf }
 0x532   : > { %1675 = vmax.xlane.f32.xlu0 %v1674_v58 }
 0x536   : > { %v1778_v59 = vpop.f32.mrb[20].mxu1 }
 0x537   : > { %v1779_v60 = vadd.f32 %v1778_v59, %v1337_v40  ;;  %v3217_v61 = vpop.f32.mrb[21].mxu1 }
 0x538   : > { %v1781_v62 = vpop.f32.mrb[22].mxu1 }
 0x539   : > { %v3218_v63 = vpop.f32.mrb[23].mxu1  ;;  %v1784_v1 = vsel %vm1401_vm7, %v1779_v60, -inf }
 0x53a   : > { %1785 = vmax.xlane.f32.xlu0 %v1784_v1 }
 0x540   : > { %v1450_v2 = vpop.xlane.xlu0 %1449 }
 0x541   : > { %v1451_v3 = vsub.f32 %v1443_v42, %v1450_v2 }
 0x543   : > { %v1452_v4 = vmul.f32 1.442695, %v1451_v3 }
 0x545   : > { %3556 = vpow2.f32 %v1452_v4 }
 0x54f   : > { %v3557_v5 = vpop.eup %3556 }
 0x550   : > { %v1454_v6 = vsel %vm1401_vm7, %v3557_v5, 0.0 }
 0x551   : > { %1455 = vadd.xlane.f32.xlu0 %v1454_v6 }
 0x5b5   : > { %v1563_v7 = vpop.xlane.xlu1 %1562 }
 0x5b6   : > { %v1564_v8 = vsub.f32 %v1556_v48, %v1563_v7  ;;  %v1950_v7 = vld [vmem:[#allocation4] sm:$0xf] }
 0x5b8   : > { %v1565_v9 = vmul.f32 1.442695, %v1564_v8 }
 0x5ba   : > { %3558 = vpow2.f32 %v1565_v9  ;;  %v2030_v9 = vsel %vm1401_vm7, %v1950_v7, 0 }
 0x5bf   : > { %v1676_v10 = vpop.xlane.xlu0 %1675 }
 0x5c0   : > { %v1677_v11 = vsub.f32 %v1669_v54, %v1676_v10  ;;  %v3033_v10 = vld [vmem:[#allocation18] ss:$0 sm:$0xff] }
 0x5c2   : > { %v1678_v13 = vmul.f32 1.442695, %v1677_v11 }
 0x5c4   : > { %v3559_v15 = vpop.eup %3558  ;;  %3560 = vpow2.f32 %v1678_v13 }
 0x5c5   : > { %v1567_v16 = vsel %vm1401_vm7, %v3559_v15, 0.0 }
 0x5c6   : > { %1568 = vadd.xlane.f32.xlu1 %v1567_v16 }
 0x5c7   : > { %v1786_v20 = vpop.xlane.xlu0 %1785 }
 0x5c8   : > { %v1787_v22 = vsub.f32 %v1779_v60, %v1786_v20  ;;  %v3045_v20 = vcombine.low %v1950_v7, %v1950_v7 }
 0x5ca   : > { %v1788_v24 = vmul.f32 1.442695, %v1787_v22 }
 0x5ce   : > { %v3561_v17 = vpop.eup %3560 }
 0x5cf   : > { %v1680_v18 = vsel %vm1401_vm7, %v3561_v17, 0.0 }
 0x5d0   : > { %1681 = vadd.xlane.f32.xlu0 %v1680_v18 }
 0x5d7   : > { %1686 = vrot.lane.b32.xlu1 %v3027_v19, %s4107_s6 }
 0x5de   : > { %v1456_v21 = vpop.xlane.xlu0 %1455 }
 0x5df   : > { %3562 = vrcp.f32 %v1456_v21 }
 0x5e0   : > { %3564 = vpow2.f32 %v1788_v24 }
 0x5e6   : > { %1576 = vrot.lane.b32.xlu0 %v3027_v19, %s4105_s2 }
 0x5e9   : > { %v3563_v23 = vpop.eup %3562 }
 0x5ea   : > { %v1458_v25 = vmul.f32 %v3563_v23, %v3557_v5  ;;  %v3565_v27 = vpop.eup %3564 }
 0x5eb   : > { %v1790_v12 = vsel %vm1401_vm7, %v3565_v27, 0.0 }
 0x5ec   : > { %v1459_v26 = vpack.c.bf16 %v1458_v25, %v1458_v25  ;;  %v3537_v25 = vld [vmem:[%s4974_s12] sm:$0xff]  }
 0x5ee   : > { %3186 = vmatmul.mubr.msk.bf16.vlgmr.msra.gmra.mrb[12].mxu0 %vm1401_vm7, %v1459_v26  ;;  %v3538_v26 = vld [vmem:[%s4974_s12 + $0x8] sm:$0xff]  }
 0x5ef   : > { %3197 = vmatprep.mubr.msk.bf16.mxu0 %vm4104_vm1, %v4103_v14 }
 0x5fb   : > { %1791 = vadd.xlane.f32.xlu1 %v1790_v12 }
 0x60c   : > { %1796 = vrot.lane.b32.xlu1 %v3027_v19, %s4106_s7 }
 0x653   : > { %v1569_v28 = vpop.xlane.xlu1 %1568 }
 0x654   : > { %3566 = vrcp.f32 %v1569_v28 }
 0x657   : > { %v1687_v34 = vpop.permute.xlu1 %1686 }
 0x658   : > { %v1692_v36 = vsel %vm1463_vm8, %v1687_v34, 0  ;;  %v1936_v34 = vstv %s3037_s15 }
 0x65d   : > { %v1682_v29 = vpop.xlane.xlu0 %1681 }
 0x65e   : > { %v3567_v30 = vpop.eup %3566  ;;  %3568 = vrcp.f32 %v1682_v29 }
 0x65f   : > { %v1571_v31 = vmul.f32 %v3567_v30, %v3559_v15 }
 0x661   : > { %v1577_v32 = vpop.permute.xlu0 %1576  ;;  %v1572_v35 = vpack.c.bf16 %v1571_v31, %v1571_v31 }
 0x662   : > { %v1582_v33 = vsel %vm1463_vm8, %v1577_v32, 0 }
 0x663   : > { %3196 = vmatpush3.bf16.msra.mxu0 %v1582_v33 }
 0x664   : > { %3207 = vmatprep.subr.bf16.mxu0 %v4103_v14 }
 0x666   : > { %3198 = vmatmul.mubr.msk.bf16.vlgmr.msra.gmra.mrb[16].mxu0 %vm1401_vm7, %v1572_v35 }
 0x667   : > { %3208 = vmatpush3.bf16.msra.mxu0 %v1692_v36  ;;  %3209 = vmatprep.mubr.msk.bf16.mxu0 %vm4104_vm1, %v4103_v14 }
 0x668   : > { %v3569_v37 = vpop.eup %3568  ;;  %3219 = vmatprep.subr.bf16.mxu0 %v4103_v14 }
 0x669   : > { %v1684_v38 = vmul.f32 %v3569_v37, %v3561_v17  ;;  %v1948_v37 = vstv %s3038_s23  ;;  %s5074_s23 = sld [smem:[#allocation64_spill]] }
 0x66b   : > { %v1685_v39 = vpack.c.bf16 %v1684_v38, %v1684_v38 }
 0x66e   : > { %3210 = vmatmul.mubr.msk.bf16.vlgmr.msra.gmra.mrb[20].mxu0 %vm1401_vm7, %v1685_v39 }
 0x66f   : > { %3221 = vmatprep.mubr.msk.bf16.mxu0 %vm4104_vm1, %v4103_v14 }
 0x688   : > { %v1792_v40 = vpop.xlane.xlu1 %1791 }
 0x689   : > { %3570 = vrcp.f32 %v1792_v40  ;;  %v4801_v40 = vld [vmem:[#allocation5] sm:$0xf] }
 0x68c   : > { %v1797_v41 = vpop.permute.xlu1 %1796 }
 0x68d   : > { %v1802_v42 = vsel %vm1463_vm8, %v1797_v41, 0 }
 0x68e   : > { %3220 = vmatpush3.bf16.msra.mxu0 %v1802_v42  ;;  %v2088_v42 = vsel %vm1463_vm8, %v4801_v40, 0 }
 0x68f   : > { %3233 = vmatprep.subr.bf16.mxu0 %v4103_v14 }
 0x693   : > { %v3571_v43 = vpop.eup %3570 }
 0x694   : > { %v1794_v44 = vmul.f32 %v3571_v43, %v3565_v27  ;;  %v3039_v43 = vld [vmem:[#allocation19] ss:$0 sm:$0xff] }
 0x696   : > { %v1795_v45 = vpack.c.bf16 %v1794_v44, %v1794_v44 }
 0x698   : > { %3222 = vmatmul.mubr.msk.bf16.vlgmr.msra.gmra.mrb[24].mxu0 %vm1401_vm7, %v1795_v45 }
 0x699   : > { %3237 = vmatprep.mubr.msk.bf16.mxu0 %vm4104_vm1, %v4103_v14  ;;  %3234 = vmatpush3.bf16.msra.mxu0 %v3537_v25 }
 0x69a   : > { %3235 = vmatprep.subr.bf16.mxu0 %v4103_v14 }
 0x69d   : > { %3236 = vmatpush3.bf16.msra.mxu0 %v3538_v26 }
 0x69e   : > { %3247 = vmatprep.subr.bf16.mxu0 %v4103_v14 }
 0x6c1   : > { %v1501_v46 = vpop.f32.mrb[12].mxu0 }
 0x6c2   : > { %v3187_v47 = vpop.f32.mrb[13].mxu0 }
 0x6c3   : > { %v1504_v48 = vpop.f32.mrb[14].mxu0 }
 0x6c4   : > { %v3188_v49 = vpop.f32.mrb[15].mxu0 }
 0x739   : > { %v1618_v52 = vpop.f32.mrb[16].mxu0 }
 0x73a   : > { %1845 = vrot.lane.b32.xlu1 %v1618_v52, %s4108_s3  ;;  %v3199_v53 = vpop.f32.mrb[17].mxu0 }
 0x73b   : > { %v1621_v54 = vpop.f32.mrb[18].mxu0 }
 0x73c   : > { %v3200_v55 = vpop.f32.mrb[19].mxu0 }
 0x741   : > { %v1728_v56 = vpop.f32.mrb[20].mxu0 }
 0x742   : > { %1849 = vrot.lane.b32.xlu0 %v1728_v56, %s4109_s5  ;;  %v3211_v57 = vpop.f32.mrb[21].mxu0 }
 0x743   : > { %v1731_v58 = vpop.f32.mrb[22].mxu0 }
 0x744   : > { %v3212_v59 = vpop.f32.mrb[23].mxu0 }
 0x745   : > { %v1962_v59 = vld [vmem:[#allocation10] sm:$0xff] }
 0x76b   : > { %v1838_v60 = vpop.f32.mrb[24].mxu0 }
 0x76c   : > { %1853 = vrot.lane.b32.xlu1 %v1838_v60, %s4110_s22  ;;  %v3223_v61 = vpop.f32.mrb[25].mxu0 }
 0x76d   : > { %v1841_v62 = vpop.f32.mrb[26].mxu0 }
 0x76e   : > { %v3224_v63 = vpop.f32.mrb[27].mxu0 }
 0x7ac   : > { %v1846_v1 = vpop.permute.xlu1 %1845 }
 0x7ad   : > { %v1856_v3 = vsel %vm1401_vm7, %v1501_v46, %v1846_v1 }
 0x7b4   : > { %v1850_v2 = vpop.permute.xlu0 %1849 }
 0x7b5   : > { %v1858_v4 = vsel %vm1857_vm9, %v1856_v3, %v1850_v2 }
 0x7de   : > { %v1854_v5 = vpop.permute.xlu1 %1853 }
 0x7df   : > { %v1860_v6 = vsel %vm1859_vm10, %v1858_v4, %v1854_v5 }
 0x7e0   : > { %v1861_v8 = vpack.c.bf16 %v1860_v6, %v1860_v6 }
 0x7e2   : > { %3230 = vmatmul.mubr.msk.bf16.vlgmr.msra.gmra.mrb[24].mxu1 %vm998_vm0, %v1861_v8 }
 0x7e3   : > { %3242 = vmatpush3.bf16.xpose.msra.mxu1 %v2030_v9  ;;  %3243 = vmatprep.mubr.msk.bf16.mxu1 %vm4104_vm1, %v4103_v14 }
 0x7e4   : > { %3253 = vmatprep.subr.bf16.mxu1 %v4103_v14 }
 0x8b5   : > { %v1917_v11 = vpop.f32.mrb[24].mxu1 }
 0x8b6   : > { %v1918_v13 = vadd.f32 %v3033_v10, %v1917_v11  ;;  %v3231_v15 = vpop.f32.mrb[25].mxu1 }
 0x8b7   : > { %v1920_v16 = vpop.f32.mrb[26].mxu1 }
 0x8b8   : > { %v4784_v17 = vadd.f32 %v1918_v13, %v4631_v0  ;;  %v3232_v18 = vpop.f32.mrb[27].mxu1 }
 0x8ba   : > { %v1926_v19 = vsel %vm998_vm0, %v4784_v17, 0.0 }
 0x8bb   : > { %1927 = vadd.xlane.f32.xlu0 %v1926_v19 }
 0x8d1   : > { %2136 = vrot.lane.b32.xlu0 %v3045_v20, %s4105_s2 }
 0x8d5   : > { %2249 = vrot.lane.b32.xlu0 %v3045_v20, %s4107_s6 }
 0x8d9   : > { %2359 = vrot.lane.b32.xlu0 %v3045_v20, %s4106_s7 }
 0x948   : > { %v1928_v21 = vpop.xlane.xlu0 %1927 }
 0x949   : > { %v1929_v22 = vmul.f32 0.03125, %v1928_v21 }
 0x94b   : > { %v1930_v23 = vsub.f32 %v4784_v17, %v1929_v22 }
 0x94c   : > { %v2137_v47 = vpop.permute.xlu0 %2136 }
 0x94d   : > { %v1931_v24 = vmul.f32 %v1930_v23, %v1930_v23  ;;  %v1937_v35 = vmul.f32 %v1936_v34, %v1930_v23  ;;  %v2142_v51 = vsel %vm1401_vm7, %v2137_v47, 0 }
 0x94f   : > { %v1932_v0 = vsel %vm998_vm0, %v1931_v24, 0.0 }
 0x950   : > { %1933 = vadd.xlane.f32.xlu1 %v1932_v0  ;;  %v2250_v52 = vpop.permute.xlu0 %2249 }
 0x951   : > { %v2255_v54 = vsel %vm1401_vm7, %v2250_v52, 0 }
 0x954   : > { %v2360_v55 = vpop.permute.xlu0 %2359 }
 0x955   : > { %v2365_v57 = vsel %vm1401_vm7, %v2360_v55, 0 }
 0x9dd   : > { %v1934_v27 = vpop.xlane.xlu1 %1933 }
 0x9de   : > { %v1935_v12 = vmul.f32 0.032258064, %v1934_v27 }
 0x9e0   : > { %3572 = vrsqrt.f32 %v1935_v12  ;;  %vm1940_vm11 = vcmp.eq.f32.partialorder %v1935_v12, inf  ;;  %v1943_v30 = vand.u32 2147483648, %v1935_v12  ;;  %vm1942_vm12 = vcmp.eq.f32.partialorder %v1935_v12, 0.0 }
 0x9ea   : > { %v3573_v28 = vpop.eup %3572 }
 0x9eb   : > { %v1939_v29 = vmul.f32 %v3573_v28, %v1935_v12 }
 0x9ed   : > { %v1941_v31 = vsel %vm1940_vm11, %v1935_v12, %v1939_v29 }
 0x9ee   : > { %v1944_v32 = vsel %vm1942_vm12, %v1943_v30, %v1941_v31 }
 0x9ef   : > { %v1945_v33 = vadd.f32 1e-06, %v1944_v32 }
 0x9f1   : > { %3574 = vrcp.f32 %v1945_v33 }
 0x9fb   : > { %v3575_v36 = vpop.eup %3574 }
 0x9fc   : > { %v1947_v38 = vmul.f32 %v3575_v36, %v1937_v35 }
 0x9fe   : > { %v1949_v39 = vadd.f32 %v1948_v37, %v1947_v38  ;;  %v3047_v37 = vcombine.low %v4801_v40, %v4801_v40 }
 0xa00   : > { %v1963_v41 = vpack.c.bf16 %v1949_v39, %v1949_v39 }
 0xa02   : > { %3238 = vmatmul.mubr.msk.bf16.vlgmr.msra.gmra.mrb[28].mxu0 %vm998_vm0, %v1963_v41 }
 0xa03   : > { %3248 = vmatpush3.bf16.msra.mxu0 %v2088_v42  ;;  %3249 = vmatprep.mubr.msk.bf16.mxu0 %vm4104_vm1, %v4103_v14 }
 0xa04   : > { %3259 = vmatprep.subr.bf16.mxu0 %v4103_v14 }
 0xad5   : > { %v2019_v44 = vpop.f32.mrb[28].mxu0 }
 0xad6   : > { %v2020_v45 = vadd.f32 %v3039_v43, %v2019_v44  ;;  %v3239_v46 = vpop.f32.mrb[29].mxu0 }
 0xad7   : > { %v2022_v48 = vpop.f32.mrb[30].mxu0 }
 0xad8   : > { %v2025_v49 = vpack.c.bf16 %v2020_v45, %v2020_v45  ;;  %v3240_v50 = vpop.f32.mrb[31].mxu0 }
 0xada   : > { %2131 = vrot.lane.b32.xlu1 %v2025_v49, %s4105_s2  ;;  %3244 = vmatmul.mubr.msk.bf16.vlgmr.msra.gmra.mrb[28].mxu1 %vm1401_vm7, %v2025_v49 }
 0xadb   : > { %3254 = vmatpush3.bf16.xpose.msra.mxu1 %v2142_v51  ;;  %3255 = vmatprep.mubr.msk.bf16.mxu1 %vm4104_vm1, %v4103_v14 }
 0xadc   : > { %3265 = vmatprep.subr.bf16.mxu1 %v4103_v14 }
 0xade   : > { %2247 = vrot.lane.b32.xlu1 %v2025_v49, %s4107_s6 }
 0xae2   : > { %2357 = vrot.lane.b32.xlu1 %v2025_v49, %s4106_s7 }
 0xb4c   : > { %v2132_v53 = vpop.permute.xlu1 %2131 }
 0xb4d   : > { %3256 = vmatmul.mubr.msk.bf16.vlgmr.msra.gmra.mrb[32].mxu1 %vm1401_vm7, %v2132_v53 }
 0xb4e   : > { %3266 = vmatpush3.bf16.xpose.msra.mxu1 %v2255_v54  ;;  %3267 = vmatprep.mubr.msk.bf16.mxu1 %vm4104_vm1, %v4103_v14 }
 0xb4f   : > { %3277 = vmatprep.subr.bf16.mxu1 %v4103_v14 }
 0xb50   : > { %v2248_v56 = vpop.permute.xlu1 %2247 }
 0xb54   : > { %v2358_v58 = vpop.permute.xlu1 %2357 }
 0xb55   : > { %3268 = vmatmul.mubr.msk.bf16.vlgmr.msra.gmra.mrb[36].mxu1 %vm1401_vm7, %v2248_v56 }
 0xb56   : > { %3278 = vmatpush3.bf16.xpose.msra.mxu1 %v2365_v57  ;;  %3279 = vmatprep.mubr.msk.bf16.mxu1 %vm4104_vm1, %v4103_v14 }
 0xb57   : > { %3289 = vmatprep.subr.bf16.mxu1 %v4103_v14 }
 0xb5d   : > { %3280 = vmatmul.mubr.msk.bf16.vlgmr.msra.gmra.mrb[40].mxu1 %vm1401_vm7, %v2358_v58 }
 0xb5e   : > { %3293 = vmatprep.mubr.msk.bf16.mxu1 %vm4104_vm1, %v4103_v14 }
 0xbad   : > { %v2066_v60 = vpop.f32.mrb[28].mxu1 }
 0xbae   : > { %v2067_v61 = vadd.f32 %v2066_v60, %v1962_v59  ;;  %v3245_v62 = vpop.f32.mrb[29].mxu1 }
 0xbaf   : > { %v2069_v63 = vpop.f32.mrb[30].mxu1 }
 0xbb0   : > { %v3246_v1 = vpop.f32.mrb[31].mxu1  ;;  %v2072_v2 = vsel %vm1401_vm7, %v2067_v61, -inf }
 0xbb1   : > { %2073 = vmax.xlane.f32.xlu0 %v2072_v2 }
 0xc20   : > { %v2178_v3 = vpop.f32.mrb[32].mxu1 }
 0xc21   : > { %v2179_v4 = vadd.f32 %v2178_v3, %v1962_v59  ;;  %v3257_v5 = vpop.f32.mrb[33].mxu1 }
 0xc22   : > { %v2181_v6 = vpop.f32.mrb[34].mxu1 }
 0xc23   : > { %v3258_v7 = vpop.f32.mrb[35].mxu1  ;;  %v2184_v8 = vsel %vm1401_vm7, %v2179_v4, -inf  ;;  %v3540_v6 = vld [vmem:[#allocation25] sm:$0xff]  }
 0xc24   : > { %2185 = vmax.xlane.f32.xlu1 %v2184_v8  ;;  %3290 = vmatpush3.bf16.msra.mxu1 %v3540_v6 }
 0xc25   : > { %3291 = vmatprep.subr.bf16.mxu1 %v4103_v14 }
 0xc28   : > { %v2291_v9 = vpop.f32.mrb[36].mxu1 }
 0xc29   : > { %v2292_v10 = vadd.f32 %v2291_v9, %v1962_v59  ;;  %v3269_v11 = vpop.f32.mrb[37].mxu1 }
 0xc2a   : > { %v2294_v13 = vpop.f32.mrb[38].mxu1 }
 0xc2b   : > { %v3270_v15 = vpop.f32.mrb[39].mxu1  ;;  %v2297_v16 = vsel %vm1401_vm7, %v2292_v10, -inf }
 0xc2c   : > { %2298 = vmax.xlane.f32.xlu0 %v2297_v16 }
 0xc30   : > { %v2401_v18 = vpop.f32.mrb[40].mxu1 }
 0xc31   : > { %v2402_v19 = vadd.f32 %v2401_v18, %v1962_v59  ;;  %v3281_v20 = vpop.f32.mrb[41].mxu1  ;;  %v3541_v18 = vld [vmem:[#allocation25 + $0x8] sm:$0xff]  }
 0xc32   : > { %v2404_v21 = vpop.f32.mrb[42].mxu1  ;;  %3292 = vmatpush3.bf16.msra.mxu1 %v3541_v18 }
 0xc33   : > { %v3282_v22 = vpop.f32.mrb[43].mxu1  ;;  %v2407_v23 = vsel %vm1401_vm7, %v2402_v19, -inf  ;;  %3305 = vmatprep.subr.bf16.mxu1 %v4103_v14 }
 0xc34   : > { %2408 = vmax.xlane.f32.xlu0 %v2407_v23 }
 0xc3e   : > { %v2074_v24 = vpop.xlane.xlu0 %2073 }
 0xc3f   : > { %v2075_v0 = vsub.f32 %v2067_v61, %v2074_v24 }
 0xc41   : > { %v2076_v25 = vmul.f32 1.442695, %v2075_v0 }
 0xc43   : > { %3576 = vpow2.f32 %v2076_v25 }
 0xc4d   : > { %v3577_v26 = vpop.eup %3576 }
 0xc4e   : > { %v2078_v27 = vsel %vm1401_vm7, %v3577_v26, 0.0 }
 0xc4f   : > { %2079 = vadd.xlane.f32.xlu0 %v2078_v27 }
 0xcb1   : > { %v2186_v12 = vpop.xlane.xlu1 %2185 }
 0xcb2   : > { %v2187_v28 = vsub.f32 %v2179_v4, %v2186_v12 }
 0xcb4   : > { %v2188_v29 = vmul.f32 1.442695, %v2187_v28  ;;  %v3053_v28 = vld [vmem:[#allocation27] ss:$0 sm:$0xff] }
 0xcb6   : > { %3578 = vpow2.f32 %v2188_v29 }
 0xcb9   : > { %v2299_v30 = vpop.xlane.xlu0 %2298 }
 0xcba   : > { %v2300_v31 = vsub.f32 %v2292_v10, %v2299_v30 }
 0xcbc   : > { %v2301_v32 = vmul.f32 1.442695, %v2300_v31 }
 0xcbe   : > { %3580 = vpow2.f32 %v2301_v32 }
 0xcc0   : > { %v3579_v33 = vpop.eup %3578 }
 0xcc1   : > { %v2190_v34 = vsel %vm1401_vm7, %v3579_v33, 0.0  ;;  %v2409_v38 = vpop.xlane.xlu0 %2408 }
 0xcc2   : > { %2191 = vadd.xlane.f32.xlu1 %v2190_v34  ;;  %v2410_v41 = vsub.f32 %v2402_v19, %v2409_v38 }
 0xcc4   : > { %v2411_v42 = vmul.f32 1.442695, %v2410_v41 }
 0xcc8   : > { %v3581_v35 = vpop.eup %3580 }
 0xcc9   : > { %v2303_v36 = vsel %vm1401_vm7, %v3581_v35, 0.0 }
 0xcca   : > { %2304 = vadd.xlane.f32.xlu0 %v2303_v36 }
 0xcd3   : > { %2309 = vrot.lane.b32.xlu1 %v3047_v37, %s4107_s6  ;;  %s5072_s6 = sld [smem:[#allocation63_spill]] }
 0xcd9   : > { %v3068_v6 = vld [vmem:[%s5072_s6] ss:$0 sm:$0xff] }
 0xcdc   : > { %v2080_v39 = vpop.xlane.xlu0 %2079 }
 0xcdd   : > { %3582 = vrcp.f32 %v2080_v39 }
 0xcde   : > { %3584 = vpow2.f32 %v2411_v42  ;;  %v3542_v42 = vld [vmem:[%s4982_s20] sm:$0xff]  }
 0xce0   : > { %2199 = vrot.lane.b32.xlu0 %v3047_v37, %s4105_s2 }
 0xce7   : > { %v3583_v43 = vpop.eup %3582 }
 0xce8   : > { %v2082_v44 = vmul.f32 %v3583_v43, %v3577_v26  ;;  %v3585_v46 = vpop.eup %3584 }
 0xce9   : > { %v2413_v40 = vsel %vm1401_vm7, %v3585_v46, 0.0 }
 0xcea   : > { %v2083_v45 = vpack.c.bf16 %v2082_v44, %v2082_v44 }
 0xcec   : > { %3250 = vmatmul.mubr.msk.bf16.vlgmr.msra.gmra.mrb[32].mxu0 %vm1401_vm7, %v2083_v45 }
 0xced   : > { %3261 = vmatprep.mubr.msk.bf16.mxu0 %vm4104_vm1, %v4103_v14 }
 0xcf7   : > { %2414 = vadd.xlane.f32.xlu1 %v2413_v40 }
 0xd08   : > { %2419 = vrot.lane.b32.xlu1 %v3047_v37, %s4106_s7  ;;  %s5068_s7 = sld [smem:[#allocation62_spill]] }
 0xd0e   : > { %v3544_v43 = vld [vmem:[%s5068_s7] sm:$0xff]  }
 0xd4f   : > { %v2192_v47 = vpop.xlane.xlu1 %2191 }
 0xd50   : > { %3586 = vrcp.f32 %v2192_v47 }
 0xd53   : > { %v2310_v53 = vpop.permute.xlu1 %2309 }
 0xd54   : > { %v2315_v55 = vsel %vm1463_vm8, %v2310_v53, 0 }
 0xd57   : > { %v2305_v48 = vpop.xlane.xlu0 %2304 }
 0xd58   : > { %3588 = vrcp.f32 %v2305_v48 }
 0xd5a   : > { %v3587_v49 = vpop.eup %3586 }
 0xd5b   : > { %v2194_v50 = vmul.f32 %v3587_v49, %v3579_v33  ;;  %v2200_v51 = vpop.permute.xlu0 %2199 }
 0xd5c   : > { %v2205_v52 = vsel %vm1463_vm8, %v2200_v51, 0 }
 0xd5d   : > { %3260 = vmatpush3.bf16.msra.mxu0 %v2205_v52  ;;  %v2195_v54 = vpack.c.bf16 %v2194_v50, %v2194_v50 }
 0xd5e   : > { %3271 = vmatprep.subr.bf16.mxu0 %v4103_v14 }
 0xd60   : > { %3262 = vmatmul.mubr.msk.bf16.vlgmr.msra.gmra.mrb[36].mxu0 %vm1401_vm7, %v2195_v54 }
 0xd61   : > { %3272 = vmatpush3.bf16.msra.mxu0 %v2315_v55  ;;  %3273 = vmatprep.mubr.msk.bf16.mxu0 %vm4104_vm1, %v4103_v14  ;;  %v2569_v55 = vstv %s3058_s4  ;;  %s981_s4 = scalar_lea.vmem [#allocation29], %s2998_s28 }
 0xd62   : > { %v3589_v56 = vpop.eup %3588  ;;  %3283 = vmatprep.subr.bf16.mxu0 %v4103_v14  ;;  %s2741_s13 = sshll.u32 %s981_s4, 4  ;;  %s4916_s13 = int_to_ptr.vmem [resolvable:$true] %s2741_s13 }
 0xd63   : > { %v2307_v57 = vmul.f32 %v3589_v56, %v3581_v35  ;;  %s3975_s26 = scalar_lea.vmem %s4916_s13, 128 }
 0xd64   : > { %p3976_p1 = scmp.ne.s32.totalorder %s4916_s13, %s3975_s26 }
 0xd65   : > { %v2308_v58 = vpack.c.bf16 %v2307_v57, %v2307_v57 }
 0xd68   : > { %3274 = vmatmul.mubr.msk.bf16.vlgmr.msra.gmra.mrb[40].mxu0 %vm1401_vm7, %v2308_v58 }
 0xd69   : > { %3285 = vmatprep.mubr.msk.bf16.mxu0 %vm4104_vm1, %v4103_v14 }
 0xd84   : > { %v2415_v59 = vpop.xlane.xlu1 %2414 }
 0xd85   : > { %3590 = vrcp.f32 %v2415_v59 }
 0xd88   : > { %v2420_v60 = vpop.permute.xlu1 %2419 }
 0xd89   : > { %v2425_v61 = vsel %vm1463_vm8, %v2420_v60, 0 }
 0xd8a   : > { %3284 = vmatpush3.bf16.msra.mxu0 %v2425_v61  ;;  %v3059_v61 = vld [vmem:[%s5071_s21] ss:$0 sm:$0xff]  ;;  %s3979_s21 = sshll.u32 %s4111_s29, 4  ;;  %s3980_s21 = int_to_ptr.vmem [resolvable:$false] %s3979_s21 }
 0xd8b   : > { %3297 = vmatprep.subr.bf16.mxu0 %v4103_v14  ;;  %s3981_s28 = scalar_lea.vmem %s3980_s21, 256  ;;  %p3982_p0 = scmp.lt.s32.totalorder %s4916_s13, %s3980_s21 }
 0xd8c   : > { %p3983_p2 = scmp.lt.s32.totalorder %s3981_s28, %s3975_s26 }
 0xd8e   : > { %p3984_p4 = por %p3983_p2, %p3982_p0 }
 0xd8f   : > { %v3591_v62 = vpop.eup %3590 }
 0xd90   : > { %v2417_v63 = vmul.f32 %v3591_v62, %v3585_v46 }
 0xd92   : > { %v2418_v1 = vpack.c.bf16 %v2417_v63, %v2417_v63 }
 0xd94   : > { %3286 = vmatmul.mubr.msk.bf16.vlgmr.msra.gmra.mrb[44].mxu0 %vm1401_vm7, %v2418_v1 }
 0xd95   : > { %3301 = vmatprep.mubr.msk.bf16.mxu0 %vm4104_vm1, %v4103_v14  ;;  %3298 = vmatpush3.bf16.msra.mxu0 %v3542_v42 }
 0xd96   : > { %3299 = vmatprep.subr.bf16.mxu0 %v4103_v14 }
 0xdbf   : > { %v2124_v2 = vpop.f32.mrb[32].mxu0 }
 0xdc0   : > { %v3251_v3 = vpop.f32.mrb[33].mxu0 }
 0xdc1   : > { %v2127_v4 = vpop.f32.mrb[34].mxu0 }
 0xdc2   : > { %v3252_v5 = vpop.f32.mrb[35].mxu0 }
 0xe33   : > { %v2241_v7 = vpop.f32.mrb[36].mxu0 }
 0xe34   : > { %2468 = vrot.lane.b32.xlu1 %v2241_v7, %s4108_s3  ;;  %v3263_v8 = vpop.f32.mrb[37].mxu0  ;;  %s5073_s3 = sld [smem:[#allocation45_spill]] }
 0xe35   : > { %v2244_v9 = vpop.f32.mrb[38].mxu0 }
 0xe36   : > { %v3264_v10 = vpop.f32.mrb[39].mxu0 }
 0xe3a   : > { %p5075_p7 = scmp.ne.s32.totalorder %s5073_s3, 0 }
 0xe3b   : > { %v2351_v11 = vpop.f32.mrb[40].mxu0 }
 0xe3c   : > { %2472 = vrot.lane.b32.xlu0 %v2351_v11, %s4109_s5  ;;  %v3275_v13 = vpop.f32.mrb[41].mxu0  ;;  %s5069_s5 = smov %s5068_s7  ;;  %p3977_p9 = pnand %p3976_p1, %p5075_p7 }
 0xe3d   : > { %v2354_v15 = vpop.f32.mrb[42].mxu0  ;;  %v3545_v44 = vld [vmem:[%s5069_s5 + $0x8] sm:$0xff]   ;;  %v3546_v59 = vld [vmem:[%s5069_s5 + $0x10] sm:$0xff]   ;;  %v3547_v60 = vld [vmem:[%s5069_s5 + $0x18] sm:$0xff]  }
 0xe3e   : > { %v3276_v16 = vpop.f32.mrb[43].mxu0  ;;  %p3978_p12 = pneg %p3977_p9 }
 0xe40   : > { %p3985_p8 = pnand %p3984_p4, %p3978_p12 }
 0xe67   : > { %v2461_v19 = vpop.f32.mrb[44].mxu0 }
 0xe68   : > { %2476 = vrot.lane.b32.xlu1 %v2461_v19, %s4110_s22  ;;  %v3287_v20 = vpop.f32.mrb[45].mxu0  ;;  %s3057_s22 = sld [smem:[#allocation28 + $0x100]] }
 0xe69   : > { %v2464_v21 = vpop.f32.mrb[46].mxu0 }
 0xe6a   : > { %v3288_v22 = vpop.f32.mrb[47].mxu0 }
 0xe6e   : > { %v2557_v52 = vstv %s3057_s22  ;;  %s3070_s22 = sshll.u32 %s4077_s30, 7  ;;  %s2727_s30 = scalar_lea.sflag [#allocation8], %s979_s10 }
 0xe6f   : > { %s4914_s1 = scalar_lea.hbm %s5074_s23, %s3070_s22 }
 0xea6   : > { %v2469_v23 = vpop.permute.xlu1 %2468 }
 0xea7   : > { %v2479_v0 = vsel %vm1401_vm7, %v2124_v2, %v2469_v23 }
 0xeae   : > { %v2473_v24 = vpop.permute.xlu0 %2472 }
 0xeaf   : > { %v2480_v25 = vsel %vm1857_vm9, %v2479_v0, %v2473_v24 }
 0xeda   : > { %v2477_v26 = vpop.permute.xlu1 %2476 }
 0xedb   : > { %v2481_v27 = vsel %vm1859_vm10, %v2480_v25, %v2477_v26 }
 0xedc   : > { %v2482_v12 = vpack.c.bf16 %v2481_v27, %v2481_v27 }
 0xede   : > { %3294 = vmatmul.mubr.msk.bf16.vlgmr.msra.gmra.mrb[44].mxu1 %vm998_vm0, %v2482_v12 }
 0xedf   : > { %3313 = vmatprep.mubr.msk.bf16.mxu1 %vm4104_vm1, %v4103_v14  ;;  %3306 = vmatpush3.bf16.msra.mxu1 %v3544_v43 }
 0xee0   : > { %3307 = vmatprep.subr.bf16.mxu1 %v4103_v14 }
 0xee3   : > { %3308 = vmatpush3.bf16.msra.mxu1 %v3545_v44 }
 0xee4   : > { %3309 = vmatprep.subr.bf16.mxu1 %v4103_v14 }
 0xee7   : > { %3310 = vmatpush3.bf16.msra.mxu1 %v3546_v59 }
 0xee8   : > { %3311 = vmatprep.subr.bf16.mxu1 %v4103_v14 }
 0xeeb   : > { %3312 = vmatpush3.bf16.msra.mxu1 %v3547_v60 }
 0xfb1   : > { %v2538_v29 = vpop.f32.mrb[44].mxu1 }
 0xfb2   : > { %v2539_v30 = vadd.f32 %v3053_v28, %v2538_v29  ;;  %v3295_v31 = vpop.f32.mrb[45].mxu1 }
 0xfb3   : > { %v2541_v32 = vpop.f32.mrb[46].mxu1 }
 0xfb4   : > { %v4873_v33 = vadd.f32 %v2539_v30, %v4784_v17  ;;  %v3296_v34 = vpop.f32.mrb[47].mxu1  ;;  %v3543_v17 = vld [vmem:[%s4982_s20 + $0x8] sm:$0xff]  }
 0xfb5   : > { %3300 = vmatpush3.bf16.msra.mxu0 %v3543_v17 }
 0xfb6   : > { %v2547_v35 = vsel %vm998_vm0, %v4873_v33, 0.0 }
 0xfb7   : > { %2548 = vadd.xlane.f32.xlu0 %v2547_v35 }
0x1044   : > { %v2549_v36 = vpop.xlane.xlu0 %2548 }
0x1045   : > { %v2550_v37 = vmul.f32 0.03125, %v2549_v36 }
0x1047   : > { %v2551_v38 = vsub.f32 %v4873_v33, %v2550_v37 }
0x1049   : > { %v2552_v39 = vmul.f32 %v2551_v38, %v2551_v38  ;;  %v2558_v53 = vmul.f32 %v2557_v52, %v2551_v38 }
0x104b   : > { %v2553_v41 = vsel %vm998_vm0, %v2552_v39, 0.0 }
0x104c   : > { %2554 = vadd.xlane.f32.xlu1 %v2553_v41 }
0x10d9   : > { %v2555_v45 = vpop.xlane.xlu1 %2554 }
0x10da   : > { %v2556_v46 = vmul.f32 0.032258064, %v2555_v45 }
0x10dc   : > { %3592 = vrsqrt.f32 %v2556_v46  ;;  %vm2561_vm13 = vcmp.eq.f32.partialorder %v2556_v46, inf  ;;  %v2564_v48 = vand.u32 2147483648, %v2556_v46  ;;  %vm2563_vm14 = vcmp.eq.f32.partialorder %v2556_v46, 0.0 }
0x10e6   : > { %v3593_v40 = vpop.eup %3592 }
0x10e7   : > { %v2560_v47 = vmul.f32 %v3593_v40, %v2556_v46 }
0x10e9   : > { %v2562_v49 = vsel %vm2561_vm13, %v2556_v46, %v2560_v47 }
0x10ea   : > { %v2565_v50 = vsel %vm2563_vm14, %v2564_v48, %v2562_v49 }
0x10eb   : > { %v2566_v51 = vadd.f32 1e-06, %v2565_v50 }
0x10ed   : > { %3594 = vrcp.f32 %v2566_v51 }
0x10f7   : > { %v3595_v54 = vpop.eup %3594 }
0x10f8   : > { %v2568_v56 = vmul.f32 %v3595_v54, %v2558_v53 }
0x10fa   : > { %v2570_v57 = vadd.f32 %v2569_v55, %v2568_v56 }
0x10fc   : > { %v2571_v58 = vpack.c.bf16 %v2570_v57, %v2570_v57 }
0x10fe   : > { %3302 = vmatmul.mubr.msk.bf16.vlgmr.msra.gmra.mrb[48].mxu0 %vm998_vm0, %v2571_v58 }
0x11d1   : > { %v2632_v62 = vpop.f32.mrb[48].mxu0 }
0x11d2   : > { %v2633_v63 = vadd.f32 %v3059_v61, %v2632_v62  ;;  %v3303_v1 = vpop.f32.mrb[49].mxu0 }
0x11d3   : > { %v2635_v2 = vpop.f32.mrb[50].mxu0 }
0x11d4   : > { %v2638_v3 = vmax.f32 %v2633_v63, 0.0  ;;  %v3304_v4 = vpop.f32.mrb[51].mxu0 }
0x11d6   : > { %v2639_v5 = vpack.c.bf16 %v2638_v3, %v2638_v3 }
0x11d8   : > { %3314 = vmatmul.mubr.msk.bf16.vlgmr.msra.gmra.mrb[48].mxu1 %vm2672_vm15, %v2639_v5 }
0x12ab   : > { %v2710_v14 = vpop.f32.mrb[48].mxu1 }
0x12ac   : > { %v2716_v7 = vadd.f32 %v2710_v14, %v4873_v33  ;;  %v3315_v8 = vpop.f32.mrb[49].mxu1 }
0x12ad   : > { %v2713_v9 = vpop.f32.mrb[50].mxu1 }
0x12ae   : > { %v2724_v10 = vadd.f32 %v3068_v6, %v2716_v7  ;;  %v3316_v11 = vpop.f32.mrb[51].mxu1 }
0x12b0   : > { %2725 = vst.msk [vmem:[%s981_s4] sm:$0xff] %vm998_vm0, %v2724_v10 }
0x12b1   : > { %3988 = shalt.err (!%p3985_p8)
}
0x12b2   : > { %s3989_s10 = scalar_lea.hbm %s4914_s1, 128  ;;  %s3993_s6 = scalar_lea.hbm %s5074_s23, 256 }
0x12b3   : > { %p3990_p10 = scmp.ne.s32.totalorder %s4914_s1, %s3989_s10  ;;  %p3994_p5 = scmp.lt.u32.totalorder %s4914_s1, %s5074_s23 }
0x12b4   : > { %p3995_p6 = scmp.lt.u32.totalorder %s3993_s6, %s3989_s10  ;;  %p3997_p1 = scmp.lt.u32.totalorder %s3989_s10, %s4914_s1 }
0x12b5   : > { %p3991_p11 = pnand %p3990_p10, %p5075_p7 }
0x12b6   : > { %p3996_p13 = por %p3995_p6, %p3994_p5 }
0x12b7   : > { %p3992_p3 = pneg %p3991_p11 }
0x12b8   : > { %p3998_p9 = por %p3997_p1, %p3996_p13 }
0x12ba   : > { %p3999_p12 = pnand %p3998_p9, %p3992_p3 }
0x12bc   : > { %4002 = shalt.err (!%p3999_p12)
}
0x12bd   : > { %3373 = dma.vmem_to_hbm [thread:$0]  (%p5075_p7), %s4916_s13, 128, %s4914_s1, %s2727_s30  }
0x12be PF: > { %s5076_s27 = sld [smem:[#allocation43_spill]]  ;;  %s5077_s15 = sld [smem:[#allocation39_spill]] }
0x12bf   : > { %s5078_s26 = sld [smem:[#allocation46_spill]] }
0x12c4   : > { %p3450_p0 = scmp.ge.s32.totalorder %s5076_s27, 2  ;;  %s2753_s29 = sand.u32 1, %s5077_s15  }
0x12c5   : > { %p5079_p2 = scmp.ne.s32.totalorder %s5078_s26, 0  ;;  %s2754_s21 = scalar_lea.sflag [#allocation8], %s2753_s29 }
0x12c7   : > { %p3419_p4 = pnand %p3450_p0, %p5079_p2 }
0x12c9   : > { %4060 = dma.done.wait (!%p3419_p4), %s2754_s21, 128  }
0x12ca   : > { %4062 = vsyncadd (!%p3419_p4), %s2754_s21, 4294967168  ;;  %s46_s3 = sadd.s32 1, %s5076_s27   ;;  %s5080_s29 = sld [smem:[#allocation40_spill]] }
0x12cb   : > { %p43_p8 = scmp.ge.s32.totalorder %s46_s3, 4   ;;  %s5081_s2 = sld [smem:[#allocation41_spill]] }
0x12cc   : > { %s5082_s6 = sld [smem:[#allocation47_spill]]  ;;  %s5083_s30 = sld [smem:[#allocation42_spill]] }
0x12cd   : > { %s5084_s7 = sld [smem:[#allocation44_spill]]  ;;  %45 = sbr.rel (!%p43_p8) target bundleno = 30 (0x1e), region = 223 }
0x12d4   :  { %2759 = vsyncpa [#allocation7], 1 }
0x12d5   :  { %2761 = vsyncpa [#allocation7 + $0x1], 1 }
0x12d6   :  { %2762 = vsyncpa [#allocation11], 1 }
0x12d7   :  { %2763 = vsyncpa [#allocation14], 1 }
0x12d8   :  { %2764 = vsyncpa [#allocation17], 1 }
0x12d9   :  { %2765 = vsyncpa [#allocation20], 1 }
0x12da   :  { %2766 = vsyncpa [#allocation23], 1 }
0x12db   :  { %2767 = vsyncpa [#allocation26], 1 }
0x12dc   :  { %2768 = vsyncpa [#allocation8], 1 }
0x12dd   :  { %2770 = vsyncpa [#allocation8 + $0x1], 1 }
0x12de   :  { %2771 = vsyncpa [#allocation9], 1 }
0x12df   :  { %2773 = vsyncpa [#allocation9 + $0x1], 1 }

</bundles_post_ra>
